<compile_context>
chip_gen: v7x
topology: tpu7x:2x2x1
jax: 0.10.0
libtpu: 0.0.40
codegen_flags: <defaults>
</compile_context>

<pallas_src>
import jax
import jax.numpy as jnp
from jax.experimental import pallas as pl
from jax.experimental.pallas import tpu as pltpu

# ----------------------------- configuration --------------------------------
D_INPUT = 16      # d_input
D_MODEL = 32      # d_model
N_HEAD = 4        # n_head
D_K = 8           # d_k
D_V = 8           # d_v
D_INNER = 64      # d_inner
N_LAYERS = 2      # n_layers
EPS_IN = 1e-12    # BertNonFusedLayerNorm eps (layer_norm_in)
EPS_LN = 1e-5     # nn.LayerNorm default eps (inside MHA / FFN sublayers)
NEG_INF = -1e30   # masked_fill(-inf) substitute (underflows to 0 after exp)


# ------------------------------ kernel helpers -------------------------------
def _layer_norm(x, gamma, beta, eps):
    """TF-style layernorm over the last axis (matches BertNonFusedLayerNorm)."""
    u = jnp.mean(x, axis=-1, keepdims=True)
    d = x - u
    s = jnp.mean(d * d, axis=-1, keepdims=True)
    return gamma * (d * jax.lax.rsqrt(s + eps)) + beta


# ------------------------------ fused Pallas kernel --------------------------
def encoder_kernel(lens_ref,                                    # SMEM (scalar prefetch)
                   x_ref, pe_ref,
                   w_in_ref, b_in_ref, g_in_ref, beta_in_ref,
                   wq_ref, bq_ref, wk_ref, bk_ref, wv_ref, bv_ref,
                   wo_ref, bo_ref, ln1_g_ref, ln1_b_ref,
                   fw1_ref, fb1_ref, fw2_ref, fb2_ref,
                   ln2_g_ref, ln2_b_ref,
                   o_ref, ctx_ref):
    nb, t, _ = x_ref.shape
    rows = nb * t
    b0 = pl.program_id(0) * nb

    # ---- masks rebuilt from sequence lengths (SMEM scalars; no HBM masks) ---
    rvec = jax.lax.broadcasted_iota(jnp.int32, (rows, 1), 0)    # flat row index
    srow = jax.lax.broadcasted_iota(jnp.int32, (rows, t), 0)    # flat row index
    kcol = jax.lax.broadcasted_iota(jnp.int32, (rows, t), 1)    # key position
    npm = jnp.zeros((rows, 1), jnp.float32)                     # non-pad mask
    klen = jnp.zeros((rows, t), jnp.int32)                      # per-row length
    for e in range(nb):                                         # static, small
        length = lens_ref[b0 + e]
        in_e = (srow >= e * t) & (srow < (e + 1) * t)
        klen = jnp.where(in_e, length, klen)
        npm = jnp.where((rvec >= e * t) & (rvec < e * t + length), 1.0, npm)
    key_pad = kcol >= klen                                      # True on padded keys

    # ---- linear_in -> BertNonFusedLayerNorm -> + PE (dropout = identity) ----
    x = x_ref[...].reshape(rows, D_INPUT)
    enc = jnp.dot(x, w_in_ref[...], preferred_element_type=jnp.float32) + b_in_ref[...]
    enc = _layer_norm(enc, g_in_ref[...], beta_in_ref[...], EPS_IN)
    enc = (enc.reshape(nb, t, D_MODEL) + pe_ref[...][None]).reshape(rows, D_MODEL)

    inv_temp = 1.0 / (D_K ** 0.5)
    for l in range(N_LAYERS):                   # all layers fused in one kernel
        # ---- multi-head self-attention: QKV over all NB*T tokens at once ----
        q = jnp.dot(enc, wq_ref[l], preferred_element_type=jnp.float32) + bq_ref[l]
        k = jnp.dot(enc, wk_ref[l], preferred_element_type=jnp.float32) + bk_ref[l]
        v = jnp.dot(enc, wv_ref[l], preferred_element_type=jnp.float32) + bv_ref[l]
        q3 = (q * inv_temp).reshape(nb, t, N_HEAD * D_K)
        k3 = k.reshape(nb, t, N_HEAD * D_K)
        v3 = v.reshape(nb, t, N_HEAD * D_V)
        for h in range(N_HEAD):                 # static loop; batched dots over examples
            qh = q3[:, :, h * D_K:(h + 1) * D_K]
            kh = k3[:, :, h * D_K:(h + 1) * D_K]
            vh = v3[:, :, h * D_V:(h + 1) * D_V]
            s = jnp.einsum('bqd,bkd->bqk', qh, kh,
                           preferred_element_type=jnp.float32)      # (nb, t, t)
            s = s.reshape(rows, t)
            s = jnp.where(key_pad, NEG_INF, s)
            s = s - jnp.max(s, axis=-1, keepdims=True)
            p = jnp.exp(s)
            p = p * pl.reciprocal(jnp.sum(p, axis=-1, keepdims=True), approx=True)
            ctx_ref[:, :, h * D_V:(h + 1) * D_V] = jnp.einsum(
                'bqk,bkd->bqd', p.reshape(nb, t, t), vh,
                preferred_element_type=jnp.float32)
        ctx = ctx_ref[...].reshape(rows, N_HEAD * D_V)
        attn = jnp.dot(ctx, wo_ref[l], preferred_element_type=jnp.float32) + bo_ref[l]
        y = _layer_norm(attn + enc, ln1_g_ref[l], ln1_b_ref[l], EPS_LN) * npm

        # ---- position-wise feed-forward -------------------------------------
        hidden = jnp.maximum(
            jnp.dot(y, fw1_ref[l], preferred_element_type=jnp.float32) + fb1_ref[l], 0.0)
        ff = jnp.dot(hidden, fw2_ref[l], preferred_element_type=jnp.float32) + fb2_ref[l]
        enc = _layer_norm(ff + y, ln2_g_ref[l], ln2_b_ref[l], EPS_LN) * npm

    o_ref[...] = enc.reshape(nb, t, D_MODEL)


# ------------------------------ glue (plain JAX) ------------------------------
def sinusoid_pe(length, d_model):
    pos = jnp.arange(length, dtype=jnp.float32)[:, None]
    div = jnp.exp(jnp.arange(0, d_model, 2, dtype=jnp.float32)
                  * -(jnp.log(10000.0) / d_model))
    pe = jnp.zeros((length, d_model), jnp.float32)
    pe = pe.at[:, 0::2].set(jnp.sin(pos * div))
    pe = pe.at[:, 1::2].set(jnp.cos(pos * div))
    return pe


def _full_spec(shape):
    nd = len(shape)
    return pl.BlockSpec(shape, lambda b, lens, _n=nd: (0,) * _n)


def _batched_spec(shape):
    nd = len(shape)
    return pl.BlockSpec(shape, lambda b, lens, _n=nd: (b,) + (0,) * (_n - 1))


def _pick_block_batch(n, t, min_rows=256):
    """Smallest divisor of n whose row count (nb*t) reaches the MXU target, else n."""
    for d in range(1, n + 1):
        if n % d == 0 and d * t >= min_rows:
            return d
    return n


def encoder_forward(padded_input, input_lengths, params):
    n, t, _ = padded_input.shape
    assert t % 8 == 0, "sequence length must be a multiple of 8 (sublane tile)"
    nb = _pick_block_batch(n, t)
    grid = (n // nb,)

    pe = sinusoid_pe(t, D_MODEL)
    lens = input_lengths.astype(jnp.int32)

    layer_names = ["wq", "bq", "wk", "bk", "wv", "bv", "wo", "bo",
                   "ln1_g", "ln1_b", "w1", "b1", "w2", "b2", "ln2_g", "ln2_b"]
    layer_args = [jnp.stack([lp[nm] for lp in params["layers"]], axis=0)
                  for nm in layer_names]
    layer_specs = [_full_spec(a.shape) for a in layer_args]

    grid_spec = pltpu.PrefetchScalarGridSpec(
        num_scalar_prefetch=1,                    # input_lengths -> SMEM
        grid=grid,
        in_specs=[
            _batched_spec((nb, t, D_INPUT)),      # padded_input block
            _full_spec((t, D_MODEL)),             # positional encoding
            _full_spec((D_INPUT, D_MODEL)),       # w_in
            _full_spec((1, D_MODEL)),             # b_in
            _full_spec((1, D_MODEL)),             # ln_in gamma
            _full_spec((1, D_MODEL)),             # ln_in beta
        ] + layer_specs,
        out_specs=_batched_spec((nb, t, D_MODEL)),
        scratch_shapes=[pltpu.VMEM((nb, t, N_HEAD * D_V), jnp.float32)],
    )

    return pl.pallas_call(
        encoder_kernel,
        grid_spec=grid_spec,
        out_shape=jax.ShapeDtypeStruct((n, t, D_MODEL), jnp.float32),
        compiler_params=pltpu.CompilerParams(dimension_semantics=("parallel",)),
    )(lens, padded_input, pe,
      params["w_in"], params["b_in"], params["ln_in_g"], params["ln_in_b"],
      *layer_args)


# --------------------------- deterministic params ----------------------------
def init_params(key):
    keys = iter(jax.random.split(key, 2 + 12 * N_LAYERS))

    def w(shape, scale=0.05):
        return jax.random.normal(next(keys), shape, jnp.float32) * scale

    params = {
        "w_in": w((D_INPUT, D_MODEL)),
        "b_in": w((1, D_MODEL), 0.01),
        "ln_in_g": jnp.ones((1, D_MODEL), jnp.float32),
        "ln_in_b": jnp.zeros((1, D_MODEL), jnp.float32),
        "layers": [],
    }
    for _ in range(N_LAYERS):
        params["layers"].append({
            "wq": w((D_MODEL, N_HEAD * D_K)), "bq": w((1, N_HEAD * D_K), 0.01),
            "wk": w((D_MODEL, N_HEAD * D_K)), "bk": w((1, N_HEAD * D_K), 0.01),
            "wv": w((D_MODEL, N_HEAD * D_V)), "bv": w((1, N_HEAD * D_V), 0.01),
            "wo": w((N_HEAD * D_V, D_MODEL)), "bo": w((1, D_MODEL), 0.01),
            "ln1_g": jnp.ones((1, D_MODEL), jnp.float32),
            "ln1_b": jnp.zeros((1, D_MODEL), jnp.float32),
            "w1": w((D_MODEL, D_INNER)), "b1": w((1, D_INNER), 0.01),
            "w2": w((D_INNER, D_MODEL)), "b2": w((1, D_MODEL), 0.01),
            "ln2_g": jnp.ones((1, D_MODEL), jnp.float32),
            "ln2_b": jnp.zeros((1, D_MODEL), jnp.float32),
        })
    return params


# ----------------------------- pure-JAX reference ----------------------------
def _ref_ln(x, g, b, eps):
    u = x.mean(-1, keepdims=True)
    s = ((x - u) ** 2).mean(-1, keepdims=True)
    return g * ((x - u) / jnp.sqrt(s + eps)) + b


def reference_forward(x, lengths, params):
    N, T, _ = x.shape
    pe = sinusoid_pe(T, D_MODEL)
    npm = (jnp.arange(T)[None, :] < lengths[:, None]).astype(jnp.float32)[..., None]
    key_pad = jnp.arange(T)[None, :] >= lengths[:, None]          # (N, T) bool
    enc = _ref_ln(x @ params["w_in"] + params["b_in"],
                  params["ln_in_g"], params["ln_in_b"], EPS_IN) + pe[None]
    for lp in params["layers"]:
        q = (enc @ lp["wq"] + lp["bq"]).reshape(N, T, N_HEAD, D_K).transpose(0, 2, 1, 3)
        k = (enc @ lp["wk"] + lp["bk"]).reshape(N, T, N_HEAD, D_K).transpose(0, 2, 1, 3)
        v = (enc @ lp["wv"] + lp["bv"]).reshape(N, T, N_HEAD, D_V).transpose(0, 2, 1, 3)
        scores = jnp.einsum("nhqd,nhkd->nhqk", q, k) / (D_K ** 0.5)
        scores = jnp.where(key_pad[:, None, None, :], NEG_INF, scores)
        p = jax.nn.softmax(scores, axis=-1)
        ctx = jnp.einsum("nhqk,nhkd->nhqd", p, v).transpose(0, 2, 1, 3)
        ctx = ctx.reshape(N, T, N_HEAD * D_V)
        y = _ref_ln(ctx @ lp["wo"] + lp["bo"] + enc, lp["ln1_g"], lp["ln1_b"], EPS_LN) * npm
        f = jnp.maximum(y @ lp["w1"] + lp["b1"], 0.0) @ lp["w2"] + lp["b2"]
        enc = _ref_ln(f + y, lp["ln2_g"], lp["ln2_b"], EPS_LN) * npm
    return enc


# ----------------------------------- main ------------------------------------
if __name__ == "__main__":
    key = jax.random.PRNGKey(0)
    kx, kp = jax.random.split(key)
    N, T = 2, 8
    padded_input = jax.random.normal(kx, (N, T, D_INPUT), jnp.float32)
    input_lengths = jnp.array([8, 5], dtype=jnp.int32)
    params = init_params(kp)

    out = encoder_forward(padded_input, input_lengths, params)
    out = jax.block_until_ready(out)
    assert out.shape == (N, T, D_MODEL)

    ref = reference_forward(padded_input, input_lengths, params)
    if not jnp.allclose(out, ref, atol=2e-2, rtol=2e-2):
        raise AssertionError("Pallas encoder output deviates from JAX reference")

    print("KERNEL_OK")
</pallas_src>

<mosaic_0001>
module attributes {stable_mosaic.version = 11 : i64} {
  func.func @encoder_kernel(%arg0: i32, %arg1: memref<2xi32, #tpu.memory_space<smem>>, %arg2: memref<2x8x16xf32, #tpu.memory_space<vmem>>, %arg3: memref<8x32xf32, #tpu.memory_space<vmem>>, %arg4: memref<16x32xf32, #tpu.memory_space<vmem>>, %arg5: memref<1x32xf32, #tpu.memory_space<vmem>>, %arg6: memref<1x32xf32, #tpu.memory_space<vmem>>, %arg7: memref<1x32xf32, #tpu.memory_space<vmem>>, %arg8: memref<2x32x32xf32, #tpu.memory_space<vmem>>, %arg9: memref<2x1x32xf32, #tpu.memory_space<vmem>>, %arg10: memref<2x32x32xf32, #tpu.memory_space<vmem>>, %arg11: memref<2x1x32xf32, #tpu.memory_space<vmem>>, %arg12: memref<2x32x32xf32, #tpu.memory_space<vmem>>, %arg13: memref<2x1x32xf32, #tpu.memory_space<vmem>>, %arg14: memref<2x32x32xf32, #tpu.memory_space<vmem>>, %arg15: memref<2x1x32xf32, #tpu.memory_space<vmem>>, %arg16: memref<2x1x32xf32, #tpu.memory_space<vmem>>, %arg17: memref<2x1x32xf32, #tpu.memory_space<vmem>>, %arg18: memref<2x32x64xf32, #tpu.memory_space<vmem>>, %arg19: memref<2x1x64xf32, #tpu.memory_space<vmem>>, %arg20: memref<2x64x32xf32, #tpu.memory_space<vmem>>, %arg21: memref<2x1x32xf32, #tpu.memory_space<vmem>>, %arg22: memref<2x1x32xf32, #tpu.memory_space<vmem>>, %arg23: memref<2x1x32xf32, #tpu.memory_space<vmem>>, %arg24: memref<2x8x32xf32, #tpu.memory_space<vmem>>, %arg25: memref<2x8x32xf32, #tpu.memory_space<vmem>>) attributes {dimension_semantics = [#tpu.dimension_semantics<parallel>], iteration_bounds = array<i64: 1>, scalar_prefetch = 1 : i64, scratch_operands = 1 : i64, tpu.core_type = #tpu.core_type<tc>, window_params = [{transform_indices = @transform_0, window_bounds = array<i64: 2, 8, 16>}, {pipeline_mode = #tpu.pipeline_mode<synchronous>, transform_indices = @transform_1, window_bounds = array<i64: 8, 32>}, {pipeline_mode = #tpu.pipeline_mode<synchronous>, transform_indices = @transform_2, window_bounds = array<i64: 16, 32>}, {pipeline_mode = #tpu.pipeline_mode<synchronous>, transform_indices = @transform_3, window_bounds = array<i64: 1, 32>}, {pipeline_mode = #tpu.pipeline_mode<synchronous>, transform_indices = @transform_4, window_bounds = array<i64: 1, 32>}, {pipeline_mode = #tpu.pipeline_mode<synchronous>, transform_indices = @transform_5, window_bounds = array<i64: 1, 32>}, {pipeline_mode = #tpu.pipeline_mode<synchronous>, transform_indices = @transform_6, window_bounds = array<i64: 2, 32, 32>}, {pipeline_mode = #tpu.pipeline_mode<synchronous>, transform_indices = @transform_7, window_bounds = array<i64: 2, 1, 32>}, {pipeline_mode = #tpu.pipeline_mode<synchronous>, transform_indices = @transform_8, window_bounds = array<i64: 2, 32, 32>}, {pipeline_mode = #tpu.pipeline_mode<synchronous>, transform_indices = @transform_9, window_bounds = array<i64: 2, 1, 32>}, {pipeline_mode = #tpu.pipeline_mode<synchronous>, transform_indices = @transform_10, window_bounds = array<i64: 2, 32, 32>}, {pipeline_mode = #tpu.pipeline_mode<synchronous>, transform_indices = @transform_11, window_bounds = array<i64: 2, 1, 32>}, {pipeline_mode = #tpu.pipeline_mode<synchronous>, transform_indices = @transform_12, window_bounds = array<i64: 2, 32, 32>}, {pipeline_mode = #tpu.pipeline_mode<synchronous>, transform_indices = @transform_13, window_bounds = array<i64: 2, 1, 32>}, {pipeline_mode = #tpu.pipeline_mode<synchronous>, transform_indices = @transform_14, window_bounds = array<i64: 2, 1, 32>}, {pipeline_mode = #tpu.pipeline_mode<synchronous>, transform_indices = @transform_15, window_bounds = array<i64: 2, 1, 32>}, {pipeline_mode = #tpu.pipeline_mode<synchronous>, transform_indices = @transform_16, window_bounds = array<i64: 2, 32, 64>}, {pipeline_mode = #tpu.pipeline_mode<synchronous>, transform_indices = @transform_17, window_bounds = array<i64: 2, 1, 64>}, {pipeline_mode = #tpu.pipeline_mode<synchronous>, transform_indices = @transform_18, window_bounds = array<i64: 2, 64, 32>}, {pipeline_mode = #tpu.pipeline_mode<synchronous>, transform_indices = @transform_19, window_bounds = array<i64: 2, 1, 32>}, {pipeline_mode = #tpu.pipeline_mode<synchronous>, transform_indices = @transform_20, window_bounds = array<i64: 2, 1, 32>}, {pipeline_mode = #tpu.pipeline_mode<synchronous>, transform_indices = @transform_21, window_bounds = array<i64: 2, 1, 32>}, {transform_indices = @transform_22, window_bounds = array<i64: 2, 8, 32>}]} {
    %c2_i32 = arith.constant 2 : i32
    %0 = arith.muli %arg0, %c2_i32 : i32
    %1 = tpu.iota {dimensions = array<i32: 0>} : vector<16x1xi32>
    %2 = tpu.iota {dimensions = array<i32: 0>} : vector<16x8xi32>
    %3 = tpu.iota {dimensions = array<i32: 1>} : vector<16x8xi32>
    %cst = arith.constant 0.000000e+00 : f32
    %4 = vector.broadcast %cst : f32 to vector<16x1xf32>
    %c0_i32 = arith.constant 0 : i32
    %5 = vector.broadcast %c0_i32 : i32 to vector<16x8xi32>
    %c0_i32_0 = arith.constant 0 : i32
    %6 = arith.addi %0, %c0_i32_0 : i32
    %7 = arith.index_cast %6 : i32 to index
    %8 = memref.load %arg1[%7] : memref<2xi32, #tpu.memory_space<smem>>
    %c0_i32_1 = arith.constant 0 : i32
    %9 = vector.broadcast %c0_i32_1 : i32 to vector<16x8xi32>
    %10 = arith.cmpi sge, %2, %9 : vector<16x8xi32>
    %c8_i32 = arith.constant 8 : i32
    %11 = vector.broadcast %c8_i32 : i32 to vector<16x8xi32>
    %12 = arith.cmpi slt, %2, %11 : vector<16x8xi32>
    %13 = arith.andi %10, %12 : vector<16x8xi1>
    %14 = vector.broadcast %8 : i32 to vector<16x8xi32>
    %15 = arith.select %13, %14, %5 : vector<16x8xi1>, vector<16x8xi32>
    %c0_i32_2 = arith.constant 0 : i32
    %16 = vector.broadcast %c0_i32_2 : i32 to vector<16x1xi32>
    %17 = arith.cmpi sge, %1, %16 : vector<16x1xi32>
    %c0_i32_3 = arith.constant 0 : i32
    %18 = arith.addi %c0_i32_3, %8 : i32
    %19 = vector.broadcast %18 : i32 to vector<16x1xi32>
    %20 = arith.cmpi slt, %1, %19 : vector<16x1xi32>
    %21 = arith.andi %17, %20 : vector<16x1xi1>
    %cst_4 = arith.constant 1.000000e+00 : f32
    %22 = vector.broadcast %cst_4 : f32 to vector<16x1xf32>
    %23 = arith.select %21, %22, %4 : vector<16x1xi1>, vector<16x1xf32>
    %c1_i32 = arith.constant 1 : i32
    %24 = arith.addi %0, %c1_i32 : i32
    %25 = arith.index_cast %24 : i32 to index
    %26 = memref.load %arg1[%25] : memref<2xi32, #tpu.memory_space<smem>>
    %c8_i32_5 = arith.constant 8 : i32
    %27 = vector.broadcast %c8_i32_5 : i32 to vector<16x8xi32>
    %28 = arith.cmpi sge, %2, %27 : vector<16x8xi32>
    %c16_i32 = arith.constant 16 : i32
    %29 = vector.broadcast %c16_i32 : i32 to vector<16x8xi32>
    %30 = arith.cmpi slt, %2, %29 : vector<16x8xi32>
    %31 = arith.andi %28, %30 : vector<16x8xi1>
    %32 = vector.broadcast %26 : i32 to vector<16x8xi32>
    %33 = arith.select %31, %32, %15 : vector<16x8xi1>, vector<16x8xi32>
    %c8_i32_6 = arith.constant 8 : i32
    %34 = vector.broadcast %c8_i32_6 : i32 to vector<16x1xi32>
    %35 = arith.cmpi sge, %1, %34 : vector<16x1xi32>
    %c8_i32_7 = arith.constant 8 : i32
    %36 = arith.addi %c8_i32_7, %26 : i32
    %37 = vector.broadcast %36 : i32 to vector<16x1xi32>
    %38 = arith.cmpi slt, %1, %37 : vector<16x1xi32>
    %39 = arith.andi %35, %38 : vector<16x1xi1>
    %cst_8 = arith.constant 1.000000e+00 : f32
    %40 = vector.broadcast %cst_8 : f32 to vector<16x1xf32>
    %41 = arith.select %39, %40, %23 : vector<16x1xi1>, vector<16x1xf32>
    %42 = arith.cmpi sge, %3, %33 : vector<16x8xi32>
    %c0 = arith.constant 0 : index
    %c0_9 = arith.constant 0 : index
    %c0_10 = arith.constant 0 : index
    %43 = vector.load %arg2[%c0, %c0_9, %c0_10] : memref<2x8x16xf32, #tpu.memory_space<vmem>>, vector<2x8x16xf32>
    %44 = vector.shape_cast %43 : vector<2x8x16xf32> to vector<16x16xf32>
    %c0_11 = arith.constant 0 : index
    %c0_12 = arith.constant 0 : index
    %45 = vector.load %arg4[%c0_11, %c0_12] : memref<16x32xf32, #tpu.memory_space<vmem>>, vector<16x32xf32>
    %cst_13 = arith.constant dense<0.000000e+00> : vector<16x32xf32>
    %46 = tpu.matmul %44, %45, %cst_13 {dimension_numbers = #tpu.dot_dimension_numbers<[1], [0], [0], [1], [0, 0, 1, 1], [], []>} : vector<16x16xf32>, vector<16x32xf32>, vector<16x32xf32> -> vector<16x32xf32>
    %c0_14 = arith.constant 0 : index
    %c0_15 = arith.constant 0 : index
    %47 = vector.load %arg5[%c0_14, %c0_15] : memref<1x32xf32, #tpu.memory_space<vmem>>, vector<1x32xf32>
    %48 = vector.broadcast %47 : vector<1x32xf32> to vector<16x32xf32>
    %49 = arith.addf %46, %48 : vector<16x32xf32>
    %c0_16 = arith.constant 0 : index
    %c0_17 = arith.constant 0 : index
    %50 = vector.load %arg6[%c0_16, %c0_17] : memref<1x32xf32, #tpu.memory_space<vmem>>, vector<1x32xf32>
    %c0_18 = arith.constant 0 : index
    %c0_19 = arith.constant 0 : index
    %51 = vector.load %arg7[%c0_18, %c0_19] : memref<1x32xf32, #tpu.memory_space<vmem>>, vector<1x32xf32>
    %cst_20 = arith.constant dense<0.000000e+00> : vector<16xf32>
    %52 = vector.multi_reduction <add>, %49, %cst_20 [1] : vector<16x32xf32> to vector<16xf32>
    %53 = vector.shape_cast %52 : vector<16xf32> to vector<16x1xf32>
    %cst_21 = arith.constant 3.200000e+01 : f32
    %54 = vector.broadcast %cst_21 : f32 to vector<16x1xf32>
    %55 = arith.divf %53, %54 : vector<16x1xf32>
    %56 = vector.broadcast %55 : vector<16x1xf32> to vector<16x32xf32>
    %57 = arith.subf %49, %56 : vector<16x32xf32>
    %58 = arith.mulf %57, %57 : vector<16x32xf32>
    %cst_22 = arith.constant dense<0.000000e+00> : vector<16xf32>
    %59 = vector.multi_reduction <add>, %58, %cst_22 [1] : vector<16x32xf32> to vector<16xf32>
    %60 = vector.shape_cast %59 : vector<16xf32> to vector<16x1xf32>
    %cst_23 = arith.constant 3.200000e+01 : f32
    %61 = vector.broadcast %cst_23 : f32 to vector<16x1xf32>
    %62 = arith.divf %60, %61 : vector<16x1xf32>
    %cst_24 = arith.constant 9.99999996E-13 : f32
    %63 = vector.broadcast %cst_24 : f32 to vector<16x1xf32>
    %64 = arith.addf %62, %63 : vector<16x1xf32>
    %65 = math.rsqrt %64 : vector<16x1xf32>
    %66 = vector.broadcast %65 : vector<16x1xf32> to vector<16x32xf32>
    %67 = arith.mulf %57, %66 : vector<16x32xf32>
    %68 = vector.broadcast %50 : vector<1x32xf32> to vector<16x32xf32>
    %69 = arith.mulf %68, %67 : vector<16x32xf32>
    %70 = vector.broadcast %51 : vector<1x32xf32> to vector<16x32xf32>
    %71 = arith.addf %69, %70 : vector<16x32xf32>
    %72 = vector.shape_cast %71 : vector<16x32xf32> to vector<2x8x32xf32>
    %c0_25 = arith.constant 0 : index
    %c0_26 = arith.constant 0 : index
    %73 = vector.load %arg3[%c0_25, %c0_26] : memref<8x32xf32, #tpu.memory_space<vmem>>, vector<8x32xf32>
    %74 = vector.shape_cast %73 : vector<8x32xf32> to vector<1x8x32xf32>
    %75 = vector.broadcast %74 : vector<1x8x32xf32> to vector<2x8x32xf32>
    %76 = arith.addf %72, %75 : vector<2x8x32xf32>
    %77 = vector.shape_cast %76 : vector<2x8x32xf32> to vector<16x32xf32>
    %c0_27 = arith.constant 0 : index
    %c0_28 = arith.constant 0 : index
    %c0_29 = arith.constant 0 : index
    %78 = vector.load %arg8[%c0_27, %c0_28, %c0_29] : memref<2x32x32xf32, #tpu.memory_space<vmem>>, vector<1x32x32xf32>
    %79 = vector.shape_cast %78 : vector<1x32x32xf32> to vector<32x32xf32>
    %cst_30 = arith.constant dense<0.000000e+00> : vector<16x32xf32>
    %80 = tpu.matmul %77, %79, %cst_30 {dimension_numbers = #tpu.dot_dimension_numbers<[1], [0], [0], [1], [0, 0, 1, 1], [], []>} : vector<16x32xf32>, vector<32x32xf32>, vector<16x32xf32> -> vector<16x32xf32>
    %c0_31 = arith.constant 0 : index
    %c0_32 = arith.constant 0 : index
    %c0_33 = arith.constant 0 : index
    %81 = vector.load %arg9[%c0_31, %c0_32, %c0_33] : memref<2x1x32xf32, #tpu.memory_space<vmem>>, vector<1x1x32xf32>
    %82 = vector.shape_cast %81 : vector<1x1x32xf32> to vector<1x32xf32>
    %83 = vector.broadcast %82 : vector<1x32xf32> to vector<16x32xf32>
    %84 = arith.addf %80, %83 : vector<16x32xf32>
    %c0_34 = arith.constant 0 : index
    %c0_35 = arith.constant 0 : index
    %c0_36 = arith.constant 0 : index
    %85 = vector.load %arg10[%c0_34, %c0_35, %c0_36] : memref<2x32x32xf32, #tpu.memory_space<vmem>>, vector<1x32x32xf32>
    %86 = vector.shape_cast %85 : vector<1x32x32xf32> to vector<32x32xf32>
    %cst_37 = arith.constant dense<0.000000e+00> : vector<16x32xf32>
    %87 = tpu.matmul %77, %86, %cst_37 {dimension_numbers = #tpu.dot_dimension_numbers<[1], [0], [0], [1], [0, 0, 1, 1], [], []>} : vector<16x32xf32>, vector<32x32xf32>, vector<16x32xf32> -> vector<16x32xf32>
    %c0_38 = arith.constant 0 : index
    %c0_39 = arith.constant 0 : index
    %c0_40 = arith.constant 0 : index
    %88 = vector.load %arg11[%c0_38, %c0_39, %c0_40] : memref<2x1x32xf32, #tpu.memory_space<vmem>>, vector<1x1x32xf32>
    %89 = vector.shape_cast %88 : vector<1x1x32xf32> to vector<1x32xf32>
    %90 = vector.broadcast %89 : vector<1x32xf32> to vector<16x32xf32>
    %91 = arith.addf %87, %90 : vector<16x32xf32>
    %c0_41 = arith.constant 0 : index
    %c0_42 = arith.constant 0 : index
    %c0_43 = arith.constant 0 : index
    %92 = vector.load %arg12[%c0_41, %c0_42, %c0_43] : memref<2x32x32xf32, #tpu.memory_space<vmem>>, vector<1x32x32xf32>
    %93 = vector.shape_cast %92 : vector<1x32x32xf32> to vector<32x32xf32>
    %cst_44 = arith.constant dense<0.000000e+00> : vector<16x32xf32>
    %94 = tpu.matmul %77, %93, %cst_44 {dimension_numbers = #tpu.dot_dimension_numbers<[1], [0], [0], [1], [0, 0, 1, 1], [], []>} : vector<16x32xf32>, vector<32x32xf32>, vector<16x32xf32> -> vector<16x32xf32>
    %c0_45 = arith.constant 0 : index
    %c0_46 = arith.constant 0 : index
    %c0_47 = arith.constant 0 : index
    %95 = vector.load %arg13[%c0_45, %c0_46, %c0_47] : memref<2x1x32xf32, #tpu.memory_space<vmem>>, vector<1x1x32xf32>
    %96 = vector.shape_cast %95 : vector<1x1x32xf32> to vector<1x32xf32>
    %97 = vector.broadcast %96 : vector<1x32xf32> to vector<16x32xf32>
    %98 = arith.addf %94, %97 : vector<16x32xf32>
    %cst_48 = arith.constant 0.353553385 : f32
    %99 = vector.broadcast %cst_48 : f32 to vector<16x32xf32>
    %100 = arith.mulf %84, %99 : vector<16x32xf32>
    %101 = vector.shape_cast %100 : vector<16x32xf32> to vector<2x8x32xf32>
    %102 = vector.shape_cast %91 : vector<16x32xf32> to vector<2x8x32xf32>
    %103 = vector.shape_cast %98 : vector<16x32xf32> to vector<2x8x32xf32>
    %104 = vector.extract_strided_slice %101 {offsets = [0, 0, 0], sizes = [2, 8, 8], strides = [1, 1, 1]} : vector<2x8x32xf32> to vector<2x8x8xf32>
    %105 = vector.extract_strided_slice %102 {offsets = [0, 0, 0], sizes = [2, 8, 8], strides = [1, 1, 1]} : vector<2x8x32xf32> to vector<2x8x8xf32>
    %106 = vector.extract_strided_slice %103 {offsets = [0, 0, 0], sizes = [2, 8, 8], strides = [1, 1, 1]} : vector<2x8x32xf32> to vector<2x8x8xf32>
    "tpu.trace_start"() <{level = 10 : i32, message = "bqd,bkd->bqk"}> : () -> ()
    %cst_49 = arith.constant dense<0.000000e+00> : vector<2x8x8xf32>
    %107 = tpu.matmul %104, %105, %cst_49 {dimension_numbers = #tpu.dot_dimension_numbers<[2], [2], [1], [1], [0, 0, 0, 1, 1, 1], [0], [0]>} : vector<2x8x8xf32>, vector<2x8x8xf32>, vector<2x8x8xf32> -> vector<2x8x8xf32>
    "tpu.trace_stop"() : () -> ()
    %108 = vector.shape_cast %107 : vector<2x8x8xf32> to vector<16x8xf32>
    %cst_50 = arith.constant -1.000000e+30 : f32
    %109 = vector.broadcast %cst_50 : f32 to vector<16x8xf32>
    %110 = arith.select %42, %109, %108 : vector<16x8xi1>, vector<16x8xf32>
    %cst_51 = arith.constant dense<0xFF800000> : vector<16xf32>
    %111 = vector.multi_reduction <maximumf>, %110, %cst_51 [1] : vector<16x8xf32> to vector<16xf32>
    %112 = vector.shape_cast %111 : vector<16xf32> to vector<16x1xf32>
    %113 = vector.broadcast %112 : vector<16x1xf32> to vector<16x8xf32>
    %114 = arith.subf %110, %113 : vector<16x8xf32>
    %115 = math.exp %114 : vector<16x8xf32>
    %cst_52 = arith.constant dense<0.000000e+00> : vector<16xf32>
    %116 = vector.multi_reduction <add>, %115, %cst_52 [1] : vector<16x8xf32> to vector<16xf32>
    %117 = vector.shape_cast %116 : vector<16xf32> to vector<16x1xf32>
    %118 = tpu.reciprocal %117 {approx = true} : vector<16x1xf32> -> vector<16x1xf32>
    %119 = vector.broadcast %118 : vector<16x1xf32> to vector<16x8xf32>
    %120 = arith.mulf %115, %119 : vector<16x8xf32>
    %121 = vector.shape_cast %120 : vector<16x8xf32> to vector<2x8x8xf32>
    "tpu.trace_start"() <{level = 10 : i32, message = "bqk,bkd->bqd"}> : () -> ()
    %cst_53 = arith.constant dense<0.000000e+00> : vector<2x8x8xf32>
    %122 = tpu.matmul %121, %106, %cst_53 {dimension_numbers = #tpu.dot_dimension_numbers<[2], [1], [1], [2], [0, 0, 0, 1, 1, 2], [0], [0]>} : vector<2x8x8xf32>, vector<2x8x8xf32>, vector<2x8x8xf32> -> vector<2x8x8xf32>
    "tpu.trace_stop"() : () -> ()
    %c0_54 = arith.constant 0 : index
    %c0_55 = arith.constant 0 : index
    %c0_56 = arith.constant 0 : index
    %123 = vector.load %arg25[%c0_54, %c0_55, %c0_56] : memref<2x8x32xf32, #tpu.memory_space<vmem>>, vector<2x8x8xf32>
    tpu.vector_store %arg25[%c0_54, %c0_55, %c0_56], %122 {strides = array<i32>} : memref<2x8x32xf32, #tpu.memory_space<vmem>>, vector<2x8x8xf32>,
    %124 = vector.extract_strided_slice %101 {offsets = [0, 0, 8], sizes = [2, 8, 8], strides = [1, 1, 1]} : vector<2x8x32xf32> to vector<2x8x8xf32>
    %125 = vector.extract_strided_slice %102 {offsets = [0, 0, 8], sizes = [2, 8, 8], strides = [1, 1, 1]} : vector<2x8x32xf32> to vector<2x8x8xf32>
    %126 = vector.extract_strided_slice %103 {offsets = [0, 0, 8], sizes = [2, 8, 8], strides = [1, 1, 1]} : vector<2x8x32xf32> to vector<2x8x8xf32>
    "tpu.trace_start"() <{level = 10 : i32, message = "bqd,bkd->bqk"}> : () -> ()
    %cst_57 = arith.constant dense<0.000000e+00> : vector<2x8x8xf32>
    %127 = tpu.matmul %124, %125, %cst_57 {dimension_numbers = #tpu.dot_dimension_numbers<[2], [2], [1], [1], [0, 0, 0, 1, 1, 1], [0], [0]>} : vector<2x8x8xf32>, vector<2x8x8xf32>, vector<2x8x8xf32> -> vector<2x8x8xf32>
    "tpu.trace_stop"() : () -> ()
    %128 = vector.shape_cast %127 : vector<2x8x8xf32> to vector<16x8xf32>
    %cst_58 = arith.constant -1.000000e+30 : f32
    %129 = vector.broadcast %cst_58 : f32 to vector<16x8xf32>
    %130 = arith.select %42, %129, %128 : vector<16x8xi1>, vector<16x8xf32>
    %cst_59 = arith.constant dense<0xFF800000> : vector<16xf32>
    %131 = vector.multi_reduction <maximumf>, %130, %cst_59 [1] : vector<16x8xf32> to vector<16xf32>
    %132 = vector.shape_cast %131 : vector<16xf32> to vector<16x1xf32>
    %133 = vector.broadcast %132 : vector<16x1xf32> to vector<16x8xf32>
    %134 = arith.subf %130, %133 : vector<16x8xf32>
    %135 = math.exp %134 : vector<16x8xf32>
    %cst_60 = arith.constant dense<0.000000e+00> : vector<16xf32>
    %136 = vector.multi_reduction <add>, %135, %cst_60 [1] : vector<16x8xf32> to vector<16xf32>
    %137 = vector.shape_cast %136 : vector<16xf32> to vector<16x1xf32>
    %138 = tpu.reciprocal %137 {approx = true} : vector<16x1xf32> -> vector<16x1xf32>
    %139 = vector.broadcast %138 : vector<16x1xf32> to vector<16x8xf32>
    %140 = arith.mulf %135, %139 : vector<16x8xf32>
    %141 = vector.shape_cast %140 : vector<16x8xf32> to vector<2x8x8xf32>
    "tpu.trace_start"() <{level = 10 : i32, message = "bqk,bkd->bqd"}> : () -> ()
    %cst_61 = arith.constant dense<0.000000e+00> : vector<2x8x8xf32>
    %142 = tpu.matmul %141, %126, %cst_61 {dimension_numbers = #tpu.dot_dimension_numbers<[2], [1], [1], [2], [0, 0, 0, 1, 1, 2], [0], [0]>} : vector<2x8x8xf32>, vector<2x8x8xf32>, vector<2x8x8xf32> -> vector<2x8x8xf32>
    "tpu.trace_stop"() : () -> ()
    %c0_62 = arith.constant 0 : index
    %c0_63 = arith.constant 0 : index
    %c8 = arith.constant 8 : index
    %143 = vector.load %arg25[%c0_62, %c0_63, %c8] : memref<2x8x32xf32, #tpu.memory_space<vmem>>, vector<2x8x8xf32>
    tpu.vector_store %arg25[%c0_62, %c0_63, %c8], %142 {strides = array<i32>} : memref<2x8x32xf32, #tpu.memory_space<vmem>>, vector<2x8x8xf32>,
    %144 = vector.extract_strided_slice %101 {offsets = [0, 0, 16], sizes = [2, 8, 8], strides = [1, 1, 1]} : vector<2x8x32xf32> to vector<2x8x8xf32>
    %145 = vector.extract_strided_slice %102 {offsets = [0, 0, 16], sizes = [2, 8, 8], strides = [1, 1, 1]} : vector<2x8x32xf32> to vector<2x8x8xf32>
    %146 = vector.extract_strided_slice %103 {offsets = [0, 0, 16], sizes = [2, 8, 8], strides = [1, 1, 1]} : vector<2x8x32xf32> to vector<2x8x8xf32>
    "tpu.trace_start"() <{level = 10 : i32, message = "bqd,bkd->bqk"}> : () -> ()
    %cst_64 = arith.constant dense<0.000000e+00> : vector<2x8x8xf32>
    %147 = tpu.matmul %144, %145, %cst_64 {dimension_numbers = #tpu.dot_dimension_numbers<[2], [2], [1], [1], [0, 0, 0, 1, 1, 1], [0], [0]>} : vector<2x8x8xf32>, vector<2x8x8xf32>, vector<2x8x8xf32> -> vector<2x8x8xf32>
    "tpu.trace_stop"() : () -> ()
    %148 = vector.shape_cast %147 : vector<2x8x8xf32> to vector<16x8xf32>
    %cst_65 = arith.constant -1.000000e+30 : f32
    %149 = vector.broadcast %cst_65 : f32 to vector<16x8xf32>
    %150 = arith.select %42, %149, %148 : vector<16x8xi1>, vector<16x8xf32>
    %cst_66 = arith.constant dense<0xFF800000> : vector<16xf32>
    %151 = vector.multi_reduction <maximumf>, %150, %cst_66 [1] : vector<16x8xf32> to vector<16xf32>
    %152 = vector.shape_cast %151 : vector<16xf32> to vector<16x1xf32>
    %153 = vector.broadcast %152 : vector<16x1xf32> to vector<16x8xf32>
    %154 = arith.subf %150, %153 : vector<16x8xf32>
    %155 = math.exp %154 : vector<16x8xf32>
    %cst_67 = arith.constant dense<0.000000e+00> : vector<16xf32>
    %156 = vector.multi_reduction <add>, %155, %cst_67 [1] : vector<16x8xf32> to vector<16xf32>
    %157 = vector.shape_cast %156 : vector<16xf32> to vector<16x1xf32>
    %158 = tpu.reciprocal %157 {approx = true} : vector<16x1xf32> -> vector<16x1xf32>
    %159 = vector.broadcast %158 : vector<16x1xf32> to vector<16x8xf32>
    %160 = arith.mulf %155, %159 : vector<16x8xf32>
    %161 = vector.shape_cast %160 : vector<16x8xf32> to vector<2x8x8xf32>
    "tpu.trace_start"() <{level = 10 : i32, message = "bqk,bkd->bqd"}> : () -> ()
    %cst_68 = arith.constant dense<0.000000e+00> : vector<2x8x8xf32>
    %162 = tpu.matmul %161, %146, %cst_68 {dimension_numbers = #tpu.dot_dimension_numbers<[2], [1], [1], [2], [0, 0, 0, 1, 1, 2], [0], [0]>} : vector<2x8x8xf32>, vector<2x8x8xf32>, vector<2x8x8xf32> -> vector<2x8x8xf32>
    "tpu.trace_stop"() : () -> ()
    %c0_69 = arith.constant 0 : index
    %c0_70 = arith.constant 0 : index
    %c16 = arith.constant 16 : index
    %163 = vector.load %arg25[%c0_69, %c0_70, %c16] : memref<2x8x32xf32, #tpu.memory_space<vmem>>, vector<2x8x8xf32>
    tpu.vector_store %arg25[%c0_69, %c0_70, %c16], %162 {strides = array<i32>} : memref<2x8x32xf32, #tpu.memory_space<vmem>>, vector<2x8x8xf32>,
    %164 = vector.extract_strided_slice %101 {offsets = [0, 0, 24], sizes = [2, 8, 8], strides = [1, 1, 1]} : vector<2x8x32xf32> to vector<2x8x8xf32>
    %165 = vector.extract_strided_slice %102 {offsets = [0, 0, 24], sizes = [2, 8, 8], strides = [1, 1, 1]} : vector<2x8x32xf32> to vector<2x8x8xf32>
    %166 = vector.extract_strided_slice %103 {offsets = [0, 0, 24], sizes = [2, 8, 8], strides = [1, 1, 1]} : vector<2x8x32xf32> to vector<2x8x8xf32>
    "tpu.trace_start"() <{level = 10 : i32, message = "bqd,bkd->bqk"}> : () -> ()
    %cst_71 = arith.constant dense<0.000000e+00> : vector<2x8x8xf32>
    %167 = tpu.matmul %164, %165, %cst_71 {dimension_numbers = #tpu.dot_dimension_numbers<[2], [2], [1], [1], [0, 0, 0, 1, 1, 1], [0], [0]>} : vector<2x8x8xf32>, vector<2x8x8xf32>, vector<2x8x8xf32> -> vector<2x8x8xf32>
    "tpu.trace_stop"() : () -> ()
    %168 = vector.shape_cast %167 : vector<2x8x8xf32> to vector<16x8xf32>
    %cst_72 = arith.constant -1.000000e+30 : f32
    %169 = vector.broadcast %cst_72 : f32 to vector<16x8xf32>
    %170 = arith.select %42, %169, %168 : vector<16x8xi1>, vector<16x8xf32>
    %cst_73 = arith.constant dense<0xFF800000> : vector<16xf32>
    %171 = vector.multi_reduction <maximumf>, %170, %cst_73 [1] : vector<16x8xf32> to vector<16xf32>
    %172 = vector.shape_cast %171 : vector<16xf32> to vector<16x1xf32>
    %173 = vector.broadcast %172 : vector<16x1xf32> to vector<16x8xf32>
    %174 = arith.subf %170, %173 : vector<16x8xf32>
    %175 = math.exp %174 : vector<16x8xf32>
    %cst_74 = arith.constant dense<0.000000e+00> : vector<16xf32>
    %176 = vector.multi_reduction <add>, %175, %cst_74 [1] : vector<16x8xf32> to vector<16xf32>
    %177 = vector.shape_cast %176 : vector<16xf32> to vector<16x1xf32>
    %178 = tpu.reciprocal %177 {approx = true} : vector<16x1xf32> -> vector<16x1xf32>
    %179 = vector.broadcast %178 : vector<16x1xf32> to vector<16x8xf32>
    %180 = arith.mulf %175, %179 : vector<16x8xf32>
    %181 = vector.shape_cast %180 : vector<16x8xf32> to vector<2x8x8xf32>
    "tpu.trace_start"() <{level = 10 : i32, message = "bqk,bkd->bqd"}> : () -> ()
    %cst_75 = arith.constant dense<0.000000e+00> : vector<2x8x8xf32>
    %182 = tpu.matmul %181, %166, %cst_75 {dimension_numbers = #tpu.dot_dimension_numbers<[2], [1], [1], [2], [0, 0, 0, 1, 1, 2], [0], [0]>} : vector<2x8x8xf32>, vector<2x8x8xf32>, vector<2x8x8xf32> -> vector<2x8x8xf32>
    "tpu.trace_stop"() : () -> ()
    %c0_76 = arith.constant 0 : index
    %c0_77 = arith.constant 0 : index
    %c24 = arith.constant 24 : index
    %183 = vector.load %arg25[%c0_76, %c0_77, %c24] : memref<2x8x32xf32, #tpu.memory_space<vmem>>, vector<2x8x8xf32>
    tpu.vector_store %arg25[%c0_76, %c0_77, %c24], %182 {strides = array<i32>} : memref<2x8x32xf32, #tpu.memory_space<vmem>>, vector<2x8x8xf32>,
    %c0_78 = arith.constant 0 : index
    %c0_79 = arith.constant 0 : index
    %c0_80 = arith.constant 0 : index
    %184 = vector.load %arg25[%c0_78, %c0_79, %c0_80] : memref<2x8x32xf32, #tpu.memory_space<vmem>>, vector<2x8x32xf32>
    %185 = vector.shape_cast %184 : vector<2x8x32xf32> to vector<16x32xf32>
    %c0_81 = arith.constant 0 : index
    %c0_82 = arith.constant 0 : index
    %c0_83 = arith.constant 0 : index
    %186 = vector.load %arg14[%c0_81, %c0_82, %c0_83] : memref<2x32x32xf32, #tpu.memory_space<vmem>>, vector<1x32x32xf32>
    %187 = vector.shape_cast %186 : vector<1x32x32xf32> to vector<32x32xf32>
    %cst_84 = arith.constant dense<0.000000e+00> : vector<16x32xf32>
    %188 = tpu.matmul %185, %187, %cst_84 {dimension_numbers = #tpu.dot_dimension_numbers<[1], [0], [0], [1], [0, 0, 1, 1], [], []>} : vector<16x32xf32>, vector<32x32xf32>, vector<16x32xf32> -> vector<16x32xf32>
    %c0_85 = arith.constant 0 : index
    %c0_86 = arith.constant 0 : index
    %c0_87 = arith.constant 0 : index
    %189 = vector.load %arg15[%c0_85, %c0_86, %c0_87] : memref<2x1x32xf32, #tpu.memory_space<vmem>>, vector<1x1x32xf32>
    %190 = vector.shape_cast %189 : vector<1x1x32xf32> to vector<1x32xf32>
    %191 = vector.broadcast %190 : vector<1x32xf32> to vector<16x32xf32>
    %192 = arith.addf %188, %191 : vector<16x32xf32>
    %193 = arith.addf %192, %77 : vector<16x32xf32>
    %c0_88 = arith.constant 0 : index
    %c0_89 = arith.constant 0 : index
    %c0_90 = arith.constant 0 : index
    %194 = vector.load %arg16[%c0_88, %c0_89, %c0_90] : memref<2x1x32xf32, #tpu.memory_space<vmem>>, vector<1x1x32xf32>
    %195 = vector.shape_cast %194 : vector<1x1x32xf32> to vector<1x32xf32>
    %c0_91 = arith.constant 0 : index
    %c0_92 = arith.constant 0 : index
    %c0_93 = arith.constant 0 : index
    %196 = vector.load %arg17[%c0_91, %c0_92, %c0_93] : memref<2x1x32xf32, #tpu.memory_space<vmem>>, vector<1x1x32xf32>
    %197 = vector.shape_cast %196 : vector<1x1x32xf32> to vector<1x32xf32>
    %cst_94 = arith.constant dense<0.000000e+00> : vector<16xf32>
    %198 = vector.multi_reduction <add>, %193, %cst_94 [1] : vector<16x32xf32> to vector<16xf32>
    %199 = vector.shape_cast %198 : vector<16xf32> to vector<16x1xf32>
    %cst_95 = arith.constant 3.200000e+01 : f32
    %200 = vector.broadcast %cst_95 : f32 to vector<16x1xf32>
    %201 = arith.divf %199, %200 : vector<16x1xf32>
    %202 = vector.broadcast %201 : vector<16x1xf32> to vector<16x32xf32>
    %203 = arith.subf %193, %202 : vector<16x32xf32>
    %204 = arith.mulf %203, %203 : vector<16x32xf32>
    %cst_96 = arith.constant dense<0.000000e+00> : vector<16xf32>
    %205 = vector.multi_reduction <add>, %204, %cst_96 [1] : vector<16x32xf32> to vector<16xf32>
    %206 = vector.shape_cast %205 : vector<16xf32> to vector<16x1xf32>
    %cst_97 = arith.constant 3.200000e+01 : f32
    %207 = vector.broadcast %cst_97 : f32 to vector<16x1xf32>
    %208 = arith.divf %206, %207 : vector<16x1xf32>
    %cst_98 = arith.constant 9.99999974E-6 : f32
    %209 = vector.broadcast %cst_98 : f32 to vector<16x1xf32>
    %210 = arith.addf %208, %209 : vector<16x1xf32>
    %211 = math.rsqrt %210 : vector<16x1xf32>
    %212 = vector.broadcast %211 : vector<16x1xf32> to vector<16x32xf32>
    %213 = arith.mulf %203, %212 : vector<16x32xf32>
    %214 = vector.broadcast %195 : vector<1x32xf32> to vector<16x32xf32>
    %215 = arith.mulf %214, %213 : vector<16x32xf32>
    %216 = vector.broadcast %197 : vector<1x32xf32> to vector<16x32xf32>
    %217 = arith.addf %215, %216 : vector<16x32xf32>
    %218 = vector.broadcast %41 : vector<16x1xf32> to vector<16x32xf32>
    %219 = arith.mulf %217, %218 : vector<16x32xf32>
    %c0_99 = arith.constant 0 : index
    %c0_100 = arith.constant 0 : index
    %c0_101 = arith.constant 0 : index
    %220 = vector.load %arg18[%c0_99, %c0_100, %c0_101] : memref<2x32x64xf32, #tpu.memory_space<vmem>>, vector<1x32x64xf32>
    %221 = vector.shape_cast %220 : vector<1x32x64xf32> to vector<32x64xf32>
    %cst_102 = arith.constant dense<0.000000e+00> : vector<16x64xf32>
    %222 = tpu.matmul %219, %221, %cst_102 {dimension_numbers = #tpu.dot_dimension_numbers<[1], [0], [0], [1], [0, 0, 1, 1], [], []>} : vector<16x32xf32>, vector<32x64xf32>, vector<16x64xf32> -> vector<16x64xf32>
    %c0_103 = arith.constant 0 : index
    %c0_104 = arith.constant 0 : index
    %c0_105 = arith.constant 0 : index
    %223 = vector.load %arg19[%c0_103, %c0_104, %c0_105] : memref<2x1x64xf32, #tpu.memory_space<vmem>>, vector<1x1x64xf32>
    %224 = vector.shape_cast %223 : vector<1x1x64xf32> to vector<1x64xf32>
    %225 = vector.broadcast %224 : vector<1x64xf32> to vector<16x64xf32>
    %226 = arith.addf %222, %225 : vector<16x64xf32>
    %cst_106 = arith.constant 0.000000e+00 : f32
    %227 = vector.broadcast %cst_106 : f32 to vector<16x64xf32>
    %228 = arith.maximumf %226, %227 : vector<16x64xf32>
    %c0_107 = arith.constant 0 : index
    %c0_108 = arith.constant 0 : index
    %c0_109 = arith.constant 0 : index
    %229 = vector.load %arg20[%c0_107, %c0_108, %c0_109] : memref<2x64x32xf32, #tpu.memory_space<vmem>>, vector<1x64x32xf32>
    %230 = vector.shape_cast %229 : vector<1x64x32xf32> to vector<64x32xf32>
    %cst_110 = arith.constant dense<0.000000e+00> : vector<16x32xf32>
    %231 = tpu.matmul %228, %230, %cst_110 {dimension_numbers = #tpu.dot_dimension_numbers<[1], [0], [0], [1], [0, 0, 1, 1], [], []>} : vector<16x64xf32>, vector<64x32xf32>, vector<16x32xf32> -> vector<16x32xf32>
    %c0_111 = arith.constant 0 : index
    %c0_112 = arith.constant 0 : index
    %c0_113 = arith.constant 0 : index
    %232 = vector.load %arg21[%c0_111, %c0_112, %c0_113] : memref<2x1x32xf32, #tpu.memory_space<vmem>>, vector<1x1x32xf32>
    %233 = vector.shape_cast %232 : vector<1x1x32xf32> to vector<1x32xf32>
    %234 = vector.broadcast %233 : vector<1x32xf32> to vector<16x32xf32>
    %235 = arith.addf %231, %234 : vector<16x32xf32>
    %236 = arith.addf %235, %219 : vector<16x32xf32>
    %c0_114 = arith.constant 0 : index
    %c0_115 = arith.constant 0 : index
    %c0_116 = arith.constant 0 : index
    %237 = vector.load %arg22[%c0_114, %c0_115, %c0_116] : memref<2x1x32xf32, #tpu.memory_space<vmem>>, vector<1x1x32xf32>
    %238 = vector.shape_cast %237 : vector<1x1x32xf32> to vector<1x32xf32>
    %c0_117 = arith.constant 0 : index
    %c0_118 = arith.constant 0 : index
    %c0_119 = arith.constant 0 : index
    %239 = vector.load %arg23[%c0_117, %c0_118, %c0_119] : memref<2x1x32xf32, #tpu.memory_space<vmem>>, vector<1x1x32xf32>
    %240 = vector.shape_cast %239 : vector<1x1x32xf32> to vector<1x32xf32>
    %cst_120 = arith.constant dense<0.000000e+00> : vector<16xf32>
    %241 = vector.multi_reduction <add>, %236, %cst_120 [1] : vector<16x32xf32> to vector<16xf32>
    %242 = vector.shape_cast %241 : vector<16xf32> to vector<16x1xf32>
    %cst_121 = arith.constant 3.200000e+01 : f32
    %243 = vector.broadcast %cst_121 : f32 to vector<16x1xf32>
    %244 = arith.divf %242, %243 : vector<16x1xf32>
    %245 = vector.broadcast %244 : vector<16x1xf32> to vector<16x32xf32>
    %246 = arith.subf %236, %245 : vector<16x32xf32>
    %247 = arith.mulf %246, %246 : vector<16x32xf32>
    %cst_122 = arith.constant dense<0.000000e+00> : vector<16xf32>
    %248 = vector.multi_reduction <add>, %247, %cst_122 [1] : vector<16x32xf32> to vector<16xf32>
    %249 = vector.shape_cast %248 : vector<16xf32> to vector<16x1xf32>
    %cst_123 = arith.constant 3.200000e+01 : f32
    %250 = vector.broadcast %cst_123 : f32 to vector<16x1xf32>
    %251 = arith.divf %249, %250 : vector<16x1xf32>
    %cst_124 = arith.constant 9.99999974E-6 : f32
    %252 = vector.broadcast %cst_124 : f32 to vector<16x1xf32>
    %253 = arith.addf %251, %252 : vector<16x1xf32>
    %254 = math.rsqrt %253 : vector<16x1xf32>
    %255 = vector.broadcast %254 : vector<16x1xf32> to vector<16x32xf32>
    %256 = arith.mulf %246, %255 : vector<16x32xf32>
    %257 = vector.broadcast %238 : vector<1x32xf32> to vector<16x32xf32>
    %258 = arith.mulf %257, %256 : vector<16x32xf32>
    %259 = vector.broadcast %240 : vector<1x32xf32> to vector<16x32xf32>
    %260 = arith.addf %258, %259 : vector<16x32xf32>
    %261 = vector.broadcast %41 : vector<16x1xf32> to vector<16x32xf32>
    %262 = arith.mulf %260, %261 : vector<16x32xf32>
    %c1 = arith.constant 1 : index
    %c0_125 = arith.constant 0 : index
    %c0_126 = arith.constant 0 : index
    %263 = vector.load %arg8[%c1, %c0_125, %c0_126] : memref<2x32x32xf32, #tpu.memory_space<vmem>>, vector<1x32x32xf32>
    %264 = vector.shape_cast %263 : vector<1x32x32xf32> to vector<32x32xf32>
    %cst_127 = arith.constant dense<0.000000e+00> : vector<16x32xf32>
    %265 = tpu.matmul %262, %264, %cst_127 {dimension_numbers = #tpu.dot_dimension_numbers<[1], [0], [0], [1], [0, 0, 1, 1], [], []>} : vector<16x32xf32>, vector<32x32xf32>, vector<16x32xf32> -> vector<16x32xf32>
    %c1_128 = arith.constant 1 : index
    %c0_129 = arith.constant 0 : index
    %c0_130 = arith.constant 0 : index
    %266 = vector.load %arg9[%c1_128, %c0_129, %c0_130] : memref<2x1x32xf32, #tpu.memory_space<vmem>>, vector<1x1x32xf32>
    %267 = vector.shape_cast %266 : vector<1x1x32xf32> to vector<1x32xf32>
    %268 = vector.broadcast %267 : vector<1x32xf32> to vector<16x32xf32>
    %269 = arith.addf %265, %268 : vector<16x32xf32>
    %c1_131 = arith.constant 1 : index
    %c0_132 = arith.constant 0 : index
    %c0_133 = arith.constant 0 : index
    %270 = vector.load %arg10[%c1_131, %c0_132, %c0_133] : memref<2x32x32xf32, #tpu.memory_space<vmem>>, vector<1x32x32xf32>
    %271 = vector.shape_cast %270 : vector<1x32x32xf32> to vector<32x32xf32>
    %cst_134 = arith.constant dense<0.000000e+00> : vector<16x32xf32>
    %272 = tpu.matmul %262, %271, %cst_134 {dimension_numbers = #tpu.dot_dimension_numbers<[1], [0], [0], [1], [0, 0, 1, 1], [], []>} : vector<16x32xf32>, vector<32x32xf32>, vector<16x32xf32> -> vector<16x32xf32>
    %c1_135 = arith.constant 1 : index
    %c0_136 = arith.constant 0 : index
    %c0_137 = arith.constant 0 : index
    %273 = vector.load %arg11[%c1_135, %c0_136, %c0_137] : memref<2x1x32xf32, #tpu.memory_space<vmem>>, vector<1x1x32xf32>
    %274 = vector.shape_cast %273 : vector<1x1x32xf32> to vector<1x32xf32>
    %275 = vector.broadcast %274 : vector<1x32xf32> to vector<16x32xf32>
    %276 = arith.addf %272, %275 : vector<16x32xf32>
    %c1_138 = arith.constant 1 : index
    %c0_139 = arith.constant 0 : index
    %c0_140 = arith.constant 0 : index
    %277 = vector.load %arg12[%c1_138, %c0_139, %c0_140] : memref<2x32x32xf32, #tpu.memory_space<vmem>>, vector<1x32x32xf32>
    %278 = vector.shape_cast %277 : vector<1x32x32xf32> to vector<32x32xf32>
    %cst_141 = arith.constant dense<0.000000e+00> : vector<16x32xf32>
    %279 = tpu.matmul %262, %278, %cst_141 {dimension_numbers = #tpu.dot_dimension_numbers<[1], [0], [0], [1], [0, 0, 1, 1], [], []>} : vector<16x32xf32>, vector<32x32xf32>, vector<16x32xf32> -> vector<16x32xf32>
    %c1_142 = arith.constant 1 : index
    %c0_143 = arith.constant 0 : index
    %c0_144 = arith.constant 0 : index
    %280 = vector.load %arg13[%c1_142, %c0_143, %c0_144] : memref<2x1x32xf32, #tpu.memory_space<vmem>>, vector<1x1x32xf32>
    %281 = vector.shape_cast %280 : vector<1x1x32xf32> to vector<1x32xf32>
    %282 = vector.broadcast %281 : vector<1x32xf32> to vector<16x32xf32>
    %283 = arith.addf %279, %282 : vector<16x32xf32>
    %cst_145 = arith.constant 0.353553385 : f32
    %284 = vector.broadcast %cst_145 : f32 to vector<16x32xf32>
    %285 = arith.mulf %269, %284 : vector<16x32xf32>
    %286 = vector.shape_cast %285 : vector<16x32xf32> to vector<2x8x32xf32>
    %287 = vector.shape_cast %276 : vector<16x32xf32> to vector<2x8x32xf32>
    %288 = vector.shape_cast %283 : vector<16x32xf32> to vector<2x8x32xf32>
    %289 = vector.extract_strided_slice %286 {offsets = [0, 0, 0], sizes = [2, 8, 8], strides = [1, 1, 1]} : vector<2x8x32xf32> to vector<2x8x8xf32>
    %290 = vector.extract_strided_slice %287 {offsets = [0, 0, 0], sizes = [2, 8, 8], strides = [1, 1, 1]} : vector<2x8x32xf32> to vector<2x8x8xf32>
    %291 = vector.extract_strided_slice %288 {offsets = [0, 0, 0], sizes = [2, 8, 8], strides = [1, 1, 1]} : vector<2x8x32xf32> to vector<2x8x8xf32>
    "tpu.trace_start"() <{level = 10 : i32, message = "bqd,bkd->bqk"}> : () -> ()
    %cst_146 = arith.constant dense<0.000000e+00> : vector<2x8x8xf32>
    %292 = tpu.matmul %289, %290, %cst_146 {dimension_numbers = #tpu.dot_dimension_numbers<[2], [2], [1], [1], [0, 0, 0, 1, 1, 1], [0], [0]>} : vector<2x8x8xf32>, vector<2x8x8xf32>, vector<2x8x8xf32> -> vector<2x8x8xf32>
    "tpu.trace_stop"() : () -> ()
    %293 = vector.shape_cast %292 : vector<2x8x8xf32> to vector<16x8xf32>
    %cst_147 = arith.constant -1.000000e+30 : f32
    %294 = vector.broadcast %cst_147 : f32 to vector<16x8xf32>
    %295 = arith.select %42, %294, %293 : vector<16x8xi1>, vector<16x8xf32>
    %cst_148 = arith.constant dense<0xFF800000> : vector<16xf32>
    %296 = vector.multi_reduction <maximumf>, %295, %cst_148 [1] : vector<16x8xf32> to vector<16xf32>
    %297 = vector.shape_cast %296 : vector<16xf32> to vector<16x1xf32>
    %298 = vector.broadcast %297 : vector<16x1xf32> to vector<16x8xf32>
    %299 = arith.subf %295, %298 : vector<16x8xf32>
    %300 = math.exp %299 : vector<16x8xf32>
    %cst_149 = arith.constant dense<0.000000e+00> : vector<16xf32>
    %301 = vector.multi_reduction <add>, %300, %cst_149 [1] : vector<16x8xf32> to vector<16xf32>
    %302 = vector.shape_cast %301 : vector<16xf32> to vector<16x1xf32>
    %303 = tpu.reciprocal %302 {approx = true} : vector<16x1xf32> -> vector<16x1xf32>
    %304 = vector.broadcast %303 : vector<16x1xf32> to vector<16x8xf32>
    %305 = arith.mulf %300, %304 : vector<16x8xf32>
    %306 = vector.shape_cast %305 : vector<16x8xf32> to vector<2x8x8xf32>
    "tpu.trace_start"() <{level = 10 : i32, message = "bqk,bkd->bqd"}> : () -> ()
    %cst_150 = arith.constant dense<0.000000e+00> : vector<2x8x8xf32>
    %307 = tpu.matmul %306, %291, %cst_150 {dimension_numbers = #tpu.dot_dimension_numbers<[2], [1], [1], [2], [0, 0, 0, 1, 1, 2], [0], [0]>} : vector<2x8x8xf32>, vector<2x8x8xf32>, vector<2x8x8xf32> -> vector<2x8x8xf32>
    "tpu.trace_stop"() : () -> ()
    %c0_151 = arith.constant 0 : index
    %c0_152 = arith.constant 0 : index
    %c0_153 = arith.constant 0 : index
    %308 = vector.load %arg25[%c0_151, %c0_152, %c0_153] : memref<2x8x32xf32, #tpu.memory_space<vmem>>, vector<2x8x8xf32>
    tpu.vector_store %arg25[%c0_151, %c0_152, %c0_153], %307 {strides = array<i32>} : memref<2x8x32xf32, #tpu.memory_space<vmem>>, vector<2x8x8xf32>,
    %309 = vector.extract_strided_slice %286 {offsets = [0, 0, 8], sizes = [2, 8, 8], strides = [1, 1, 1]} : vector<2x8x32xf32> to vector<2x8x8xf32>
    %310 = vector.extract_strided_slice %287 {offsets = [0, 0, 8], sizes = [2, 8, 8], strides = [1, 1, 1]} : vector<2x8x32xf32> to vector<2x8x8xf32>
    %311 = vector.extract_strided_slice %288 {offsets = [0, 0, 8], sizes = [2, 8, 8], strides = [1, 1, 1]} : vector<2x8x32xf32> to vector<2x8x8xf32>
    "tpu.trace_start"() <{level = 10 : i32, message = "bqd,bkd->bqk"}> : () -> ()
    %cst_154 = arith.constant dense<0.000000e+00> : vector<2x8x8xf32>
    %312 = tpu.matmul %309, %310, %cst_154 {dimension_numbers = #tpu.dot_dimension_numbers<[2], [2], [1], [1], [0, 0, 0, 1, 1, 1], [0], [0]>} : vector<2x8x8xf32>, vector<2x8x8xf32>, vector<2x8x8xf32> -> vector<2x8x8xf32>
    "tpu.trace_stop"() : () -> ()
    %313 = vector.shape_cast %312 : vector<2x8x8xf32> to vector<16x8xf32>
    %cst_155 = arith.constant -1.000000e+30 : f32
    %314 = vector.broadcast %cst_155 : f32 to vector<16x8xf32>
    %315 = arith.select %42, %314, %313 : vector<16x8xi1>, vector<16x8xf32>
    %cst_156 = arith.constant dense<0xFF800000> : vector<16xf32>
    %316 = vector.multi_reduction <maximumf>, %315, %cst_156 [1] : vector<16x8xf32> to vector<16xf32>
    %317 = vector.shape_cast %316 : vector<16xf32> to vector<16x1xf32>
    %318 = vector.broadcast %317 : vector<16x1xf32> to vector<16x8xf32>
    %319 = arith.subf %315, %318 : vector<16x8xf32>
    %320 = math.exp %319 : vector<16x8xf32>
    %cst_157 = arith.constant dense<0.000000e+00> : vector<16xf32>
    %321 = vector.multi_reduction <add>, %320, %cst_157 [1] : vector<16x8xf32> to vector<16xf32>
    %322 = vector.shape_cast %321 : vector<16xf32> to vector<16x1xf32>
    %323 = tpu.reciprocal %322 {approx = true} : vector<16x1xf32> -> vector<16x1xf32>
    %324 = vector.broadcast %323 : vector<16x1xf32> to vector<16x8xf32>
    %325 = arith.mulf %320, %324 : vector<16x8xf32>
    %326 = vector.shape_cast %325 : vector<16x8xf32> to vector<2x8x8xf32>
    "tpu.trace_start"() <{level = 10 : i32, message = "bqk,bkd->bqd"}> : () -> ()
    %cst_158 = arith.constant dense<0.000000e+00> : vector<2x8x8xf32>
    %327 = tpu.matmul %326, %311, %cst_158 {dimension_numbers = #tpu.dot_dimension_numbers<[2], [1], [1], [2], [0, 0, 0, 1, 1, 2], [0], [0]>} : vector<2x8x8xf32>, vector<2x8x8xf32>, vector<2x8x8xf32> -> vector<2x8x8xf32>
    "tpu.trace_stop"() : () -> ()
    %c0_159 = arith.constant 0 : index
    %c0_160 = arith.constant 0 : index
    %c8_161 = arith.constant 8 : index
    %328 = vector.load %arg25[%c0_159, %c0_160, %c8_161] : memref<2x8x32xf32, #tpu.memory_space<vmem>>, vector<2x8x8xf32>
    tpu.vector_store %arg25[%c0_159, %c0_160, %c8_161], %327 {strides = array<i32>} : memref<2x8x32xf32, #tpu.memory_space<vmem>>, vector<2x8x8xf32>,
    %329 = vector.extract_strided_slice %286 {offsets = [0, 0, 16], sizes = [2, 8, 8], strides = [1, 1, 1]} : vector<2x8x32xf32> to vector<2x8x8xf32>
    %330 = vector.extract_strided_slice %287 {offsets = [0, 0, 16], sizes = [2, 8, 8], strides = [1, 1, 1]} : vector<2x8x32xf32> to vector<2x8x8xf32>
    %331 = vector.extract_strided_slice %288 {offsets = [0, 0, 16], sizes = [2, 8, 8], strides = [1, 1, 1]} : vector<2x8x32xf32> to vector<2x8x8xf32>
    "tpu.trace_start"() <{level = 10 : i32, message = "bqd,bkd->bqk"}> : () -> ()
    %cst_162 = arith.constant dense<0.000000e+00> : vector<2x8x8xf32>
    %332 = tpu.matmul %329, %330, %cst_162 {dimension_numbers = #tpu.dot_dimension_numbers<[2], [2], [1], [1], [0, 0, 0, 1, 1, 1], [0], [0]>} : vector<2x8x8xf32>, vector<2x8x8xf32>, vector<2x8x8xf32> -> vector<2x8x8xf32>
    "tpu.trace_stop"() : () -> ()
    %333 = vector.shape_cast %332 : vector<2x8x8xf32> to vector<16x8xf32>
    %cst_163 = arith.constant -1.000000e+30 : f32
    %334 = vector.broadcast %cst_163 : f32 to vector<16x8xf32>
    %335 = arith.select %42, %334, %333 : vector<16x8xi1>, vector<16x8xf32>
    %cst_164 = arith.constant dense<0xFF800000> : vector<16xf32>
    %336 = vector.multi_reduction <maximumf>, %335, %cst_164 [1] : vector<16x8xf32> to vector<16xf32>
    %337 = vector.shape_cast %336 : vector<16xf32> to vector<16x1xf32>
    %338 = vector.broadcast %337 : vector<16x1xf32> to vector<16x8xf32>
    %339 = arith.subf %335, %338 : vector<16x8xf32>
    %340 = math.exp %339 : vector<16x8xf32>
    %cst_165 = arith.constant dense<0.000000e+00> : vector<16xf32>
    %341 = vector.multi_reduction <add>, %340, %cst_165 [1] : vector<16x8xf32> to vector<16xf32>
    %342 = vector.shape_cast %341 : vector<16xf32> to vector<16x1xf32>
    %343 = tpu.reciprocal %342 {approx = true} : vector<16x1xf32> -> vector<16x1xf32>
    %344 = vector.broadcast %343 : vector<16x1xf32> to vector<16x8xf32>
    %345 = arith.mulf %340, %344 : vector<16x8xf32>
    %346 = vector.shape_cast %345 : vector<16x8xf32> to vector<2x8x8xf32>
    "tpu.trace_start"() <{level = 10 : i32, message = "bqk,bkd->bqd"}> : () -> ()
    %cst_166 = arith.constant dense<0.000000e+00> : vector<2x8x8xf32>
    %347 = tpu.matmul %346, %331, %cst_166 {dimension_numbers = #tpu.dot_dimension_numbers<[2], [1], [1], [2], [0, 0, 0, 1, 1, 2], [0], [0]>} : vector<2x8x8xf32>, vector<2x8x8xf32>, vector<2x8x8xf32> -> vector<2x8x8xf32>
    "tpu.trace_stop"() : () -> ()
    %c0_167 = arith.constant 0 : index
    %c0_168 = arith.constant 0 : index
    %c16_169 = arith.constant 16 : index
    %348 = vector.load %arg25[%c0_167, %c0_168, %c16_169] : memref<2x8x32xf32, #tpu.memory_space<vmem>>, vector<2x8x8xf32>
    tpu.vector_store %arg25[%c0_167, %c0_168, %c16_169], %347 {strides = array<i32>} : memref<2x8x32xf32, #tpu.memory_space<vmem>>, vector<2x8x8xf32>,
    %349 = vector.extract_strided_slice %286 {offsets = [0, 0, 24], sizes = [2, 8, 8], strides = [1, 1, 1]} : vector<2x8x32xf32> to vector<2x8x8xf32>
    %350 = vector.extract_strided_slice %287 {offsets = [0, 0, 24], sizes = [2, 8, 8], strides = [1, 1, 1]} : vector<2x8x32xf32> to vector<2x8x8xf32>
    %351 = vector.extract_strided_slice %288 {offsets = [0, 0, 24], sizes = [2, 8, 8], strides = [1, 1, 1]} : vector<2x8x32xf32> to vector<2x8x8xf32>
    "tpu.trace_start"() <{level = 10 : i32, message = "bqd,bkd->bqk"}> : () -> ()
    %cst_170 = arith.constant dense<0.000000e+00> : vector<2x8x8xf32>
    %352 = tpu.matmul %349, %350, %cst_170 {dimension_numbers = #tpu.dot_dimension_numbers<[2], [2], [1], [1], [0, 0, 0, 1, 1, 1], [0], [0]>} : vector<2x8x8xf32>, vector<2x8x8xf32>, vector<2x8x8xf32> -> vector<2x8x8xf32>
    "tpu.trace_stop"() : () -> ()
    %353 = vector.shape_cast %352 : vector<2x8x8xf32> to vector<16x8xf32>
    %cst_171 = arith.constant -1.000000e+30 : f32
    %354 = vector.broadcast %cst_171 : f32 to vector<16x8xf32>
    %355 = arith.select %42, %354, %353 : vector<16x8xi1>, vector<16x8xf32>
    %cst_172 = arith.constant dense<0xFF800000> : vector<16xf32>
    %356 = vector.multi_reduction <maximumf>, %355, %cst_172 [1] : vector<16x8xf32> to vector<16xf32>
    %357 = vector.shape_cast %356 : vector<16xf32> to vector<16x1xf32>
    %358 = vector.broadcast %357 : vector<16x1xf32> to vector<16x8xf32>
    %359 = arith.subf %355, %358 : vector<16x8xf32>
    %360 = math.exp %359 : vector<16x8xf32>
    %cst_173 = arith.constant dense<0.000000e+00> : vector<16xf32>
    %361 = vector.multi_reduction <add>, %360, %cst_173 [1] : vector<16x8xf32> to vector<16xf32>
    %362 = vector.shape_cast %361 : vector<16xf32> to vector<16x1xf32>
    %363 = tpu.reciprocal %362 {approx = true} : vector<16x1xf32> -> vector<16x1xf32>
    %364 = vector.broadcast %363 : vector<16x1xf32> to vector<16x8xf32>
    %365 = arith.mulf %360, %364 : vector<16x8xf32>
    %366 = vector.shape_cast %365 : vector<16x8xf32> to vector<2x8x8xf32>
    "tpu.trace_start"() <{level = 10 : i32, message = "bqk,bkd->bqd"}> : () -> ()
    %cst_174 = arith.constant dense<0.000000e+00> : vector<2x8x8xf32>
    %367 = tpu.matmul %366, %351, %cst_174 {dimension_numbers = #tpu.dot_dimension_numbers<[2], [1], [1], [2], [0, 0, 0, 1, 1, 2], [0], [0]>} : vector<2x8x8xf32>, vector<2x8x8xf32>, vector<2x8x8xf32> -> vector<2x8x8xf32>
    "tpu.trace_stop"() : () -> ()
    %c0_175 = arith.constant 0 : index
    %c0_176 = arith.constant 0 : index
    %c24_177 = arith.constant 24 : index
    %368 = vector.load %arg25[%c0_175, %c0_176, %c24_177] : memref<2x8x32xf32, #tpu.memory_space<vmem>>, vector<2x8x8xf32>
    tpu.vector_store %arg25[%c0_175, %c0_176, %c24_177], %367 {strides = array<i32>} : memref<2x8x32xf32, #tpu.memory_space<vmem>>, vector<2x8x8xf32>,
    %c0_178 = arith.constant 0 : index
    %c0_179 = arith.constant 0 : index
    %c0_180 = arith.constant 0 : index
    %369 = vector.load %arg25[%c0_178, %c0_179, %c0_180] : memref<2x8x32xf32, #tpu.memory_space<vmem>>, vector<2x8x32xf32>
    %370 = vector.shape_cast %369 : vector<2x8x32xf32> to vector<16x32xf32>
    %c1_181 = arith.constant 1 : index
    %c0_182 = arith.constant 0 : index
    %c0_183 = arith.constant 0 : index
    %371 = vector.load %arg14[%c1_181, %c0_182, %c0_183] : memref<2x32x32xf32, #tpu.memory_space<vmem>>, vector<1x32x32xf32>
    %372 = vector.shape_cast %371 : vector<1x32x32xf32> to vector<32x32xf32>
    %cst_184 = arith.constant dense<0.000000e+00> : vector<16x32xf32>
    %373 = tpu.matmul %370, %372, %cst_184 {dimension_numbers = #tpu.dot_dimension_numbers<[1], [0], [0], [1], [0, 0, 1, 1], [], []>} : vector<16x32xf32>, vector<32x32xf32>, vector<16x32xf32> -> vector<16x32xf32>
    %c1_185 = arith.constant 1 : index
    %c0_186 = arith.constant 0 : index
    %c0_187 = arith.constant 0 : index
    %374 = vector.load %arg15[%c1_185, %c0_186, %c0_187] : memref<2x1x32xf32, #tpu.memory_space<vmem>>, vector<1x1x32xf32>
    %375 = vector.shape_cast %374 : vector<1x1x32xf32> to vector<1x32xf32>
    %376 = vector.broadcast %375 : vector<1x32xf32> to vector<16x32xf32>
    %377 = arith.addf %373, %376 : vector<16x32xf32>
    %378 = arith.addf %377, %262 : vector<16x32xf32>
    %c1_188 = arith.constant 1 : index
    %c0_189 = arith.constant 0 : index
    %c0_190 = arith.constant 0 : index
    %379 = vector.load %arg16[%c1_188, %c0_189, %c0_190] : memref<2x1x32xf32, #tpu.memory_space<vmem>>, vector<1x1x32xf32>
    %380 = vector.shape_cast %379 : vector<1x1x32xf32> to vector<1x32xf32>
    %c1_191 = arith.constant 1 : index
    %c0_192 = arith.constant 0 : index
    %c0_193 = arith.constant 0 : index
    %381 = vector.load %arg17[%c1_191, %c0_192, %c0_193] : memref<2x1x32xf32, #tpu.memory_space<vmem>>, vector<1x1x32xf32>
    %382 = vector.shape_cast %381 : vector<1x1x32xf32> to vector<1x32xf32>
    %cst_194 = arith.constant dense<0.000000e+00> : vector<16xf32>
    %383 = vector.multi_reduction <add>, %378, %cst_194 [1] : vector<16x32xf32> to vector<16xf32>
    %384 = vector.shape_cast %383 : vector<16xf32> to vector<16x1xf32>
    %cst_195 = arith.constant 3.200000e+01 : f32
    %385 = vector.broadcast %cst_195 : f32 to vector<16x1xf32>
    %386 = arith.divf %384, %385 : vector<16x1xf32>
    %387 = vector.broadcast %386 : vector<16x1xf32> to vector<16x32xf32>
    %388 = arith.subf %378, %387 : vector<16x32xf32>
    %389 = arith.mulf %388, %388 : vector<16x32xf32>
    %cst_196 = arith.constant dense<0.000000e+00> : vector<16xf32>
    %390 = vector.multi_reduction <add>, %389, %cst_196 [1] : vector<16x32xf32> to vector<16xf32>
    %391 = vector.shape_cast %390 : vector<16xf32> to vector<16x1xf32>
    %cst_197 = arith.constant 3.200000e+01 : f32
    %392 = vector.broadcast %cst_197 : f32 to vector<16x1xf32>
    %393 = arith.divf %391, %392 : vector<16x1xf32>
    %cst_198 = arith.constant 9.99999974E-6 : f32
    %394 = vector.broadcast %cst_198 : f32 to vector<16x1xf32>
    %395 = arith.addf %393, %394 : vector<16x1xf32>
    %396 = math.rsqrt %395 : vector<16x1xf32>
    %397 = vector.broadcast %396 : vector<16x1xf32> to vector<16x32xf32>
    %398 = arith.mulf %388, %397 : vector<16x32xf32>
    %399 = vector.broadcast %380 : vector<1x32xf32> to vector<16x32xf32>
    %400 = arith.mulf %399, %398 : vector<16x32xf32>
    %401 = vector.broadcast %382 : vector<1x32xf32> to vector<16x32xf32>
    %402 = arith.addf %400, %401 : vector<16x32xf32>
    %403 = vector.broadcast %41 : vector<16x1xf32> to vector<16x32xf32>
    %404 = arith.mulf %402, %403 : vector<16x32xf32>
    %c1_199 = arith.constant 1 : index
    %c0_200 = arith.constant 0 : index
    %c0_201 = arith.constant 0 : index
    %405 = vector.load %arg18[%c1_199, %c0_200, %c0_201] : memref<2x32x64xf32, #tpu.memory_space<vmem>>, vector<1x32x64xf32>
    %406 = vector.shape_cast %405 : vector<1x32x64xf32> to vector<32x64xf32>
    %cst_202 = arith.constant dense<0.000000e+00> : vector<16x64xf32>
    %407 = tpu.matmul %404, %406, %cst_202 {dimension_numbers = #tpu.dot_dimension_numbers<[1], [0], [0], [1], [0, 0, 1, 1], [], []>} : vector<16x32xf32>, vector<32x64xf32>, vector<16x64xf32> -> vector<16x64xf32>
    %c1_203 = arith.constant 1 : index
    %c0_204 = arith.constant 0 : index
    %c0_205 = arith.constant 0 : index
    %408 = vector.load %arg19[%c1_203, %c0_204, %c0_205] : memref<2x1x64xf32, #tpu.memory_space<vmem>>, vector<1x1x64xf32>
    %409 = vector.shape_cast %408 : vector<1x1x64xf32> to vector<1x64xf32>
    %410 = vector.broadcast %409 : vector<1x64xf32> to vector<16x64xf32>
    %411 = arith.addf %407, %410 : vector<16x64xf32>
    %cst_206 = arith.constant 0.000000e+00 : f32
    %412 = vector.broadcast %cst_206 : f32 to vector<16x64xf32>
    %413 = arith.maximumf %411, %412 : vector<16x64xf32>
    %c1_207 = arith.constant 1 : index
    %c0_208 = arith.constant 0 : index
    %c0_209 = arith.constant 0 : index
    %414 = vector.load %arg20[%c1_207, %c0_208, %c0_209] : memref<2x64x32xf32, #tpu.memory_space<vmem>>, vector<1x64x32xf32>
    %415 = vector.shape_cast %414 : vector<1x64x32xf32> to vector<64x32xf32>
    %cst_210 = arith.constant dense<0.000000e+00> : vector<16x32xf32>
    %416 = tpu.matmul %413, %415, %cst_210 {dimension_numbers = #tpu.dot_dimension_numbers<[1], [0], [0], [1], [0, 0, 1, 1], [], []>} : vector<16x64xf32>, vector<64x32xf32>, vector<16x32xf32> -> vector<16x32xf32>
    %c1_211 = arith.constant 1 : index
    %c0_212 = arith.constant 0 : index
    %c0_213 = arith.constant 0 : index
    %417 = vector.load %arg21[%c1_211, %c0_212, %c0_213] : memref<2x1x32xf32, #tpu.memory_space<vmem>>, vector<1x1x32xf32>
    %418 = vector.shape_cast %417 : vector<1x1x32xf32> to vector<1x32xf32>
    %419 = vector.broadcast %418 : vector<1x32xf32> to vector<16x32xf32>
    %420 = arith.addf %416, %419 : vector<16x32xf32>
    %421 = arith.addf %420, %404 : vector<16x32xf32>
    %c1_214 = arith.constant 1 : index
    %c0_215 = arith.constant 0 : index
    %c0_216 = arith.constant 0 : index
    %422 = vector.load %arg22[%c1_214, %c0_215, %c0_216] : memref<2x1x32xf32, #tpu.memory_space<vmem>>, vector<1x1x32xf32>
    %423 = vector.shape_cast %422 : vector<1x1x32xf32> to vector<1x32xf32>
    %c1_217 = arith.constant 1 : index
    %c0_218 = arith.constant 0 : index
    %c0_219 = arith.constant 0 : index
    %424 = vector.load %arg23[%c1_217, %c0_218, %c0_219] : memref<2x1x32xf32, #tpu.memory_space<vmem>>, vector<1x1x32xf32>
    %425 = vector.shape_cast %424 : vector<1x1x32xf32> to vector<1x32xf32>
    %cst_220 = arith.constant dense<0.000000e+00> : vector<16xf32>
    %426 = vector.multi_reduction <add>, %421, %cst_220 [1] : vector<16x32xf32> to vector<16xf32>
    %427 = vector.shape_cast %426 : vector<16xf32> to vector<16x1xf32>
    %cst_221 = arith.constant 3.200000e+01 : f32
    %428 = vector.broadcast %cst_221 : f32 to vector<16x1xf32>
    %429 = arith.divf %427, %428 : vector<16x1xf32>
    %430 = vector.broadcast %429 : vector<16x1xf32> to vector<16x32xf32>
    %431 = arith.subf %421, %430 : vector<16x32xf32>
    %432 = arith.mulf %431, %431 : vector<16x32xf32>
    %cst_222 = arith.constant dense<0.000000e+00> : vector<16xf32>
    %433 = vector.multi_reduction <add>, %432, %cst_222 [1] : vector<16x32xf32> to vector<16xf32>
    %434 = vector.shape_cast %433 : vector<16xf32> to vector<16x1xf32>
    %cst_223 = arith.constant 3.200000e+01 : f32
    %435 = vector.broadcast %cst_223 : f32 to vector<16x1xf32>
    %436 = arith.divf %434, %435 : vector<16x1xf32>
    %cst_224 = arith.constant 9.99999974E-6 : f32
    %437 = vector.broadcast %cst_224 : f32 to vector<16x1xf32>
    %438 = arith.addf %436, %437 : vector<16x1xf32>
    %439 = math.rsqrt %438 : vector<16x1xf32>
    %440 = vector.broadcast %439 : vector<16x1xf32> to vector<16x32xf32>
    %441 = arith.mulf %431, %440 : vector<16x32xf32>
    %442 = vector.broadcast %423 : vector<1x32xf32> to vector<16x32xf32>
    %443 = arith.mulf %442, %441 : vector<16x32xf32>
    %444 = vector.broadcast %425 : vector<1x32xf32> to vector<16x32xf32>
    %445 = arith.addf %443, %444 : vector<16x32xf32>
    %446 = vector.broadcast %41 : vector<16x1xf32> to vector<16x32xf32>
    %447 = arith.mulf %445, %446 : vector<16x32xf32>
    %448 = vector.shape_cast %447 : vector<16x32xf32> to vector<2x8x32xf32>
    %c0_225 = arith.constant 0 : index
    %c0_226 = arith.constant 0 : index
    %c0_227 = arith.constant 0 : index
    %449 = vector.load %arg24[%c0_225, %c0_226, %c0_227] : memref<2x8x32xf32, #tpu.memory_space<vmem>>, vector<2x8x32xf32>
    tpu.vector_store %arg24[%c0_225, %c0_226, %c0_227], %448 {strides = array<i32>} : memref<2x8x32xf32, #tpu.memory_space<vmem>>, vector<2x8x32xf32>,
    return
  }
  func.func @transform_0(%arg0: i32, %arg1: memref<2xi32, #tpu.memory_space<smem>>) -> (i32, i32, i32) {
    %c0_i32 = arith.constant 0 : i32
    %c0_i32_0 = arith.constant 0 : i32
    %c0_i32_1 = arith.constant 0 : i32
    return %arg0, %c0_i32, %c0_i32_0 : i32, i32, i32
  }
  func.func @transform_1(%arg0: i32, %arg1: memref<2xi32, #tpu.memory_space<smem>>) -> (i32, i32) {
    %c0_i32 = arith.constant 0 : i32
    %c0_i32_0 = arith.constant 0 : i32
    %c0_i32_1 = arith.constant 0 : i32
    return %c0_i32, %c0_i32_0 : i32, i32
  }
  func.func @transform_2(%arg0: i32, %arg1: memref<2xi32, #tpu.memory_space<smem>>) -> (i32, i32) {
    %c0_i32 = arith.constant 0 : i32
    %c0_i32_0 = arith.constant 0 : i32
    %c0_i32_1 = arith.constant 0 : i32
    return %c0_i32, %c0_i32_0 : i32, i32
  }
  func.func @transform_3(%arg0: i32, %arg1: memref<2xi32, #tpu.memory_space<smem>>) -> (i32, i32) {
    %c0_i32 = arith.constant 0 : i32
    %c0_i32_0 = arith.constant 0 : i32
    %c0_i32_1 = arith.constant 0 : i32
    return %c0_i32, %c0_i32_0 : i32, i32
  }
  func.func @transform_4(%arg0: i32, %arg1: memref<2xi32, #tpu.memory_space<smem>>) -> (i32, i32) {
    %c0_i32 = arith.constant 0 : i32
    %c0_i32_0 = arith.constant 0 : i32
    %c0_i32_1 = arith.constant 0 : i32
    return %c0_i32, %c0_i32_0 : i32, i32
  }
  func.func @transform_5(%arg0: i32, %arg1: memref<2xi32, #tpu.memory_space<smem>>) -> (i32, i32) {
    %c0_i32 = arith.constant 0 : i32
    %c0_i32_0 = arith.constant 0 : i32
    %c0_i32_1 = arith.constant 0 : i32
    return %c0_i32, %c0_i32_0 : i32, i32
  }
  func.func @transform_6(%arg0: i32, %arg1: memref<2xi32, #tpu.memory_space<smem>>) -> (i32, i32, i32) {
    %c0_i32 = arith.constant 0 : i32
    %c0_i32_0 = arith.constant 0 : i32
    %c0_i32_1 = arith.constant 0 : i32
    %c0_i32_2 = arith.constant 0 : i32
    return %c0_i32, %c0_i32_0, %c0_i32_1 : i32, i32, i32
  }
  func.func @transform_7(%arg0: i32, %arg1: memref<2xi32, #tpu.memory_space<smem>>) -> (i32, i32, i32) {
    %c0_i32 = arith.constant 0 : i32
    %c0_i32_0 = arith.constant 0 : i32
    %c0_i32_1 = arith.constant 0 : i32
    %c0_i32_2 = arith.constant 0 : i32
    return %c0_i32, %c0_i32_0, %c0_i32_1 : i32, i32, i32
  }
  func.func @transform_8(%arg0: i32, %arg1: memref<2xi32, #tpu.memory_space<smem>>) -> (i32, i32, i32) {
    %c0_i32 = arith.constant 0 : i32
    %c0_i32_0 = arith.constant 0 : i32
    %c0_i32_1 = arith.constant 0 : i32
    %c0_i32_2 = arith.constant 0 : i32
    return %c0_i32, %c0_i32_0, %c0_i32_1 : i32, i32, i32
  }
  func.func @transform_9(%arg0: i32, %arg1: memref<2xi32, #tpu.memory_space<smem>>) -> (i32, i32, i32) {
    %c0_i32 = arith.constant 0 : i32
    %c0_i32_0 = arith.constant 0 : i32
    %c0_i32_1 = arith.constant 0 : i32
    %c0_i32_2 = arith.constant 0 : i32
    return %c0_i32, %c0_i32_0, %c0_i32_1 : i32, i32, i32
  }
  func.func @transform_10(%arg0: i32, %arg1: memref<2xi32, #tpu.memory_space<smem>>) -> (i32, i32, i32) {
    %c0_i32 = arith.constant 0 : i32
    %c0_i32_0 = arith.constant 0 : i32
    %c0_i32_1 = arith.constant 0 : i32
    %c0_i32_2 = arith.constant 0 : i32
    return %c0_i32, %c0_i32_0, %c0_i32_1 : i32, i32, i32
  }
  func.func @transform_11(%arg0: i32, %arg1: memref<2xi32, #tpu.memory_space<smem>>) -> (i32, i32, i32) {
    %c0_i32 = arith.constant 0 : i32
    %c0_i32_0 = arith.constant 0 : i32
    %c0_i32_1 = arith.constant 0 : i32
    %c0_i32_2 = arith.constant 0 : i32
    return %c0_i32, %c0_i32_0, %c0_i32_1 : i32, i32, i32
  }
  func.func @transform_12(%arg0: i32, %arg1: memref<2xi32, #tpu.memory_space<smem>>) -> (i32, i32, i32) {
    %c0_i32 = arith.constant 0 : i32
    %c0_i32_0 = arith.constant 0 : i32
    %c0_i32_1 = arith.constant 0 : i32
    %c0_i32_2 = arith.constant 0 : i32
    return %c0_i32, %c0_i32_0, %c0_i32_1 : i32, i32, i32
  }
  func.func @transform_13(%arg0: i32, %arg1: memref<2xi32, #tpu.memory_space<smem>>) -> (i32, i32, i32) {
    %c0_i32 = arith.constant 0 : i32
    %c0_i32_0 = arith.constant 0 : i32
    %c0_i32_1 = arith.constant 0 : i32
    %c0_i32_2 = arith.constant 0 : i32
    return %c0_i32, %c0_i32_0, %c0_i32_1 : i32, i32, i32
  }
  func.func @transform_14(%arg0: i32, %arg1: memref<2xi32, #tpu.memory_space<smem>>) -> (i32, i32, i32) {
    %c0_i32 = arith.constant 0 : i32
    %c0_i32_0 = arith.constant 0 : i32
    %c0_i32_1 = arith.constant 0 : i32
    %c0_i32_2 = arith.constant 0 : i32
    return %c0_i32, %c0_i32_0, %c0_i32_1 : i32, i32, i32
  }
  func.func @transform_15(%arg0: i32, %arg1: memref<2xi32, #tpu.memory_space<smem>>) -> (i32, i32, i32) {
    %c0_i32 = arith.constant 0 : i32
    %c0_i32_0 = arith.constant 0 : i32
    %c0_i32_1 = arith.constant 0 : i32
    %c0_i32_2 = arith.constant 0 : i32
    return %c0_i32, %c0_i32_0, %c0_i32_1 : i32, i32, i32
  }
  func.func @transform_16(%arg0: i32, %arg1: memref<2xi32, #tpu.memory_space<smem>>) -> (i32, i32, i32) {
    %c0_i32 = arith.constant 0 : i32
    %c0_i32_0 = arith.constant 0 : i32
    %c0_i32_1 = arith.constant 0 : i32
    %c0_i32_2 = arith.constant 0 : i32
    return %c0_i32, %c0_i32_0, %c0_i32_1 : i32, i32, i32
  }
  func.func @transform_17(%arg0: i32, %arg1: memref<2xi32, #tpu.memory_space<smem>>) -> (i32, i32, i32) {
    %c0_i32 = arith.constant 0 : i32
    %c0_i32_0 = arith.constant 0 : i32
    %c0_i32_1 = arith.constant 0 : i32
    %c0_i32_2 = arith.constant 0 : i32
    return %c0_i32, %c0_i32_0, %c0_i32_1 : i32, i32, i32
  }
  func.func @transform_18(%arg0: i32, %arg1: memref<2xi32, #tpu.memory_space<smem>>) -> (i32, i32, i32) {
    %c0_i32 = arith.constant 0 : i32
    %c0_i32_0 = arith.constant 0 : i32
    %c0_i32_1 = arith.constant 0 : i32
    %c0_i32_2 = arith.constant 0 : i32
    return %c0_i32, %c0_i32_0, %c0_i32_1 : i32, i32, i32
  }
  func.func @transform_19(%arg0: i32, %arg1: memref<2xi32, #tpu.memory_space<smem>>) -> (i32, i32, i32) {
    %c0_i32 = arith.constant 0 : i32
    %c0_i32_0 = arith.constant 0 : i32
    %c0_i32_1 = arith.constant 0 : i32
    %c0_i32_2 = arith.constant 0 : i32
    return %c0_i32, %c0_i32_0, %c0_i32_1 : i32, i32, i32
  }
  func.func @transform_20(%arg0: i32, %arg1: memref<2xi32, #tpu.memory_space<smem>>) -> (i32, i32, i32) {
    %c0_i32 = arith.constant 0 : i32
    %c0_i32_0 = arith.constant 0 : i32
    %c0_i32_1 = arith.constant 0 : i32
    %c0_i32_2 = arith.constant 0 : i32
    return %c0_i32, %c0_i32_0, %c0_i32_1 : i32, i32, i32
  }
  func.func @transform_21(%arg0: i32, %arg1: memref<2xi32, #tpu.memory_space<smem>>) -> (i32, i32, i32) {
    %c0_i32 = arith.constant 0 : i32
    %c0_i32_0 = arith.constant 0 : i32
    %c0_i32_1 = arith.constant 0 : i32
    %c0_i32_2 = arith.constant 0 : i32
    return %c0_i32, %c0_i32_0, %c0_i32_1 : i32, i32, i32
  }
  func.func @transform_22(%arg0: i32, %arg1: memref<2xi32, #tpu.memory_space<smem>>) -> (i32, i32, i32) {
    %c0_i32 = arith.constant 0 : i32
    %c0_i32_0 = arith.constant 0 : i32
    %c0_i32_1 = arith.constant 0 : i32
    return %arg0, %c0_i32, %c0_i32_0 : i32, i32, i32
  }
}

</mosaic_0001>

<bundles_post_ra>
// kernel: tpu_custom_call.1
= control target key start
LH: loop header
LB: loop body
LE: loop exit
PB: predicated region body
PF: predicated region fallthrough
CT: control target
= control target key end

     0   :  { %s6490_s0 = inlined_call_operand.hbm [shape: s32[2], index: 0, kind: input, shape index: {}]   ;;  %s6491_s1 = inlined_call_operand.hbm [shape: f32[2,8,16], index: 1, kind: input, shape index: {}]   ;;  %s6492_s2 = inlined_call_operand.hbm [shape: f32[8,32], index: 2, kind: input, shape index: {}]   ;;  %s6493_s3 = inlined_call_operand.hbm [shape: f32[16,32], index: 3, kind: input, shape index: {}]   ;;  %s6494_s4 = inlined_call_operand.vmem [shape: f32[1,32], index: 4, kind: input, shape index: {}]   ;;  %s6495_s5 = inlined_call_operand.hbm [shape: f32[1,32], index: 5, kind: input, shape index: {}]   ;;  %s6496_s6 = inlined_call_operand.hbm [shape: f32[1,32], index: 6, kind: input, shape index: {}]   ;;  %s6497_s7 = inlined_call_operand.vmem [shape: f32[2,32,32], index: 7, kind: input, shape index: {}]   ;;  %s6498_s8 = inlined_call_operand.vmem [shape: f32[2,1,32], index: 8, kind: input, shape index: {}]   ;;  %s6499_s9 = inlined_call_operand.vmem [shape: f32[2,32,32], index: 9, kind: input, shape index: {}]   ;;  %s6500_s10 = inlined_call_operand.vmem [shape: f32[2,1,32], index: 10, kind: input, shape index: {}]   ;;  %s6501_s11 = inlined_call_operand.vmem [shape: f32[2,32,32], index: 11, kind: input, shape index: {}]   ;;  %s6502_s12 = inlined_call_operand.vmem [shape: f32[2,1,32], index: 12, kind: input, shape index: {}]   ;;  %s6503_s13 = inlined_call_operand.hbm [shape: f32[2,32,32], index: 13, kind: input, shape index: {}]   ;;  %s6504_s14 = inlined_call_operand.hbm [shape: f32[2,1,32], index: 14, kind: input, shape index: {}]   ;;  %s6505_s15 = inlined_call_operand.hbm [shape: f32[2,1,32], index: 15, kind: input, shape index: {}]   ;;  %s6506_s16 = inlined_call_operand.hbm [shape: f32[2,1,32], index: 16, kind: input, shape index: {}]   ;;  %s6507_s17 = inlined_call_operand.hbm [shape: f32[2,32,64], index: 17, kind: input, shape index: {}]   ;;  %s6508_s18 = inlined_call_operand.hbm [shape: f32[2,1,64], index: 18, kind: input, shape index: {}]   ;;  %s6509_s19 = inlined_call_operand.vmem [shape: f32[2,64,32], index: 19, kind: input, shape index: {}]   ;;  %s6510_s20 = inlined_call_operand.vmem [shape: f32[2,1,32], index: 20, kind: input, shape index: {}]   ;;  %s6511_s21 = inlined_call_operand.vmem [shape: f32[2,1,32], index: 21, kind: input, shape index: {}]   ;;  %s6512_s22 = inlined_call_operand.vmem [shape: f32[2,1,32], index: 22, kind: input, shape index: {}]   ;;  %s6513_s23 = inlined_call_operand.hbm [shape: f32[2,8,32], index: 23, kind: output, shape index: {}]  }
   0x1   :  { %6524 = sst [smem:[#allocation32_spill]] %s6490_s0 }
   0x2   :  { %6525 = sst [smem:[#allocation33_spill]] %s6491_s1  ;;  %s6533_s24 = sld [smem:[#allocation32_spill]] }
   0x3   :  { %6526 = sst [smem:[#allocation34_spill]] %s6492_s2 }
   0x4   :  { %6527 = sst [smem:[#allocation35_spill]] %s6493_s3 }
   0x5   :  { %6528 = sst [smem:[#allocation36_spill]] %s6494_s4 }
   0x6   :  { %6529 = sst [smem:[#allocation37_spill]] %s6495_s5 }
   0x7   :  { %6530 = sst [smem:[#allocation38_spill]] %s6496_s6 }
   0x8   :  { %6531 = sst [smem:[#allocation39_spill]] %s6497_s7 }
   0x9   :  { %6532 = sst [smem:[#allocation40_spill]] %s6500_s10  ;;  %s5256_s10 = scalar_lea.hbm %s6533_s24, 16 }
   0xa   :  { %p5257_p0 = scmp.ne.s32.totalorder %s6533_s24, %s5256_s10  ;;  %p5260_p1 = scmp.lt.u32.totalorder %s5256_s10, %s6533_s24 }
   0xc   :  { %p5262_p2 = pnand %p5260_p1, %p5257_p0 }
   0xe   :  { %5265 = shalt.err (!%p5262_p2)  }
   0xf   :  { %s5546_s2 = smov [#allocation4]  }
  0x10   :  { %29 = dma.hbm_to_smem %s6533_s24, 16, %s5546_s2, [#allocation3] }
  0x11   :  { %5530 = dma.done.wait [#allocation3], 16 }
  0x12   :  { %5531 = vsyncadd [#allocation3], 4294967280 }
  0x13   :  { %31 = sfence }
  0x14   :  { %32 = vsyncpa [#allocation6], 0 }
  0x15   :  { %33 = vsyncpa [#allocation9], 0 }
  0x16   :  { %34 = vsyncpa [#allocation12], 0 }
  0x17   :  { %35 = vsyncpa [#allocation15], 0 }
  0x18   :  { %36 = vsyncpa [#allocation18], 0 }
  0x19   :  { %37 = vsyncpa [#allocation21], 0 }
  0x1a   :  { %38 = vsyncpa [#allocation7], 0  ;;  %s5547_s7 = smov [#allocation8]   ;;  %s5548_s10 = smov [#allocation11]  }
  0x1b   :  { %s57_s28 = sshll.u32 %s5547_s7, 4  ;;  %s81_s29 = sshll.u32 %s5548_s10, 4  ;;  %s58_s28 = int_to_ptr.vmem [resolvable:$true] %s57_s28  ;;  %s82_s29 = int_to_ptr.vmem [resolvable:$true] %s81_s29 }
  0x1c   :  { %s6534_s4 = sld [smem:[#allocation34_spill]] }
  0x22   :  { %s5266_s30 = scalar_lea.hbm %s6534_s4, 128 }
  0x23   :  { %p5267_p3 = scmp.ne.s32.totalorder %s6534_s4, %s5266_s30  ;;  %p5270_p4 = scmp.lt.u32.totalorder %s5266_s30, %s6534_s4 }
  0x25   :  { %p5272_p5 = pnand %p5270_p4, %p5267_p3 }
  0x27   :  { %5275 = shalt.err (!%p5272_p5)
}
  0x28   :  { %s5276_s26 = scalar_lea.vmem %s58_s28, 128  ;;  %p5281_p7 = scmp.lt.s32.totalorder %s58_s28, %s58_s28 }
  0x29   :  { %p5277_p6 = scmp.ne.s32.totalorder %s58_s28, %s5276_s26  ;;  %p5282_p8 = scmp.lt.s32.totalorder %s5276_s26, %s5276_s26 }
  0x2b   :  { %p5283_p9 = por %p5282_p8, %p5281_p7 }
  0x2d   :  { %p5284_p10 = pnand %p5283_p9, %p5277_p6 }
  0x2f   :  { %5287 = shalt.err (!%p5284_p10)
}
  0x30   :  { %60 = dma.hbm_to_vmem [thread:$0]  %s6534_s4, 128, %s58_s28, [#allocation9]  }
  0x31   :  { %s6535_s10 = sld [smem:[#allocation37_spill]] }
  0x37   :  { %s5288_s3 = scalar_lea.hbm %s6535_s10, 16 }
  0x38   :  { %p5289_p11 = scmp.ne.s32.totalorder %s6535_s10, %s5288_s3  ;;  %p5292_p12 = scmp.lt.u32.totalorder %s5288_s3, %s6535_s10 }
  0x3a   :  { %p5294_p13 = pnand %p5292_p12, %p5289_p11 }
  0x3c   :  { %5297 = shalt.err (!%p5294_p13)
}
  0x3d   :  { %s5298_s5 = scalar_lea.vmem %s82_s29, 16  ;;  %s5302_s1 = scalar_lea.vmem %s82_s29, 32 }
  0x3e   :  { %p5299_p0 = scmp.ne.s32.totalorder %s82_s29, %s5298_s5  ;;  %p5303_p1 = scmp.lt.s32.totalorder %s82_s29, %s82_s29 }
  0x3f   :  { %p5304_p2 = scmp.lt.s32.totalorder %s5302_s1, %s5298_s5 }
  0x41   :  { %p5305_p3 = por %p5304_p2, %p5303_p1 }
  0x43   :  { %p5306_p4 = pnand %p5305_p3, %p5299_p0 }
  0x45   :  { %5309 = shalt.err (!%p5306_p4)
}
  0x46   :  { %84 = dma.hbm_to_vmem [thread:$0]  %s6535_s10, 16, %s82_s29, [#allocation12]  }
  0x47   :  { %s5549_s26 = smov [#allocation14]   ;;  %s5310_s7 = scalar_lea.hbm %s6503_s13, 1024 }
  0x48   :  { %s112_s2 = sshll.u32 %s5549_s26, 4  ;;  %p5311_p5 = scmp.ne.s32.totalorder %s6503_s13, %s5310_s7  ;;  %s113_s2 = int_to_ptr.vmem [resolvable:$true] %s112_s2 }
  0x49   :  { %p5314_p6 = scmp.lt.u32.totalorder %s5310_s7, %s6503_s13 }
  0x4b   :  { %p5316_p7 = pnand %p5314_p6, %p5311_p5 }
  0x4d   :  { %5319 = shalt.err (!%p5316_p7)
}
  0x4e   :  { %s5320_s25 = scalar_lea.vmem %s113_s2, 1024  ;;  %p5325_p9 = scmp.lt.s32.totalorder %s113_s2, %s113_s2 }
  0x4f   :  { %p5321_p8 = scmp.ne.s32.totalorder %s113_s2, %s5320_s25  ;;  %p5326_p10 = scmp.lt.s32.totalorder %s5320_s25, %s5320_s25 }
  0x51   :  { %p5327_p11 = por %p5326_p10, %p5325_p9 }
  0x53   :  { %p5328_p12 = pnand %p5327_p11, %p5321_p8 }
  0x55   :  { %5331 = shalt.err (!%p5328_p12)
}
  0x56   :  { %s5550_s29 = smov 128   ;;  %s5551_s10 = smov 8  }
  0x57   :  { %118 = dma.hbm_to_vmem [thread:$0]  %s6503_s13, 1024, %s113_s2, [#allocation15], %s5550_s29, %s5550_s29, %s5551_s10  }
  0x58   :  { %s5552_s28 = smov [#allocation17]   ;;  %s5553_s26 = smov [#allocation20]  }
  0x59   :  { %s136_s4 = sshll.u32 %s5552_s28, 4  ;;  %s160_s6 = sshll.u32 %s5553_s26, 4  ;;  %s137_s4 = int_to_ptr.vmem [resolvable:$true] %s136_s4  ;;  %s161_s6 = int_to_ptr.vmem [resolvable:$true] %s160_s6 }
  0x5a   :  { %s5332_s3 = scalar_lea.hbm %s6505_s15, 32 }
  0x5b   :  { %p5333_p13 = scmp.ne.s32.totalorder %s6505_s15, %s5332_s3  ;;  %p5336_p0 = scmp.lt.u32.totalorder %s5332_s3, %s6505_s15 }
  0x5d   :  { %p5338_p1 = pnand %p5336_p0, %p5333_p13 }
  0x5f   :  { %5341 = shalt.err (!%p5338_p1)
}
  0x60   :  { %s5342_s13 = scalar_lea.vmem %s137_s4, 32  ;;  %p5347_p3 = scmp.lt.s32.totalorder %s137_s4, %s137_s4 }
  0x61   :  { %p5343_p2 = scmp.ne.s32.totalorder %s137_s4, %s5342_s13  ;;  %p5348_p4 = scmp.lt.s32.totalorder %s5342_s13, %s5342_s13 }
  0x63   :  { %p5349_p5 = por %p5348_p4, %p5347_p3 }
  0x65   :  { %p5350_p6 = pnand %p5349_p5, %p5343_p2 }
  0x67   :  { %5353 = shalt.err (!%p5350_p6)
}
  0x68   :  { %s6522_s2 = smov 16   ;;  %s5555_s5 = smov 1  }
  0x69   :  { %142 = dma.hbm_to_vmem [thread:$0]  %s6505_s15, 32, %s137_s4, [#allocation18], %s6522_s2, %s6522_s2, %s5555_s5  }
  0x6a   :  { %s5354_s7 = scalar_lea.hbm %s6507_s17, 1024 }
  0x6b   :  { %p5355_p7 = scmp.ne.s32.totalorder %s6507_s17, %s5354_s7  ;;  %p5358_p8 = scmp.lt.u32.totalorder %s5354_s7, %s6507_s17 }
  0x6d   :  { %p5360_p9 = pnand %p5358_p8, %p5355_p7 }
  0x6f   :  { %5363 = shalt.err (!%p5360_p9)
}
  0x70   :  { %s5364_s25 = scalar_lea.vmem %s161_s6, 1024  ;;  %p5369_p11 = scmp.lt.s32.totalorder %s161_s6, %s161_s6 }
  0x71   :  { %p5365_p10 = scmp.ne.s32.totalorder %s161_s6, %s5364_s25  ;;  %p5370_p12 = scmp.lt.s32.totalorder %s5364_s25, %s5364_s25 }
  0x73   :  { %p5371_p13 = por %p5370_p12, %p5369_p11 }
  0x75   :  { %p5372_p0 = pnand %p5371_p13, %p5365_p10 }
  0x77   :  { %5375 = shalt.err (!%p5372_p0)
}
  0x78   :  { %166 = dma.hbm_to_vmem [thread:$0]  %s6507_s17, 1024, %s161_s6, [#allocation21], %s5550_s29, %s5550_s29, %s5551_s10  }
  0x79   :  { %s5556_s13 = smov [#allocation5]   ;;  %s5557_s28 = smov [#allocation10]  }
  0x7a   :  { %s44_s1 = sshll.u32 %s5556_s13, 4  ;;  %s66_s26 = sshll.u32 %s5557_s28, 4  ;;  %s45_s1 = int_to_ptr.vmem [resolvable:$true] %s44_s1  ;;  %s67_s26 = int_to_ptr.vmem [resolvable:$true] %s66_s26 }
  0x7b   :  { %s6536_s3 = sld [smem:[#allocation33_spill]] }
  0x81   :  { %s5376_s0 = scalar_lea.hbm %s6536_s3, 256 }
  0x82   :  { %p5377_p1 = scmp.ne.s32.totalorder %s6536_s3, %s5376_s0  ;;  %p5380_p2 = scmp.lt.u32.totalorder %s5376_s0, %s6536_s3 }
  0x84   :  { %p5382_p3 = pnand %p5380_p2, %p5377_p1 }
  0x86   :  { %5385 = shalt.err (!%p5382_p3)
}
  0x87   :  { %s5386_s17 = scalar_lea.vmem %s45_s1, 256  ;;  %p5391_p5 = scmp.lt.s32.totalorder %s45_s1, %s45_s1 }
  0x88   :  { %p5387_p4 = scmp.ne.s32.totalorder %s45_s1, %s5386_s17  ;;  %p5392_p6 = scmp.lt.s32.totalorder %s5386_s17, %s5386_s17 }
  0x8a   :  { %p5393_p7 = por %p5392_p6, %p5391_p5 }
  0x8c   :  { %p5394_p8 = pnand %p5393_p7, %p5387_p4 }
  0x8e   :  { %5397 = shalt.err (!%p5394_p8)
}
  0x8f   :  { %50 = dma.hbm_to_vmem [thread:$0]  %s6536_s3, 256, %s45_s1, [#allocation6], %s5550_s29, %s5550_s29, %s5551_s10  }
  0x90   :  { %s6537_s13 = sld [smem:[#allocation35_spill]] }
  0x96   :  { %s5398_s28 = scalar_lea.hbm %s6537_s13, 256 }
  0x97   :  { %p5399_p9 = scmp.ne.s32.totalorder %s6537_s13, %s5398_s28  ;;  %p5402_p10 = scmp.lt.u32.totalorder %s5398_s28, %s6537_s13 }
  0x99   :  { %p5404_p11 = pnand %p5402_p10, %p5399_p9 }
  0x9b   :  { %5407 = shalt.err (!%p5404_p11)
}
  0x9c   :  { %s5408_s30 = scalar_lea.vmem %s67_s26, 256  ;;  %p5413_p13 = scmp.lt.s32.totalorder %s67_s26, %s67_s26 }
  0x9d   :  { %p5409_p12 = scmp.ne.s32.totalorder %s67_s26, %s5408_s30  ;;  %p5414_p0 = scmp.lt.s32.totalorder %s5408_s30, %s5408_s30 }
  0x9f   :  { %p5415_p1 = por %p5414_p0, %p5413_p13 }
  0xa1   :  { %p5416_p2 = pnand %p5415_p1, %p5409_p12 }
  0xa3   :  { %5419 = shalt.err (!%p5416_p2)
}
  0xa4   :  { %72 = dma.hbm_to_vmem [thread:$0]  %s6537_s13, 256, %s67_s26, [#allocation9], %s5550_s29, %s5550_s29, %s5551_s10  }
  0xa5   :  { %s5558_s25 = smov [#allocation13]   ;;  %s5559_s6 = smov [#allocation16]  }
  0xa6   :  { %s91_s17 = sshll.u32 %s5558_s25, 4  ;;  %s124_s15 = sshll.u32 %s5559_s6, 4  ;;  %s92_s17 = int_to_ptr.vmem [resolvable:$true] %s91_s17  ;;  %s125_s15 = int_to_ptr.vmem [resolvable:$true] %s124_s15 }
  0xa7   :  { %s6538_s28 = sld [smem:[#allocation38_spill]] }
  0xad   :  { %s5420_s27 = scalar_lea.hbm %s6538_s28, 16 }
  0xae   :  { %p5421_p3 = scmp.ne.s32.totalorder %s6538_s28, %s5420_s27  ;;  %p5424_p4 = scmp.lt.u32.totalorder %s5420_s27, %s6538_s28 }
  0xb0   :  { %p5426_p5 = pnand %p5424_p4, %p5421_p3 }
  0xb2   :  { %5429 = shalt.err (!%p5426_p5)
}
  0xb3   :  { %s5430_s26 = scalar_lea.vmem %s92_s17, 16  ;;  %s5434_s13 = scalar_lea.vmem %s92_s17, 32 }
  0xb4   :  { %p5431_p6 = scmp.ne.s32.totalorder %s92_s17, %s5430_s26  ;;  %p5435_p7 = scmp.lt.s32.totalorder %s92_s17, %s92_s17 }
  0xb5   :  { %p5436_p8 = scmp.lt.s32.totalorder %s5434_s13, %s5430_s26 }
  0xb7   :  { %p5437_p9 = por %p5436_p8, %p5435_p7 }
  0xb9   :  { %p5438_p10 = pnand %p5437_p9, %p5431_p6 }
  0xbb   :  { %5441 = shalt.err (!%p5438_p10)
}
  0xbc   :  { %94 = dma.hbm_to_vmem [thread:$0]  %s6538_s28, 16, %s92_s17, [#allocation12]  }
  0xbd   :  { %s5442_s4 = scalar_lea.hbm %s6504_s14, 32 }
  0xbe   :  { %p5443_p11 = scmp.ne.s32.totalorder %s6504_s14, %s5442_s4  ;;  %p5446_p12 = scmp.lt.u32.totalorder %s5442_s4, %s6504_s14 }
  0xc0   :  { %p5448_p13 = pnand %p5446_p12, %p5443_p11 }
  0xc2   :  { %5451 = shalt.err (!%p5448_p13)
}
  0xc3   :  { %s5452_s24 = scalar_lea.vmem %s125_s15, 32  ;;  %p5457_p1 = scmp.lt.s32.totalorder %s125_s15, %s125_s15 }
  0xc4   :  { %p5453_p0 = scmp.ne.s32.totalorder %s125_s15, %s5452_s24  ;;  %p5458_p2 = scmp.lt.s32.totalorder %s5452_s24, %s5452_s24 }
  0xc6   :  { %p5459_p3 = por %p5458_p2, %p5457_p1 }
  0xc8   :  { %p5460_p4 = pnand %p5459_p3, %p5453_p0 }
  0xca   :  { %5463 = shalt.err (!%p5460_p4)
}
  0xcb   :  { %s6539_s17 = smov 16   ;;  %s5560_s26 = smov [#allocation19]  }
  0xcc   :  { %130 = dma.hbm_to_vmem [thread:$0]  %s6504_s14, 32, %s125_s15, [#allocation15], %s6539_s17, %s6539_s17, %s5555_s5  }
  0xcd   :  { %s148_s13 = sshll.u32 %s5560_s26, 4  ;;  %s5561_s1 = smov [#allocation22]   ;;  %s149_s13 = int_to_ptr.vmem [resolvable:$true] %s148_s13 }
  0xce   :  { %s172_s3 = sshll.u32 %s5561_s1, 4  ;;  %s5464_s4 = scalar_lea.hbm %s6506_s16, 32  ;;  %s173_s3 = int_to_ptr.vmem [resolvable:$true] %s172_s3 }
  0xcf   :  { %p5465_p5 = scmp.ne.s32.totalorder %s6506_s16, %s5464_s4  ;;  %p5468_p6 = scmp.lt.u32.totalorder %s5464_s4, %s6506_s16 }
  0xd1   :  { %p5470_p7 = pnand %p5468_p6, %p5465_p5 }
  0xd3   :  { %5473 = shalt.err (!%p5470_p7)
}
  0xd4   :  { %s5474_s14 = scalar_lea.vmem %s149_s13, 32  ;;  %p5479_p9 = scmp.lt.s32.totalorder %s149_s13, %s149_s13 }
  0xd5   :  { %p5475_p8 = scmp.ne.s32.totalorder %s149_s13, %s5474_s14  ;;  %p5480_p10 = scmp.lt.s32.totalorder %s5474_s14, %s5474_s14 }
  0xd7   :  { %p5481_p11 = por %p5480_p10, %p5479_p9 }
  0xd9   :  { %p5482_p12 = pnand %p5481_p11, %p5475_p8 }
  0xdb   :  { %5485 = shalt.err (!%p5482_p12)
}
  0xdc   :  { %154 = dma.hbm_to_vmem [thread:$0]  %s6506_s16, 32, %s149_s13, [#allocation18], %s6539_s17, %s6539_s17, %s5555_s5  }
  0xdd   :  { %s5486_s26 = scalar_lea.hbm %s6508_s18, 32 }
  0xde   :  { %p5487_p13 = scmp.ne.s32.totalorder %s6508_s18, %s5486_s26  ;;  %p5490_p0 = scmp.lt.u32.totalorder %s5486_s26, %s6508_s18 }
  0xe0   :  { %p5492_p1 = pnand %p5490_p0, %p5487_p13 }
  0xe2   :  { %5495 = shalt.err (!%p5492_p1)
}
  0xe3   :  { %s5496_s2 = scalar_lea.vmem %s173_s3, 32  ;;  %p5501_p3 = scmp.lt.s32.totalorder %s173_s3, %s173_s3 }
  0xe4   :  { %p5497_p2 = scmp.ne.s32.totalorder %s173_s3, %s5496_s2  ;;  %p5502_p4 = scmp.lt.s32.totalorder %s5496_s2, %s5496_s2 }
  0xe6   :  { %p5503_p5 = por %p5502_p4, %p5501_p3 }
  0xe8   :  { %p5504_p6 = pnand %p5503_p5, %p5497_p2 }
  0xea   :  { %5507 = shalt.err (!%p5504_p6)
}
  0xeb   :  { %178 = dma.hbm_to_vmem [thread:$0]  %s6508_s18, 32, %s173_s3, [#allocation21], %s6539_s17, %s6539_s17, %s5555_s5  }
  0xec   :  { %5532 = dma.done.wait [#allocation6], 256  }
  0xed   :  { %5533 = vsyncadd [#allocation6], 4294967040 }
  0xee   :  { %5534 = dma.done.wait [#allocation9], 384  }
  0xef   :  { %5535 = vsyncadd [#allocation9], 4294966912 }
  0xf0   :  { %5536 = dma.done.wait [#allocation12], 32  }
  0xf1   :  { %5537 = vsyncadd [#allocation12], 4294967264 }
  0xf2   :  { %5538 = dma.done.wait [#allocation15], 1056  }
  0xf3   :  { %5539 = vsyncadd [#allocation15], 4294966240 }
  0xf4   :  { %5540 = dma.done.wait [#allocation18], 64  }
  0xf5   :  { %5541 = vsyncadd [#allocation18], 4294967232 }
  0xf6   :  { %5542 = dma.done.wait [#allocation21], 1056  }
  0xf7   :  { %5543 = vsyncadd [#allocation21], 4294966240  ;;  %vm274_vm0 = vcmask 130048   ;;  %v265_v0 = vld [vmem:[#allocation10] sm:$0xff]  ;;  %v266_v1 = vld [vmem:[#allocation10 + $0x8] sm:$0xff]  ;;  %s6540_s3 = sld [smem:[#allocation36_spill]] }
  0xf8   :  { %v263_v2 = vld [vmem:[#allocation5] sm:$0xff]  ;;  %v5033_v3 = vpack.c.bf16 %v266_v1, %v265_v0  ;;  %v264_v4 = vld [vmem:[#allocation5 + $0x8] sm:$0xff]  ;;  %vm358_vm1 = vcmask 261120   ;;  %s6541_s0 = sld [smem:[#allocation39_spill]]  ;;  %v583_v25 = vld [vmem:[%s6501_s11] sm:$0xff]  ;;  %v5562_v59 = vmov 0.0  }
  0xf9   :  { %4722 = vmatprep.mubr.msk.f32.mxu0 %vm274_vm0, %v263_v2  ;;  %v584_v26 = vld [vmem:[%s6501_s11 + $0x8] sm:$0xff]  ;;  %v585_v31 = vld [vmem:[%s6501_s11 + $0x10] sm:$0xff]  ;;  %v586_v32 = vld [vmem:[%s6501_s11 + $0x18] sm:$0xff]  ;;  %vm5563_vm2 = vmmov 0   ;;  %s6542_s2 = sld [smem:[#allocation40_spill]]  ;;  %vm671_vm3 = vcmask 64512  }
  0xfa   :  { %5034 = vmatprep.subr.bf16.mxu0 %v5033_v3  ;;  %v5053_v27 = vpack.c.bf16 %v584_v26, %v583_v25  ;;  %v5057_v33 = vpack.c.bf16 %v586_v32, %v585_v31  ;;  %v497_v34 = vld [vmem:[%s6499_s9] sm:$0xff]  ;;  %v498_v35 = vld [vmem:[%s6499_s9 + $0x8] sm:$0xff]  ;;  %v4450_v44 = vld [vmem:[#allocation11] ss:$0 sm:$0xff]  ;;  %s226_s16 = sld [smem:[#allocation4]]  ;;  %s5961_s13 = sld [smem:[#allocation4 + $0x1]] }
  0xfb   :  { %5036 = vmatpush3.bf16.msra.mxu0 %v5033_v3  ;;  %v5045_v36 = vpack.c.bf16 %v498_v35, %v497_v34  ;;  %v4451_v46 = vld [vmem:[#allocation13] ss:$0 sm:$0xff]  ;;  %v402_v49 = vld [vmem:[#allocation8] sm:$0xff]  ;;  %v499_v54 = vld [vmem:[%s6499_s9 + $0x10] sm:$0xff]  ;;  %s5564_s18 = smov 120   ;;  %s5565_s5 = smov 112  }
  0xfc   :  { %5054 = vmatprep.subr.bf16.mxu1 %v5053_v27  ;;  %v500_v55 = vld [vmem:[%s6499_s9 + $0x18] sm:$0xff]  ;;  %v4458_v60 = vld [vmem:[%s6502_s12] ss:$0 sm:$0xff]  ;;  %vm1338_vm6 = vcmask 130112   ;;  %vm1681_vm7 = vcmask 195712   ;;  %s5567_s27 = smov 24  }
  0xfd   :  { %v4447_v5 = vld [vmem:[%s6540_s3] ss:$0 sm:$0xff]  ;;  %5056 = vmatpush3.bf16.msra.mxu1 %v5053_v27  ;;  %v5049_v58 = vpack.c.bf16 %v500_v55, %v499_v54  ;;  %s5566_s3 = smov 104   ;;  %vm2024_vm8 = vcmask 261312   ;;  %vm2278_vm12 = vcmask 523264   ;;  %s5568_s1 = smov [#allocation23]  }
  0xfe   :  { %4723 = vmatmul.mubr.msk.f32.vlgmr.msra.gmra.mrb[0].mxu0 %vm274_vm0, %v264_v4  ;;  %v405_v22 = vld [vmem:[%s6541_s0] sm:$0xff]  ;;  %v406_v23 = vld [vmem:[%s6541_s0 + $0x8] sm:$0xff]  ;;  %v407_v28 = vld [vmem:[%s6541_s0 + $0x10] sm:$0xff]  ;;  %5058 = vmatprep.subr.bf16.mxu1 %v5057_v33  ;;  %s4429_s25 = sshll.u32 %s5568_s1, 4  ;;  %s4430_s25 = int_to_ptr.vmem [resolvable:$true] %s4429_s25 }
  0xff   :  { %v5037_v24 = vpack.c.bf16 %v406_v23, %v405_v22  ;;  %v408_v29 = vld [vmem:[%s6541_s0 + $0x18] sm:$0xff]  ;;  %v4452_v2 = vld [vmem:[%s6498_s8] ss:$0 sm:$0xff]  ;;  %p5513_p8 = scmp.lt.s32.totalorder %s4430_s25, %s4430_s25 }
 0x100   :  { %v5041_v30 = vpack.c.bf16 %v408_v29, %v407_v28  ;;  %v4455_v3 = vld [vmem:[%s6542_s2] ss:$0 sm:$0xff]  ;;  %s253_s7 = sadd.s32 8, %s5961_s13 }
 0x101   :  { %5038 = vmatprep.subr.bf16.mxu0 %v5037_v24  ;;  %5060 = vmatpush3.bf16.msra.mxu1 %v5057_v33 }
 0x102   :  { %5040 = vmatpush3.bf16.msra.mxu0 %v5037_v24  ;;  %4768 = vmatprep.subr.mxu1 %v5562_v59 }
 0x103   :  { %5042 = vmatprep.subr.bf16.mxu0 %v5041_v30 }
 0x106   :  { %5044 = vmatpush3.bf16.msra.mxu0 %v5041_v30 }
 0x107   :  { %5046 = vmatprep.subr.bf16.mxu0 %v5045_v36 }
 0x1d1   :  { %v4724_v6 = vpop.f32.mrb[0].mxu0 }
 0x1d2   :  { %v347_v7 = vpop.f32.mrb[1].mxu0  ;;  %v353_v9 = vadd.f32 %v4724_v6, %v4447_v5 }
 0x1d3   :  { %v348_v8 = vadd.f32 %v4447_v5, %v347_v7 }
 0x1d4   :  { %v362_v11 = vsel %vm358_vm1, %v353_v9, 0.0 }
 0x1d5   :  { %v359_v10 = vsel %vm358_vm1, %v348_v8, 0.0 }
 0x1d6   :  { %360 = vadd.xlane.f32.xlu0 %v359_v10 }
 0x1da   :  { %363 = vadd.xlane.f32.xlu0 %v362_v11 }
 0x263   :  { %v361_v12 = vpop.xlane.xlu0 %360 }
 0x264   :  { %v366_v13 = vmul.f32 0.03125, %v361_v12 }
 0x266   :  { %v368_v14 = vsub.f32 %v348_v8, %v366_v13  ;;  %v221_v13 = vlaneseq }
 0x267   :  { %v364_v15 = vpop.xlane.xlu0 %363 }
 0x268   :  { %v367_v16 = vmul.f32 0.03125, %v364_v15  ;;  %v370_v17 = vmul.f32 %v368_v14, %v368_v14  ;;  %v5964_v15 = vstv %s226_s16 }
 0x26a   :  { %v369_v18 = vsub.f32 %v353_v9, %v367_v16  ;;  %v372_v19 = vsel %vm358_vm1, %v370_v17, 0.0  ;;  %v250_v17 = vstv %s5961_s13 }
 0x26b   :  { %373 = vadd.xlane.f32.xlu1 %v372_v19 }
 0x26c   :  { %v371_v20 = vmul.f32 %v369_v18, %v369_v18 }
 0x26e   :  { %v375_v21 = vsel %vm358_vm1, %v371_v20, 0.0 }
 0x26f   :  { %376 = vadd.xlane.f32.xlu1 %v375_v21 }
 0x2f8   :  { %v374_v37 = vpop.xlane.xlu1 %373 }
 0x2f9   :  { %v378_v38 = vmul.f32 0.03125, %v374_v37 }
 0x2fb   :  { %v380_v39 = vadd.f32 1e-12, %v378_v38 }
 0x2fc   :  { %v377_v40 = vpop.xlane.xlu1 %376 }
 0x2fd   :  { %5172 = vrsqrt.f32 %v380_v39  ;;  %v379_v41 = vmul.f32 0.03125, %v377_v40 }
 0x2ff   :  { %v381_v42 = vadd.f32 1e-12, %v379_v41 }
 0x301   :  { %5174 = vrsqrt.f32 %v381_v42 }
 0x307   :  { %v5173_v43 = vpop.eup %5172 }
 0x308   :  { %v384_v45 = vmul.f32 %v5173_v43, %v368_v14  ;;  %v225_v14 = vand.u32 127, %v221_v13 }
 0x30a   :  { %v392_v47 = vmul.f32 %v4450_v44, %v384_v45  ;;  %vm5967_vm4 = vcmp.ge.s32.totalorder %v225_v14, %v5964_v15  ;;  %vm5975_vm5 = vcmp.ge.s32.totalorder %v225_v14, %v250_v17 }
 0x30b   :  { %v5175_v48 = vpop.eup %5174 }
 0x30c   :  { %v385_v50 = vmul.f32 %v5175_v48, %v369_v18  ;;  %v400_v51 = vadd.f32 %v4451_v46, %v392_v47 }
 0x30e   :  { %v393_v52 = vmul.f32 %v4450_v44, %v385_v50  ;;  %v5894_v53 = vadd.f32 %v402_v49, %v400_v51 }
 0x310   :  { %v401_v56 = vadd.f32 %v4451_v46, %v393_v52  ;;  %4733 = vmatprep.mubr.msk.f32.mxu0 %vm358_vm1, %v5894_v53  ;;  %4755 = vmatprep.mubr.msk.f32.mxu1 %vm358_vm1, %v5894_v53 }
 0x312   :  { %v5906_v57 = vadd.f32 %v402_v49, %v401_v56 }
 0x314   :  { %4734 = vmatmul.mubr.msk.f32.vlgmr.msra.gmra.mrb[2].mxu0 %vm358_vm1, %v5906_v57  ;;  %4756 = vmatmul.mubr.msk.f32.vlgmr.msra.gmra.mrb[0].mxu1 %vm358_vm1, %v5906_v57 }
 0x315   :  { %5048 = vmatpush3.bf16.msra.mxu0 %v5045_v36  ;;  %4744 = vmatprep.mubr.msk.f32.mxu0 %vm358_vm1, %v5894_v53 }
 0x316   :  { %5050 = vmatprep.subr.bf16.mxu0 %v5049_v58  ;;  %4770 = vmatprep.mubr.msk.f32.mxu1 %vm5563_vm2, %v5562_v59 }
 0x319   :  { %5052 = vmatpush3.bf16.msra.mxu0 %v5049_v58 }
 0x31a   :  { %4758 = vmatprep.subr.mxu0 %v5562_v59 }
 0x31c   :  { %4745 = vmatmul.mubr.msk.f32.vlgmr.msra.gmra.mrb[4].mxu0 %vm358_vm1, %v5906_v57 }
 0x31d   :  { %4760 = vmatprep.mubr.msk.f32.mxu0 %vm5563_vm2, %v5562_v59 }
 0x3e7   :  { %v4735_v61 = vpop.f32.mrb[2].mxu0  ;;  %v4757_v62 = vpop.f32.mrb[0].mxu1 }
 0x3e8   :  { %v488_v63 = vpop.f32.mrb[3].mxu0  ;;  %v660_v0 = vpop.f32.mrb[1].mxu1  ;;  %v494_v8 = vadd.f32 %v4735_v61, %v4452_v2  ;;  %v5953_v12 = vadd.f32 %v4757_v62, %v4458_v60 }
 0x3e9   :  { %v5925_v1 = vadd.f32 %v4458_v60, %v660_v0  ;;  %v489_v5 = vadd.f32 %v4452_v2, %v488_v63 }
 0x3ea   :  { %v5950_v11 = vmul.f32 0.35355338, %v494_v8 }
 0x3eb   :  { %4769 = vmatpush3.msra.mxu1 %v5925_v1  ;;  %v5939_v9 = vmul.f32 0.35355338, %v489_v5 }
 0x3ec   :  { %4778 = vmatprep.subr.mxu1 %v5562_v59 }
 0x3ef   :  { %v4746_v4 = vpop.f32.mrb[4].mxu0 }
 0x3f0   :  { %v574_v6 = vpop.f32.mrb[5].mxu0  ;;  %v5942_v10 = vadd.f32 %v4746_v4, %v4455_v3 }
 0x3f1   :  { %v5935_v7 = vadd.f32 %v4455_v3, %v574_v6 }
 0x3f3   :  { %4759 = vmatpush3.xpose.msk.msra.mxu0 %vm671_vm3, %v5935_v7 }
 0x3f4   :  { %4763 = vmatprep.subr.mxu0 %v5562_v59 }
 0x3f6   :  { %4761 = vmatmul.mubr.msk.f32.vlgmr.msra.gmra.mrb[6].mxu0 %vm671_vm3, %v5939_v9 }
 0x3f7   :  { %4764 = vmatpush3.xpose.msk.msra.mxu0 %vm671_vm3, %v5942_v10  ;;  %4765 = vmatprep.mubr.msk.f32.mxu0 %vm5563_vm2, %v5562_v59 }
 0x3f8   :  { %4773 = vmatprep.subr.mxu0 %v5562_v59 }
 0x3fa   :  { %4766 = vmatmul.mubr.msk.f32.vlgmr.msra.gmra.mrb[8].mxu0 %vm671_vm3, %v5950_v11 }
 0x3fb   :  { %4774 = vmatpush3.msra.mxu0 %v5953_v12  ;;  %4775 = vmatprep.mubr.msk.f32.mxu0 %vm5563_vm2, %v5562_v59 }
 0x3fc   :  { %4783 = vmatprep.subr.mxu0 %v5562_v59 }
 0x4c9   :  { %v744_v18 = vpop.f32.mrb[6].mxu0 }
 0x4ca   :  { %v824_v19 = vsel %vm5967_vm4, -1e+30, %v744_v18  ;;  %v4762_v20 = vpop.f32.mrb[7].mxu0 }
 0x4cb   :  { %v826_v21 = vsel %vm671_vm3, %v824_v19, -inf }
 0x4cc   :  { %827 = vmax.xlane.f32.xlu0 %v826_v21 }
 0x4cd   :  { %v820_v23 = vpop.f32.mrb[8].mxu0 }
 0x4ce   :  { %v825_v24 = vsel %vm5975_vm5, -1e+30, %v820_v23  ;;  %v4767_v25 = vpop.f32.mrb[9].mxu0 }
 0x4cf   :  { %v829_v26 = vsel %vm671_vm3, %v825_v24, -inf }
 0x4d0   :  { %830 = vmax.xlane.f32.xlu1 %v829_v26 }
 0x4e1   :  { %1076 = vrot.lane.b32.xlu1 %v5942_v10, %s5564_s18 }
 0x4e5   :  { %996 = vrot.lane.b32.xlu1 %v5939_v9, %s5564_s18 }
 0x559   :  { %v828_v27 = vpop.xlane.xlu0 %827 }
 0x55a   :  { %v832_v28 = vsub.f32 %v824_v19, %v828_v27 }
 0x55c   :  { %v834_v29 = vmul.f32 1.442695, %v832_v28 }
 0x55d   :  { %v831_v30 = vpop.xlane.xlu1 %830 }
 0x55e   :  { %5176 = vpow2.f32 %v834_v29  ;;  %v833_v31 = vsub.f32 %v825_v24, %v831_v30 }
 0x560   :  { %v836_v32 = vmul.f32 1.442695, %v833_v31 }
 0x561   :  { %v1077_v37 = vpop.permute.xlu1 %1076 }
 0x562   :  { %5178 = vpow2.f32 %v836_v32 }
 0x565   :  { %v997_v38 = vpop.permute.xlu1 %996 }
 0x568   :  { %v5177_v33 = vpop.eup %5176 }
 0x569   :  { %v838_v34 = vsel %vm671_vm3, %v5177_v33, 0.0 }
 0x56a   :  { %839 = vadd.xlane.f32.xlu0 %v838_v34 }
 0x56c   :  { %v5179_v35 = vpop.eup %5178 }
 0x56d   :  { %v841_v36 = vsel %vm671_vm3, %v5179_v35, 0.0 }
 0x56e   :  { %842 = vadd.xlane.f32.xlu1 %v841_v36 }
 0x57f   :  { %1074 = vrot.lane.b32.xlu1 %v5950_v11, %s5564_s18 }
 0x580   :  { %998 = vrot.lane.b32.xlu0 %v5935_v7, %s5564_s18 }
 0x5f7   :  { %v840_v39 = vpop.xlane.xlu0 %839 }
 0x5f8   :  { %5180 = vrcp.f32 %v840_v39 }
 0x5fb   :  { %v843_v40 = vpop.xlane.xlu1 %842  ;;  %v999_v43 = vpop.permute.xlu0 %998 }
 0x5fc   :  { %5182 = vrcp.f32 %v843_v40 }
 0x5ff   :  { %v1075_v46 = vpop.permute.xlu1 %1074 }
 0x602   :  { %v5181_v41 = vpop.eup %5180 }
 0x603   :  { %v846_v42 = vmul.f32 %v5181_v41, %v5177_v33 }
 0x605   :  { %4771 = vmatmul.mubr.msk.f32.vlgmr.msra.gmra.mrb[2].mxu1 %vm671_vm3, %v846_v42 }
 0x606   :  { %v5183_v44 = vpop.eup %5182  ;;  %4779 = vmatpush3.xpose.msk.msra.mxu1 %vm671_vm3, %v999_v43  ;;  %4780 = vmatprep.mubr.msk.f32.mxu1 %vm5563_vm2, %v5562_v59 }
 0x607   :  { %v847_v45 = vmul.f32 %v5183_v44, %v5179_v35  ;;  %4788 = vmatprep.subr.mxu1 %v5562_v59 }
 0x609   :  { %4776 = vmatmul.mubr.msk.f32.vlgmr.msra.gmra.mrb[10].mxu0 %vm671_vm3, %v847_v45  ;;  %4781 = vmatmul.mubr.msk.f32.vlgmr.msra.gmra.mrb[4].mxu1 %vm671_vm3, %v997_v38 }
 0x60a   :  { %4784 = vmatpush3.xpose.msk.msra.mxu0 %vm671_vm3, %v1077_v37  ;;  %4785 = vmatprep.mubr.msk.f32.mxu0 %vm5563_vm2, %v5562_v59 }
 0x60b   :  { %4793 = vmatprep.subr.mxu0 %v5562_v59  ;;  %4790 = vmatprep.mubr.msk.f32.mxu1 %vm5563_vm2, %v5562_v59 }
 0x60d   :  { %4786 = vmatmul.mubr.msk.f32.vlgmr.msra.gmra.mrb[12].mxu0 %vm671_vm3, %v1075_v46 }
 0x60e   :  { %4795 = vmatprep.mubr.msk.f32.mxu0 %vm5563_vm2, %v5562_v59 }
 0x6d8   :  { %v917_v47 = vpop.f32.mrb[2].mxu1 }
 0x6d9   :  { %994 = vst.msk [vmem:[#allocation2] sm:$0xff] %vm671_vm3, %v917_v47  ;;  %v4772_v48 = vpop.f32.mrb[3].mxu1 }
 0x6dc   :  { %v990_v49 = vpop.f32.mrb[10].mxu0  ;;  %v1070_v50 = vpop.f32.mrb[4].mxu1 }
 0x6dd   :  { %995 = vst.msk [vmem:[#allocation2 + $0x8] sm:$0xff] %vm671_vm3, %v990_v49  ;;  %v1152_v51 = vsel %vm5967_vm4, -1e+30, %v1070_v50  ;;  %v4777_v52 = vpop.f32.mrb[11].mxu0  ;;  %v4782_v54 = vpop.f32.mrb[5].mxu1 }
 0x6de   :  { %v1154_v55 = vsel %vm671_vm3, %v1152_v51, -inf }
 0x6df   :  { %1155 = vmax.xlane.f32.xlu0 %v1154_v55 }
 0x6e0   :  { %v1148_v56 = vpop.f32.mrb[12].mxu0 }
 0x6e1   :  { %v1153_v58 = vsel %vm5975_vm5, -1e+30, %v1148_v56  ;;  %v4787_v60 = vpop.f32.mrb[13].mxu0 }
 0x6e2   :  { %v1157_v61 = vsel %vm671_vm3, %v1153_v58, -inf }
 0x6e3   :  { %1158 = vmax.xlane.f32.xlu1 %v1157_v61 }
 0x6f4   :  { %1254 = vrot.lane.b32.xlu1 %v5953_v12, %s5564_s18 }
 0x6f5   :  { %1177 = vrot.lane.b32.xlu0 %v5925_v1, %s5564_s18 }
 0x6f8   :  { %1343 = vrot.lane.b32.xlu1 %v5935_v7, %s5565_s5 }
 0x6fc   :  { %1421 = vrot.lane.b32.xlu1 %v5942_v10, %s5565_s5 }
 0x700   :  { %1419 = vrot.lane.b32.xlu1 %v5950_v11, %s5565_s5 }
 0x76c   :  { %v1156_v62 = vpop.xlane.xlu0 %1155 }
 0x76d   :  { %v1160_v63 = vsub.f32 %v1152_v51, %v1156_v62 }
 0x76f   :  { %v1162_v0 = vmul.f32 1.442695, %v1160_v63 }
 0x770   :  { %v1159_v2 = vpop.xlane.xlu1 %1158  ;;  %v1178_v3 = vpop.permute.xlu0 %1177 }
 0x771   :  { %5184 = vpow2.f32 %v1162_v0  ;;  %v1161_v4 = vsub.f32 %v1153_v58, %v1159_v2  ;;  %4789 = vmatpush3.msra.mxu1 %v1178_v3 }
 0x772   :  { %4798 = vmatprep.subr.mxu1 %v5562_v59 }
 0x773   :  { %v1164_v5 = vmul.f32 1.442695, %v1161_v4 }
 0x774   :  { %v1255_v6 = vpop.permute.xlu1 %1254 }
 0x775   :  { %5186 = vpow2.f32 %v1164_v5  ;;  %4794 = vmatpush3.msra.mxu0 %v1255_v6 }
 0x776   :  { %4803 = vmatprep.subr.mxu0 %v5562_v59 }
 0x778   :  { %v1344_v21 = vpop.permute.xlu1 %1343 }
 0x77b   :  { %v5185_v8 = vpop.eup %5184 }
 0x77c   :  { %v1166_v14 = vsel %vm671_vm3, %v5185_v8, 0.0  ;;  %v1422_v26 = vpop.permute.xlu1 %1421 }
 0x77d   :  { %1167 = vadd.xlane.f32.xlu0 %v1166_v14 }
 0x77f   :  { %v5187_v17 = vpop.eup %5186 }
 0x780   :  { %v1169_v18 = vsel %vm671_vm3, %v5187_v17, 0.0  ;;  %v1420_v29 = vpop.permute.xlu1 %1419 }
 0x781   :  { %1170 = vadd.xlane.f32.xlu0 %v1169_v18 }
 0x797   :  { %1341 = vrot.lane.b32.xlu0 %v5939_v9, %s5565_s5 }
 0x80a   :  { %v1168_v19 = vpop.xlane.xlu0 %1167 }
 0x80b   :  { %5188 = vrcp.f32 %v1168_v19 }
 0x80e   :  { %v1171_v20 = vpop.xlane.xlu0 %1170 }
 0x80f   :  { %5190 = vrcp.f32 %v1171_v20 }
 0x812   :  { %v1342_v28 = vpop.permute.xlu0 %1341 }
 0x815   :  { %v5189_v23 = vpop.eup %5188 }
 0x816   :  { %v1174_v24 = vmul.f32 %v5189_v23, %v5185_v8 }
 0x818   :  { %4791 = vmatmul.mubr.msk.f32.vlgmr.msra.gmra.mrb[6].mxu1 %vm671_vm3, %v1174_v24 }
 0x819   :  { %v5191_v25 = vpop.eup %5190  ;;  %4799 = vmatpush3.xpose.msk.msra.mxu1 %vm671_vm3, %v1344_v21  ;;  %4800 = vmatprep.mubr.msk.f32.mxu1 %vm5563_vm2, %v5562_v59 }
 0x81a   :  { %v1175_v27 = vmul.f32 %v5191_v25, %v5187_v17  ;;  %4808 = vmatprep.subr.mxu1 %v5562_v59 }
 0x81c   :  { %4796 = vmatmul.mubr.msk.f32.vlgmr.msra.gmra.mrb[14].mxu0 %vm671_vm3, %v1175_v27  ;;  %4801 = vmatmul.mubr.msk.f32.vlgmr.msra.gmra.mrb[8].mxu1 %vm671_vm3, %v1342_v28 }
 0x81d   :  { %4804 = vmatpush3.xpose.msk.msra.mxu0 %vm671_vm3, %v1422_v26  ;;  %4805 = vmatprep.mubr.msk.f32.mxu0 %vm5563_vm2, %v5562_v59 }
 0x81e   :  { %4813 = vmatprep.subr.mxu0 %v5562_v59  ;;  %4810 = vmatprep.mubr.msk.f32.mxu1 %vm5563_vm2, %v5562_v59 }
 0x820   :  { %4806 = vmatmul.mubr.msk.f32.vlgmr.msra.gmra.mrb[16].mxu0 %vm671_vm3, %v1420_v29 }
 0x821   :  { %4815 = vmatprep.mubr.msk.f32.mxu0 %vm5563_vm2, %v5562_v59 }
 0x8eb   :  { %v6048_v30 = vpop.f32.mrb[6].mxu1 }
 0x8ec   :  { %v4792_v31 = vpop.f32.mrb[7].mxu1 }
 0x8ef   :  { %v6050_v32 = vpop.f32.mrb[14].mxu0  ;;  %v1415_v33 = vpop.f32.mrb[8].mxu1 }
 0x8f0   :  { %v1497_v34 = vsel %vm5967_vm4, -1e+30, %v1415_v33  ;;  %v4797_v35 = vpop.f32.mrb[15].mxu0  ;;  %v4802_v36 = vpop.f32.mrb[9].mxu1 }
 0x8f1   :  { %v1499_v37 = vsel %vm671_vm3, %v1497_v34, -inf }
 0x8f2   :  { %1500 = vmax.xlane.f32.xlu0 %v1499_v37 }
 0x8f3   :  { %v1493_v38 = vpop.f32.mrb[16].mxu0 }
 0x8f4   :  { %v1498_v39 = vsel %vm5975_vm5, -1e+30, %v1493_v38  ;;  %v4807_v40 = vpop.f32.mrb[17].mxu0 }
 0x8f5   :  { %v1502_v41 = vsel %vm671_vm3, %v1498_v39, -inf }
 0x8f6   :  { %1503 = vmax.xlane.f32.xlu1 %v1502_v41 }
 0x907   :  { %1597 = vrot.lane.b32.xlu1 %v5953_v12, %s5565_s5 }
 0x908   :  { %1521 = vrot.lane.b32.xlu0 %v5925_v1, %s5565_s5 }
 0x90b   :  { %1686 = vrot.lane.b32.xlu1 %v5935_v7, %s5566_s3 }
 0x90f   :  { %1764 = vrot.lane.b32.xlu1 %v5942_v10, %s5566_s3 }
 0x913   :  { %1762 = vrot.lane.b32.xlu1 %v5950_v11, %s5566_s3 }
 0x97f   :  { %v1501_v42 = vpop.xlane.xlu0 %1500 }
 0x980   :  { %v1505_v43 = vsub.f32 %v1497_v34, %v1501_v42  ;;  %v2030_v42 = vld [vmem:[#allocation14 + $0x8] sm:$0xff] }
 0x982   :  { %v1507_v44 = vmul.f32 1.442695, %v1505_v43 }
 0x983   :  { %v1504_v45 = vpop.xlane.xlu1 %1503  ;;  %v1522_v46 = vpop.permute.xlu0 %1521 }
 0x984   :  { %5192 = vpow2.f32 %v1507_v44  ;;  %v1506_v47 = vsub.f32 %v1498_v39, %v1504_v45  ;;  %4809 = vmatpush3.msra.mxu1 %v1522_v46  ;;  %v2031_v44 = vld [vmem:[#allocation14 + $0x10] sm:$0xff]  ;;  %v2032_v45 = vld [vmem:[#allocation14 + $0x18] sm:$0xff] }
 0x985   :  { %4818 = vmatprep.subr.mxu1 %v5562_v59  ;;  %v5065_v46 = vpack.c.bf16 %v2032_v45, %v2031_v44 }
 0x986   :  { %v1509_v48 = vmul.f32 1.442695, %v1506_v47 }
 0x987   :  { %v1598_v49 = vpop.permute.xlu1 %1597 }
 0x988   :  { %5194 = vpow2.f32 %v1509_v48  ;;  %4814 = vmatpush3.msra.mxu0 %v1598_v49 }
 0x989   :  { %4823 = vmatprep.subr.mxu0 %v5562_v59 }
 0x98b   :  { %v1687_v54 = vpop.permute.xlu1 %1686 }
 0x98e   :  { %v5193_v7 = vpop.eup %5192 }
 0x98f   :  { %v1511_v10 = vsel %vm671_vm3, %v5193_v7, 0.0  ;;  %v1765_v60 = vpop.permute.xlu1 %1764 }
 0x990   :  { %1512 = vadd.xlane.f32.xlu0 %v1511_v10 }
 0x992   :  { %v5195_v11 = vpop.eup %5194 }
 0x993   :  { %v1514_v50 = vsel %vm671_vm3, %v5195_v11, 0.0  ;;  %v1763_v62 = vpop.permute.xlu1 %1762 }
 0x994   :  { %1515 = vadd.xlane.f32.xlu0 %v1514_v50 }
 0x9aa   :  { %1684 = vrot.lane.b32.xlu0 %v5939_v9, %s5566_s3 }
 0xa1d   :  { %v1513_v51 = vpop.xlane.xlu0 %1512 }
 0xa1e   :  { %5196 = vrcp.f32 %v1513_v51 }
 0xa21   :  { %v1516_v52 = vpop.xlane.xlu0 %1515 }
 0xa22   :  { %5198 = vrcp.f32 %v1516_v52  ;;  %v4485_v52 = vld [vmem:[#allocation16] ss:$0 sm:$0xff] }
 0xa25   :  { %v1685_v9 = vpop.permute.xlu0 %1684 }
 0xa28   :  { %v5197_v55 = vpop.eup %5196 }
 0xa29   :  { %v1519_v56 = vmul.f32 %v5197_v55, %v5193_v7 }
 0xa2b   :  { %4811 = vmatmul.mubr.msk.f32.vlgmr.msra.gmra.mrb[10].mxu1 %vm671_vm3, %v1519_v56 }
 0xa2c   :  { %v5199_v58 = vpop.eup %5198  ;;  %4819 = vmatpush3.xpose.msk.msra.mxu1 %vm671_vm3, %v1687_v54  ;;  %4820 = vmatprep.mubr.msk.f32.mxu1 %vm5563_vm2, %v5562_v59 }
 0xa2d   :  { %v1520_v61 = vmul.f32 %v5199_v58, %v5195_v11  ;;  %4828 = vmatprep.subr.mxu1 %v5562_v59 }
 0xa2f   :  { %4816 = vmatmul.mubr.msk.f32.vlgmr.msra.gmra.mrb[18].mxu0 %vm671_vm3, %v1520_v61  ;;  %4821 = vmatmul.mubr.msk.f32.vlgmr.msra.gmra.mrb[12].mxu1 %vm671_vm3, %v1685_v9 }
 0xa30   :  { %4824 = vmatpush3.xpose.msk.msra.mxu0 %vm671_vm3, %v1765_v60  ;;  %4825 = vmatprep.mubr.msk.f32.mxu0 %vm5563_vm2, %v5562_v59 }
 0xa31   :  { %4833 = vmatprep.subr.mxu0 %v5562_v59  ;;  %4830 = vmatprep.mubr.msk.f32.mxu1 %vm5563_vm2, %v5562_v59 }
 0xa33   :  { %4826 = vmatmul.mubr.msk.f32.vlgmr.msra.gmra.mrb[20].mxu0 %vm671_vm3, %v1763_v62 }
 0xa34   :  { %4835 = vmatprep.mubr.msk.f32.mxu0 %vm5563_vm2, %v5562_v59 }
 0xafe   :  { %v1593_v63 = vpop.f32.mrb[10].mxu1 }
 0xaff   :  { %v4812_v0 = vpop.f32.mrb[11].mxu1 }
 0xb02   :  { %v1669_v2 = vpop.f32.mrb[18].mxu0  ;;  %v1758_v3 = vpop.f32.mrb[12].mxu1 }
 0xb03   :  { %v1840_v4 = vsel %vm5967_vm4, -1e+30, %v1758_v3  ;;  %v4817_v5 = vpop.f32.mrb[19].mxu0  ;;  %v4822_v6 = vpop.f32.mrb[13].mxu1 }
 0xb04   :  { %v1842_v8 = vsel %vm671_vm3, %v1840_v4, -inf }
 0xb05   :  { %1843 = vmax.xlane.f32.xlu0 %v1842_v8 }
 0xb06   :  { %v1836_v14 = vpop.f32.mrb[20].mxu0 }
 0xb07   :  { %v1841_v17 = vsel %vm5975_vm5, -1e+30, %v1836_v14  ;;  %v4827_v18 = vpop.f32.mrb[21].mxu0 }
 0xb08   :  { %v1845_v19 = vsel %vm671_vm3, %v1841_v17, -inf }
 0xb09   :  { %1846 = vmax.xlane.f32.xlu1 %v1845_v19  ;;  %v2171_v19 = vld [vmem:[#allocation20 + $0x10] sm:$0xff] }
 0xb1a   :  { %1940 = vrot.lane.b32.xlu1 %v5953_v12, %s5566_s3 }
 0xb1e   :  { %1332 = vrot.lane.b32.xlu1 %v6048_v30, %s5551_s10 }
 0xb22   :  { %1334 = vrot.lane.b32.xlu1 %v6050_v32, %s5551_s10 }
 0xb26   :  { %1677 = vrot.lane.b32.xlu1 %v1669_v2, %s6539_s17 }
 0xb92   :  { %v1844_v20 = vpop.xlane.xlu0 %1843 }
 0xb93   :  { %v1848_v21 = vsub.f32 %v1840_v4, %v1844_v20  ;;  %v2172_v20 = vld [vmem:[#allocation20 + $0x18] sm:$0xff] }
 0xb95   :  { %v1850_v23 = vmul.f32 1.442695, %v1848_v21  ;;  %v5073_v21 = vpack.c.bf16 %v2172_v20, %v2171_v19 }
 0xb96   :  { %v1847_v24 = vpop.xlane.xlu1 %1846 }
 0xb97   :  { %5200 = vpow2.f32 %v1850_v23  ;;  %v1849_v25 = vsub.f32 %v1841_v17, %v1847_v24  ;;  %v2170_v17 = vld [vmem:[#allocation20 + $0x8] sm:$0xff]  ;;  %v2263_v23 = vld [vmem:[%s6509_s19] sm:$0xff] }
 0xb98   :  { %v2264_v24 = vld [vmem:[%s6509_s19 + $0x8] sm:$0xff] }
 0xb99   :  { %v1852_v26 = vmul.f32 1.442695, %v1849_v25  ;;  %v2265_v25 = vld [vmem:[%s6509_s19 + $0x10] sm:$0xff] }
 0xb9a   :  { %v1941_v27 = vpop.permute.xlu1 %1940 }
 0xb9b   :  { %5202 = vpow2.f32 %v1852_v26  ;;  %4834 = vmatpush3.msra.mxu0 %v1941_v27  ;;  %v5077_v26 = vpack.c.bf16 %v2264_v24, %v2263_v23  ;;  %v2266_v27 = vld [vmem:[%s6509_s19 + $0x18] sm:$0xff]  ;;  %v4498_v24 = vld [vmem:[%s6541_s0 + $0x20] sm:$0xff] }
 0xb9e   :  { %v1333_v12 = vpop.permute.xlu1 %1332 }
 0xb9f   :  { %1339 = vst.msk [vmem:[#allocation2] sm:$0xff] %vm1338_vm6, %v1333_v12  ;;  %v5081_v12 = vpack.c.bf16 %v2266_v27, %v2265_v25  ;;  %v4499_v25 = vld [vmem:[%s6541_s0 + $0x28] sm:$0xff]  ;;  %v4514_v27 = vld [vmem:[%s6501_s11 + $0x20] sm:$0xff] }
 0xba1   :  { %v5201_v28 = vpop.eup %5200 }
 0xba2   :  { %v1335_v29 = vpop.permute.xlu1 %1334  ;;  %v1854_v30 = vsel %vm671_vm3, %v5201_v28, 0.0 }
 0xba3   :  { %1340 = vst.msk [vmem:[#allocation2 + $0x8] sm:$0xff] %vm1338_vm6, %v1335_v29  ;;  %1855 = vadd.xlane.f32.xlu0 %v1854_v30  ;;  %v2268_v29 = vld [vmem:[%s6509_s19 + $0x28] sm:$0xff] }
 0xba5   :  { %v5203_v31 = vpop.eup %5202 }
 0xba6   :  { %v1678_v32 = vpop.permute.xlu1 %1677  ;;  %v1857_v33 = vsel %vm671_vm3, %v5203_v31, 0.0 }
 0xba7   :  { %1683 = vst.msk [vmem:[#allocation2 + $0x8] sm:$0xff] %vm1681_vm7, %v1678_v32  ;;  %1858 = vadd.xlane.f32.xlu0 %v1857_v33 }
 0xbbd   :  { %1864 = vrot.lane.b32.xlu0 %v5925_v1, %s5566_s3  ;;  %v2029_v1 = vld [vmem:[#allocation14] sm:$0xff] }
 0xbbe   :  { %v5061_v43 = vpack.c.bf16 %v2030_v42, %v2029_v1  ;;  %v4489_v1 = vld [vmem:[#allocation19] ss:$0 sm:$0xff]  ;;  %v254_v42 = vstv %s253_s7 }
 0xbc1   :  { %1675 = vrot.lane.b32.xlu0 %v1593_v63, %s6539_s17 }
 0xc30   :  { %v1856_v34 = vpop.xlane.xlu0 %1855 }
 0xc31   :  { %5204 = vrcp.f32 %v1856_v34 }
 0xc34   :  { %v1859_v35 = vpop.xlane.xlu0 %1858 }
 0xc35   :  { %5206 = vrcp.f32 %v1859_v35 }
 0xc38   :  { %v1865_v36 = vpop.permute.xlu0 %1864 }
 0xc39   :  { %4829 = vmatpush3.msra.mxu1 %v1865_v36 }
 0xc3a   :  { %5062 = vmatprep.subr.bf16.mxu1 %v5061_v43 }
 0xc3b   :  { %v5205_v37 = vpop.eup %5204 }
 0xc3c   :  { %v1862_v38 = vmul.f32 %v5205_v37, %v5201_v28  ;;  %v1676_v39 = vpop.permute.xlu0 %1675  ;;  %v2267_v28 = vld [vmem:[%s6509_s19 + $0x20] sm:$0xff]  ;;  %v222_v37 = vshrl.u32 %v221_v13, 7 }
 0xc3d   :  { %1682 = vst.msk [vmem:[#allocation2] sm:$0xff] %vm1681_vm7, %v1676_v39  ;;  %v5085_v30 = vpack.c.bf16 %v2268_v29, %v2267_v28  ;;  %v4500_v29 = vld [vmem:[%s6541_s0 + $0x30] sm:$0xff] }
 0xc3e   :  { %4831 = vmatmul.mubr.msk.f32.vlgmr.msra.gmra.mrb[14].mxu1 %vm671_vm3, %v1862_v38  ;;  %v223_v38 = vadd.s32 8, %v222_v37  ;;  %vm236_vm9 = vcmp.lt.s32.totalorder %v222_v37, %v5964_v15 }
 0xc3f   :  { %v5207_v40 = vpop.eup %5206  ;;  %5064 = vmatpush3.bf16.msra.mxu1 %v5061_v43  ;;  %v6149_v45 = vsel %vm236_vm9, 1.0, %v5562_v59 }
 0xc40   :  { %v1863_v41 = vmul.f32 %v5207_v40, %v5203_v31  ;;  %5066 = vmatprep.subr.bf16.mxu1 %v5065_v46  ;;  %v4488_v40 = vld [vmem:[#allocation17] ss:$0 sm:$0xff]  ;;  %vm237_vm10 = vcmp.lt.s32.totalorder %v223_v38, %v5964_v15  ;;  %vm256_vm11 = vcmp.lt.s32.totalorder %v223_v38, %v254_v42 }
 0xc41   :  { %v241_v13 = vsel %vm237_vm10, 1.0, %v5562_v59 }
 0xc42   :  { %4836 = vmatmul.mubr.msk.f32.vlgmr.msra.gmra.mrb[22].mxu0 %vm671_vm3, %v1863_v41 }
 0xc43   :  { %5068 = vmatpush3.bf16.msra.mxu1 %v5065_v46 }
 0xc44   :  { %5078 = vmatprep.subr.bf16.mxu1 %v5077_v26 }
 0xd11   :  { %v1936_v47 = vpop.f32.mrb[14].mxu1 }
 0xd12   :  { %2018 = vrot.lane.b32.xlu0 %v1936_v47, %s5567_s27  ;;  %v4832_v48 = vpop.f32.mrb[15].mxu1 }
 0xd15   :  { %v2012_v49 = vpop.f32.mrb[22].mxu0 }
 0xd16   :  { %2020 = vrot.lane.b32.xlu1 %v2012_v49, %s5567_s27  ;;  %v4837_v7 = vpop.f32.mrb[23].mxu0 }
 0xd17   :  { %v6153_v7 = vsel %vm256_vm11, 1.0, %v241_v13 }
 0xd84   :  { %v2019_v10 = vpop.permute.xlu0 %2018 }
 0xd85   :  { %2025 = vst.msk [vmem:[#allocation2] sm:$0xff] %vm2024_vm8, %v2019_v10 }
 0xd88   :  { %v2021_v11 = vpop.permute.xlu1 %2020 }
 0xd89   :  { %2026 = vst.msk [vmem:[#allocation2 + $0x8] sm:$0xff] %vm2024_vm8, %v2021_v11  ;;  %v2269_v11 = vld [vmem:[%s6509_s19 + $0x30] sm:$0xff] }
 0xd8c   :  { %v2027_v50 = vld [vmem:[#allocation2] sm:$0xff] }
 0xd8d   :  { %4846 = vmatprep.mubr.msk.f32.mxu1 %vm358_vm1, %v2027_v50  ;;  %v2270_v50 = vld [vmem:[%s6509_s19 + $0x38] sm:$0xff] }
 0xd90   :  { %v2028_v51 = vld [vmem:[#allocation2 + $0x8] sm:$0xff] }
 0xd91   :  { %4847 = vmatmul.mubr.msk.f32.vlgmr.msra.gmra.mrb[16].mxu1 %vm358_vm1, %v2028_v51  ;;  %v5089_v51 = vpack.c.bf16 %v2270_v50, %v2269_v11  ;;  %v4508_v50 = vld [vmem:[%s6499_s9 + $0x30] sm:$0xff] }
 0xd92   :  { %5080 = vmatpush3.bf16.msra.mxu1 %v5077_v26  ;;  %v5093_v26 = vpack.c.bf16 %v4499_v25, %v4498_v24 }
 0xd93   :  { %5082 = vmatprep.subr.bf16.mxu1 %v5081_v12 }
 0xd96   :  { %5084 = vmatpush3.bf16.msra.mxu1 %v5081_v12  ;;  %v4515_v12 = vld [vmem:[%s6501_s11 + $0x28] sm:$0xff] }
 0xd97   :  { %5086 = vmatprep.subr.bf16.mxu1 %v5085_v30  ;;  %v5109_v28 = vpack.c.bf16 %v4515_v12, %v4514_v27 }
 0xd9a   :  { %5088 = vmatpush3.bf16.msra.mxu1 %v5085_v30  ;;  %v4501_v30 = vld [vmem:[%s6541_s0 + $0x38] sm:$0xff] }
 0xd9b   :  { %5090 = vmatprep.subr.bf16.mxu1 %v5089_v51 }
 0xd9e   :  { %5092 = vmatpush3.bf16.msra.mxu1 %v5089_v51  ;;  %v4509_v51 = vld [vmem:[%s6499_s9 + $0x38] sm:$0xff] }
 0xd9f   :  { %5110 = vmatprep.subr.bf16.mxu1 %v5109_v28 }
 0xe64   :  { %v4848_v54 = vpop.f32.mrb[16].mxu1 }
 0xe65   :  { %v2118_v55 = vadd.f32 %v4848_v54, %v4485_v52  ;;  %v2112_v56 = vpop.f32.mrb[17].mxu1 }
 0xe66   :  { %v2113_v58 = vadd.f32 %v4485_v52, %v2112_v56  ;;  %v4490_v52 = vld [vmem:[#allocation22] ss:$0 sm:$0xff] }
 0xe67   :  { %v2122_v60 = vadd.f32 %v2118_v55, %v5906_v57 }
 0xe68   :  { %v2121_v61 = vadd.f32 %v2113_v58, %v5894_v53  ;;  %v2169_v53 = vld [vmem:[#allocation20] sm:$0xff] }
 0xe69   :  { %v2128_v9 = vsel %vm358_vm1, %v2122_v60, 0.0  ;;  %v5069_v18 = vpack.c.bf16 %v2170_v17, %v2169_v53 }
 0xe6a   :  { %2129 = vadd.xlane.f32.xlu1 %v2128_v9  ;;  %v2125_v62 = vsel %vm358_vm1, %v2121_v61, 0.0  ;;  %v4493_v9 = vld [vmem:[%s6510_s20] ss:$0 sm:$0xff] }
 0xe6b   :  { %2126 = vadd.xlane.f32.xlu0 %v2125_v62  ;;  %5070 = vmatprep.subr.bf16.mxu0 %v5069_v18 }
 0xe6c   :  { %5072 = vmatpush3.bf16.msra.mxu0 %v5069_v18 }
 0xe6d   :  { %5074 = vmatprep.subr.bf16.mxu0 %v5073_v21 }
 0xe70   :  { %5076 = vmatpush3.bf16.msra.mxu0 %v5073_v21 }
 0xe71   :  { %5094 = vmatprep.subr.bf16.mxu0 %v5093_v26 }
 0xef7   :  { %v2130_v63 = vpop.xlane.xlu1 %2129 }
 0xef8   :  { %v2132_v0 = vmul.f32 0.03125, %v2130_v63  ;;  %v2127_v2 = vpop.xlane.xlu0 %2126 }
 0xef9   :  { %v2131_v3 = vmul.f32 0.03125, %v2127_v2 }
 0xefa   :  { %v2134_v4 = vsub.f32 %v2122_v60, %v2132_v0 }
 0xefb   :  { %v2133_v5 = vsub.f32 %v2121_v61, %v2131_v3 }
 0xefc   :  { %v2136_v14 = vmul.f32 %v2134_v4, %v2134_v4 }
 0xefd   :  { %v2135_v6 = vmul.f32 %v2133_v5, %v2133_v5 }
 0xefe   :  { %v2140_v57 = vsel %vm358_vm1, %v2136_v14, 0.0 }
 0xeff   :  { %v2137_v8 = vsel %vm358_vm1, %v2135_v6, 0.0 }
 0xf00   :  { %2138 = vadd.xlane.f32.xlu0 %v2137_v8 }
 0xf04   :  { %2141 = vadd.xlane.f32.xlu0 %v2140_v57 }
 0xf8d   :  { %v2139_v31 = vpop.xlane.xlu0 %2138 }
 0xf8e   :  { %v2143_v32 = vmul.f32 0.03125, %v2139_v31  ;;  %v4516_v31 = vld [vmem:[%s6501_s11 + $0x30] sm:$0xff] }
 0xf90   :  { %v2145_v33 = vadd.f32 1e-05, %v2143_v32  ;;  %v5097_v32 = vpack.c.bf16 %v4501_v30, %v4500_v29 }
 0xf91   :  { %v2142_v34 = vpop.xlane.xlu0 %2141 }
 0xf92   :  { %5208 = vrsqrt.f32 %v2145_v33  ;;  %v2144_v35 = vmul.f32 0.03125, %v2142_v34  ;;  %v4517_v33 = vld [vmem:[%s6501_s11 + $0x38] sm:$0xff] }
 0xf93   :  { %v5113_v34 = vpack.c.bf16 %v4517_v33, %v4516_v31 }
 0xf94   :  { %v2146_v36 = vadd.f32 1e-05, %v2144_v35  ;;  %v4506_v35 = vld [vmem:[%s6499_s9 + $0x20] sm:$0xff] }
 0xf96   :  { %5210 = vrsqrt.f32 %v2146_v36  ;;  %v4507_v36 = vld [vmem:[%s6499_s9 + $0x28] sm:$0xff] }
 0xf97   :  { %v5101_v37 = vpack.c.bf16 %v4507_v36, %v4506_v35 }
 0xf9c   :  { %v5209_v39 = vpop.eup %5208 }
 0xf9d   :  { %v2149_v41 = vmul.f32 %v5209_v39, %v2133_v5 }
 0xf9f   :  { %v2157_v43 = vmul.f32 %v4488_v40, %v2149_v41 }
 0xfa0   :  { %v5211_v44 = vpop.eup %5210 }
 0xfa1   :  { %v2150_v46 = vmul.f32 %v5211_v44, %v2134_v4  ;;  %v2165_v47 = vadd.f32 %v4489_v1, %v2157_v43  ;;  %v4496_v44 = vld [vmem:[%s6511_s21] ss:$0 sm:$0xff] }
 0xfa3   :  { %v2158_v48 = vmul.f32 %v4488_v40, %v2150_v46  ;;  %v2167_v49 = vmul.f32 %v2165_v47, %v6149_v45 }
 0xfa5   :  { %v2166_v10 = vadd.f32 %v4489_v1, %v2158_v48  ;;  %4857 = vmatprep.mubr.msk.f32.mxu0 %vm358_vm1, %v2167_v49  ;;  %v4497_v48 = vld [vmem:[%s6512_s22] ss:$0 sm:$0xff] }
 0xfa7   :  { %v2168_v15 = vmul.f32 %v2166_v10, %v6153_v7 }
 0xfa9   :  { %4858 = vmatmul.mubr.msk.f32.vlgmr.msra.gmra.mrb[24].mxu0 %vm358_vm1, %v2168_v15 }
 0xfaa   :  { %5096 = vmatpush3.bf16.msra.mxu0 %v5093_v26 }
 0xfab   :  { %5098 = vmatprep.subr.bf16.mxu0 %v5097_v32 }
 0xfae   :  { %5100 = vmatpush3.bf16.msra.mxu0 %v5097_v32 }
 0xfaf   :  { %5102 = vmatprep.subr.bf16.mxu0 %v5101_v37 }
0x107c   :  { %v4859_v54 = vpop.f32.mrb[24].mxu0 }
0x107d   :  { %v2258_v55 = vadd.f32 %v4859_v54, %v4490_v52  ;;  %v2252_v56 = vpop.f32.mrb[25].mxu0 }
0x107e   :  { %v2253_v58 = vadd.f32 %v4490_v52, %v2252_v56  ;;  %v4519_v56 = vld [vmem:[%s6502_s12 + $0x1] ss:$0 sm:$0xff] }
0x107f   :  { %v2262_v61 = vmax.f32 %v2258_v55, 0.0  ;;  %v5105_v55 = vpack.c.bf16 %v4509_v51, %v4508_v50 }
0x1080   :  { %v2261_v60 = vmax.f32 %v2253_v58, 0.0 }
0x1082   :  { %4876 = vmatprep.mubr.msk.f32.mxu1 %vm2278_vm12, %v2261_v60 }
0x1083   :  { %4877 = vmatmul.mubr.msk.f32.vlgmr.msra.gmra.mrb[18].mxu1 %vm2278_vm12, %v2262_v61 }
0x1084   :  { %5112 = vmatpush3.bf16.msra.mxu1 %v5109_v28 }
0x1085   :  { %5114 = vmatprep.subr.bf16.mxu1 %v5113_v34 }
0x1088   :  { %5116 = vmatpush3.bf16.msra.mxu1 %v5113_v34 }
0x1089   :  { %4922 = vmatprep.subr.mxu1 %v5562_v59 }
0x1156   :  { %v4878_v62 = vpop.f32.mrb[18].mxu1 }
0x1157   :  { %v2357_v63 = vadd.f32 %v4878_v62, %v4493_v9  ;;  %v2351_v0 = vpop.f32.mrb[19].mxu1 }
0x1158   :  { %v2352_v2 = vadd.f32 %v4493_v9, %v2351_v0  ;;  %v4511_v0 = vld [vmem:[%s6542_s2 + $0x1] ss:$0 sm:$0xff] }
0x1159   :  { %v2361_v3 = vadd.f32 %v2357_v63, %v2168_v15  ;;  %v4503_v63 = vld [vmem:[%s6498_s8 + $0x1] ss:$0 sm:$0xff] }
0x115a   :  { %v2360_v4 = vadd.f32 %v2352_v2, %v2167_v49 }
0x115b   :  { %v2367_v5 = vsel %vm358_vm1, %v2361_v3, 0.0 }
0x115c   :  { %2368 = vadd.xlane.f32.xlu1 %v2367_v5  ;;  %v2364_v6 = vsel %vm358_vm1, %v2360_v4, 0.0 }
0x115d   :  { %2365 = vadd.xlane.f32.xlu0 %v2364_v6 }
0x11e9   :  { %v2369_v8 = vpop.xlane.xlu1 %2368 }
0x11ea   :  { %v2371_v14 = vmul.f32 0.03125, %v2369_v8  ;;  %v2366_v57 = vpop.xlane.xlu0 %2365 }
0x11eb   :  { %v2370_v53 = vmul.f32 0.03125, %v2366_v57 }
0x11ec   :  { %v2373_v17 = vsub.f32 %v2361_v3, %v2371_v14 }
0x11ed   :  { %v2372_v18 = vsub.f32 %v2360_v4, %v2370_v53 }
0x11ee   :  { %v2375_v19 = vmul.f32 %v2373_v17, %v2373_v17 }
0x11ef   :  { %v2374_v20 = vmul.f32 %v2372_v18, %v2372_v18 }
0x11f0   :  { %v2379_v21 = vsel %vm358_vm1, %v2375_v19, 0.0 }
0x11f1   :  { %2380 = vadd.xlane.f32.xlu1 %v2379_v21  ;;  %v2376_v23 = vsel %vm358_vm1, %v2374_v20, 0.0 }
0x11f2   :  { %2377 = vadd.xlane.f32.xlu0 %v2376_v23 }
0x127e   :  { %v2381_v38 = vpop.xlane.xlu1 %2380 }
0x127f   :  { %v2383_v39 = vmul.f32 0.03125, %v2381_v38  ;;  %v2378_v40 = vpop.xlane.xlu0 %2377 }
0x1280   :  { %v2382_v41 = vmul.f32 0.03125, %v2378_v40 }
0x1281   :  { %v2385_v1 = vadd.f32 1e-05, %v2383_v39 }
0x1282   :  { %v2384_v42 = vadd.f32 1e-05, %v2382_v41 }
0x1283   :  { %5212 = vrsqrt.f32 %v2385_v1 }
0x1284   :  { %5214 = vrsqrt.f32 %v2384_v42 }
0x128d   :  { %v5213_v43 = vpop.eup %5212 }
0x128e   :  { %v5215_v46 = vpop.eup %5214  ;;  %v2389_v47 = vmul.f32 %v5213_v43, %v2373_v17 }
0x128f   :  { %v2388_v13 = vmul.f32 %v5215_v46, %v2372_v18 }
0x1290   :  { %v2397_v49 = vmul.f32 %v4496_v44, %v2389_v47 }
0x1291   :  { %v2396_v10 = vmul.f32 %v4496_v44, %v2388_v13 }
0x1292   :  { %v2405_v15 = vadd.f32 %v4497_v48, %v2397_v49 }
0x1293   :  { %v2404_v11 = vadd.f32 %v4497_v48, %v2396_v10 }
0x1294   :  { %v6220_v54 = vmul.f32 %v2405_v15, %v6153_v7 }
0x1295   :  { %v6217_v52 = vmul.f32 %v2404_v11, %v6149_v45 }
0x1297   :  { %4887 = vmatprep.mubr.msk.f32.mxu0 %vm358_vm1, %v6217_v52  ;;  %4909 = vmatprep.mubr.msk.f32.mxu1 %vm358_vm1, %v6217_v52 }
0x1298   :  { %4888 = vmatmul.mubr.msk.f32.vlgmr.msra.gmra.mrb[26].mxu0 %vm358_vm1, %v6220_v54  ;;  %4910 = vmatmul.mubr.msk.f32.vlgmr.msra.gmra.mrb[20].mxu1 %vm358_vm1, %v6220_v54 }
0x1299   :  { %5104 = vmatpush3.bf16.msra.mxu0 %v5101_v37  ;;  %4898 = vmatprep.mubr.msk.f32.mxu0 %vm358_vm1, %v6217_v52 }
0x129a   :  { %5106 = vmatprep.subr.bf16.mxu0 %v5105_v55  ;;  %4924 = vmatprep.mubr.msk.f32.mxu1 %vm5563_vm2, %v5562_v59 }
0x129d   :  { %5108 = vmatpush3.bf16.msra.mxu0 %v5105_v55 }
0x129e   :  { %4912 = vmatprep.subr.mxu0 %v5562_v59 }
0x12a0   :  { %4899 = vmatmul.mubr.msk.f32.vlgmr.msra.gmra.mrb[28].mxu0 %vm358_vm1, %v6220_v54 }
0x12a1   :  { %4914 = vmatprep.mubr.msk.f32.mxu0 %vm5563_vm2, %v5562_v59 }
0x136b   :  { %v4889_v58 = vpop.f32.mrb[26].mxu0  ;;  %v4911_v60 = vpop.f32.mrb[20].mxu1 }
0x136c   :  { %v2493_v61 = vpop.f32.mrb[27].mxu0  ;;  %v2669_v9 = vpop.f32.mrb[21].mxu1  ;;  %v2499_v6 = vadd.f32 %v4889_v58, %v4503_v63  ;;  %v6270_v53 = vadd.f32 %v4911_v60, %v4519_v56 }
0x136d   :  { %v6242_v62 = vadd.f32 %v4519_v56, %v2669_v9  ;;  %v2494_v3 = vadd.f32 %v4503_v63, %v2493_v61 }
0x136e   :  { %v6267_v57 = vmul.f32 0.35355338, %v2499_v6 }
0x136f   :  { %4923 = vmatpush3.msra.mxu1 %v6242_v62  ;;  %v6256_v8 = vmul.f32 0.35355338, %v2494_v3 }
0x1370   :  { %4932 = vmatprep.subr.mxu1 %v5562_v59 }
0x1373   :  { %v4900_v2 = vpop.f32.mrb[28].mxu0 }
0x1374   :  { %v2581_v4 = vpop.f32.mrb[29].mxu0  ;;  %v6259_v14 = vadd.f32 %v4900_v2, %v4511_v0 }
0x1375   :  { %v6252_v5 = vadd.f32 %v4511_v0, %v2581_v4 }
0x1377   :  { %4913 = vmatpush3.xpose.msk.msra.mxu0 %vm671_vm3, %v6252_v5 }
0x1378   :  { %4917 = vmatprep.subr.mxu0 %v5562_v59 }
0x137a   :  { %4915 = vmatmul.mubr.msk.f32.vlgmr.msra.gmra.mrb[30].mxu0 %vm671_vm3, %v6256_v8 }
0x137b   :  { %4918 = vmatpush3.xpose.msk.msra.mxu0 %vm671_vm3, %v6259_v14  ;;  %4919 = vmatprep.mubr.msk.f32.mxu0 %vm5563_vm2, %v5562_v59 }
0x137c   :  { %4927 = vmatprep.subr.mxu0 %v5562_v59 }
0x137e   :  { %4920 = vmatmul.mubr.msk.f32.vlgmr.msra.gmra.mrb[32].mxu0 %vm671_vm3, %v6267_v57 }
0x137f   :  { %4928 = vmatpush3.msra.mxu0 %v6270_v53  ;;  %4929 = vmatprep.mubr.msk.f32.mxu0 %vm5563_vm2, %v5562_v59 }
0x1380   :  { %4937 = vmatprep.subr.mxu0 %v5562_v59 }
0x144d   :  { %v2752_v17 = vpop.f32.mrb[30].mxu0 }
0x144e   :  { %v2832_v18 = vsel %vm5967_vm4, -1e+30, %v2752_v17  ;;  %v4916_v19 = vpop.f32.mrb[31].mxu0 }
0x144f   :  { %v2834_v20 = vsel %vm671_vm3, %v2832_v18, -inf }
0x1450   :  { %2835 = vmax.xlane.f32.xlu0 %v2834_v20 }
0x1451   :  { %v2828_v21 = vpop.f32.mrb[32].mxu0 }
0x1452   :  { %v2833_v23 = vsel %vm5975_vm5, -1e+30, %v2828_v21  ;;  %v4921_v24 = vpop.f32.mrb[33].mxu0 }
0x1453   :  { %v2837_v25 = vsel %vm671_vm3, %v2833_v23, -inf }
0x1454   :  { %2838 = vmax.xlane.f32.xlu1 %v2837_v25 }
0x1465   :  { %3084 = vrot.lane.b32.xlu1 %v6259_v14, %s5564_s18 }
0x1469   :  { %3004 = vrot.lane.b32.xlu1 %v6256_v8, %s5564_s18 }
0x14dd   :  { %v2836_v26 = vpop.xlane.xlu0 %2835 }
0x14de   :  { %v2840_v27 = vsub.f32 %v2832_v18, %v2836_v26 }
0x14e0   :  { %v2842_v12 = vmul.f32 1.442695, %v2840_v27 }
0x14e1   :  { %v2839_v28 = vpop.xlane.xlu1 %2838 }
0x14e2   :  { %5216 = vpow2.f32 %v2842_v12  ;;  %v2841_v29 = vsub.f32 %v2833_v23, %v2839_v28 }
0x14e4   :  { %v2844_v30 = vmul.f32 1.442695, %v2841_v29 }
0x14e5   :  { %v3085_v35 = vpop.permute.xlu1 %3084 }
0x14e6   :  { %5218 = vpow2.f32 %v2844_v30 }
0x14e9   :  { %v3005_v36 = vpop.permute.xlu1 %3004 }
0x14ec   :  { %v5217_v31 = vpop.eup %5216 }
0x14ed   :  { %v2846_v32 = vsel %vm671_vm3, %v5217_v31, 0.0 }
0x14ee   :  { %2847 = vadd.xlane.f32.xlu0 %v2846_v32 }
0x14f0   :  { %v5219_v33 = vpop.eup %5218 }
0x14f1   :  { %v2849_v34 = vsel %vm671_vm3, %v5219_v33, 0.0 }
0x14f2   :  { %2850 = vadd.xlane.f32.xlu1 %v2849_v34 }
0x1503   :  { %3082 = vrot.lane.b32.xlu1 %v6267_v57, %s5564_s18 }
0x1504   :  { %3006 = vrot.lane.b32.xlu0 %v6252_v5, %s5564_s18 }
0x157b   :  { %v2848_v37 = vpop.xlane.xlu0 %2847 }
0x157c   :  { %5220 = vrcp.f32 %v2848_v37 }
0x157f   :  { %v2851_v38 = vpop.xlane.xlu1 %2850  ;;  %v3007_v41 = vpop.permute.xlu0 %3006 }
0x1580   :  { %5222 = vrcp.f32 %v2851_v38 }
0x1583   :  { %v3083_v43 = vpop.permute.xlu1 %3082 }
0x1586   :  { %v5221_v39 = vpop.eup %5220 }
0x1587   :  { %v2854_v40 = vmul.f32 %v5221_v39, %v5217_v31 }
0x1589   :  { %4925 = vmatmul.mubr.msk.f32.vlgmr.msra.gmra.mrb[22].mxu1 %vm671_vm3, %v2854_v40 }
0x158a   :  { %v5223_v1 = vpop.eup %5222  ;;  %4933 = vmatpush3.xpose.msk.msra.mxu1 %vm671_vm3, %v3007_v41  ;;  %4934 = vmatprep.mubr.msk.f32.mxu1 %vm5563_vm2, %v5562_v59 }
0x158b   :  { %v2855_v42 = vmul.f32 %v5223_v1, %v5219_v33  ;;  %4942 = vmatprep.subr.mxu1 %v5562_v59 }
0x158d   :  { %4930 = vmatmul.mubr.msk.f32.vlgmr.msra.gmra.mrb[34].mxu0 %vm671_vm3, %v2855_v42  ;;  %4935 = vmatmul.mubr.msk.f32.vlgmr.msra.gmra.mrb[24].mxu1 %vm671_vm3, %v3005_v36 }
0x158e   :  { %4938 = vmatpush3.xpose.msk.msra.mxu0 %vm671_vm3, %v3085_v35  ;;  %4939 = vmatprep.mubr.msk.f32.mxu0 %vm5563_vm2, %v5562_v59 }
0x158f   :  { %4947 = vmatprep.subr.mxu0 %v5562_v59  ;;  %4944 = vmatprep.mubr.msk.f32.mxu1 %vm5563_vm2, %v5562_v59 }
0x1591   :  { %4940 = vmatmul.mubr.msk.f32.vlgmr.msra.gmra.mrb[36].mxu0 %vm671_vm3, %v3083_v43 }
0x1592   :  { %4949 = vmatprep.mubr.msk.f32.mxu0 %vm5563_vm2, %v5562_v59 }
0x165c   :  { %v2925_v44 = vpop.f32.mrb[22].mxu1 }
0x165d   :  { %3002 = vst.msk [vmem:[#allocation2] sm:$0xff] %vm671_vm3, %v2925_v44  ;;  %v4926_v46 = vpop.f32.mrb[23].mxu1 }
0x1660   :  { %v2998_v47 = vpop.f32.mrb[34].mxu0  ;;  %v3078_v13 = vpop.f32.mrb[24].mxu1 }
0x1661   :  { %3003 = vst.msk [vmem:[#allocation2 + $0x8] sm:$0xff] %vm671_vm3, %v2998_v47  ;;  %v3160_v48 = vsel %vm5967_vm4, -1e+30, %v3078_v13  ;;  %v4931_v49 = vpop.f32.mrb[35].mxu0  ;;  %v4936_v10 = vpop.f32.mrb[25].mxu1 }
0x1662   :  { %v3162_v15 = vsel %vm671_vm3, %v3160_v48, -inf }
0x1663   :  { %3163 = vmax.xlane.f32.xlu0 %v3162_v15 }
0x1664   :  { %v3156_v11 = vpop.f32.mrb[36].mxu0 }
0x1665   :  { %v3161_v50 = vsel %vm5975_vm5, -1e+30, %v3156_v11  ;;  %v4941_v51 = vpop.f32.mrb[37].mxu0 }
0x1666   :  { %v3165_v55 = vsel %vm671_vm3, %v3161_v50, -inf }
0x1667   :  { %3166 = vmax.xlane.f32.xlu1 %v3165_v55 }
0x1678   :  { %3262 = vrot.lane.b32.xlu1 %v6270_v53, %s5564_s18 }
0x1679   :  { %3185 = vrot.lane.b32.xlu0 %v6242_v62, %s5564_s18 }
0x167c   :  { %3350 = vrot.lane.b32.xlu1 %v6252_v5, %s5565_s5 }
0x1680   :  { %3428 = vrot.lane.b32.xlu1 %v6259_v14, %s5565_s5 }
0x1684   :  { %3426 = vrot.lane.b32.xlu1 %v6267_v57, %s5565_s5 }
0x16f0   :  { %v3164_v56 = vpop.xlane.xlu0 %3163 }
0x16f1   :  { %v3168_v58 = vsub.f32 %v3160_v48, %v3164_v56 }
0x16f3   :  { %v3170_v60 = vmul.f32 1.442695, %v3168_v58 }
0x16f4   :  { %v3186_v61 = vpop.permute.xlu0 %3185  ;;  %v3167_v9 = vpop.xlane.xlu1 %3166 }
0x16f5   :  { %5224 = vpow2.f32 %v3170_v60  ;;  %v3169_v63 = vsub.f32 %v3161_v50, %v3167_v9  ;;  %4943 = vmatpush3.msra.mxu1 %v3186_v61 }
0x16f6   :  { %4952 = vmatprep.subr.mxu1 %v5562_v59 }
0x16f7   :  { %v3172_v0 = vmul.f32 1.442695, %v3169_v63 }
0x16f8   :  { %v3263_v2 = vpop.permute.xlu1 %3262 }
0x16f9   :  { %5226 = vpow2.f32 %v3172_v0  ;;  %4948 = vmatpush3.msra.mxu0 %v3263_v2 }
0x16fa   :  { %4957 = vmatprep.subr.mxu0 %v5562_v59 }
0x16fc   :  { %v3351_v20 = vpop.permute.xlu1 %3350 }
0x16ff   :  { %v5225_v3 = vpop.eup %5224 }
0x1700   :  { %v3174_v4 = vsel %vm671_vm3, %v5225_v3, 0.0  ;;  %v3429_v25 = vpop.permute.xlu1 %3428 }
0x1701   :  { %3175 = vadd.xlane.f32.xlu0 %v3174_v4 }
0x1703   :  { %v5227_v6 = vpop.eup %5226 }
0x1704   :  { %v3177_v17 = vsel %vm671_vm3, %v5227_v6, 0.0  ;;  %v3427_v12 = vpop.permute.xlu1 %3426 }
0x1705   :  { %3178 = vadd.xlane.f32.xlu0 %v3177_v17 }
0x171b   :  { %3348 = vrot.lane.b32.xlu0 %v6256_v8, %s5565_s5 }
0x178e   :  { %v3176_v18 = vpop.xlane.xlu0 %3175 }
0x178f   :  { %5228 = vrcp.f32 %v3176_v18 }
0x1792   :  { %v3179_v19 = vpop.xlane.xlu0 %3178 }
0x1793   :  { %5230 = vrcp.f32 %v3179_v19 }
0x1796   :  { %v3349_v27 = vpop.permute.xlu0 %3348 }
0x1799   :  { %v5229_v21 = vpop.eup %5228 }
0x179a   :  { %v3182_v23 = vmul.f32 %v5229_v21, %v5225_v3 }
0x179c   :  { %4945 = vmatmul.mubr.msk.f32.vlgmr.msra.gmra.mrb[26].mxu1 %vm671_vm3, %v3182_v23 }
0x179d   :  { %v5231_v24 = vpop.eup %5230  ;;  %4953 = vmatpush3.xpose.msk.msra.mxu1 %vm671_vm3, %v3351_v20  ;;  %4954 = vmatprep.mubr.msk.f32.mxu1 %vm5563_vm2, %v5562_v59 }
0x179e   :  { %v3183_v26 = vmul.f32 %v5231_v24, %v5227_v6  ;;  %4962 = vmatprep.subr.mxu1 %v5562_v59 }
0x17a0   :  { %4950 = vmatmul.mubr.msk.f32.vlgmr.msra.gmra.mrb[38].mxu0 %vm671_vm3, %v3183_v26  ;;  %4955 = vmatmul.mubr.msk.f32.vlgmr.msra.gmra.mrb[28].mxu1 %vm671_vm3, %v3349_v27 }
0x17a1   :  { %4958 = vmatpush3.xpose.msk.msra.mxu0 %vm671_vm3, %v3429_v25  ;;  %4959 = vmatprep.mubr.msk.f32.mxu0 %vm5563_vm2, %v5562_v59 }
0x17a2   :  { %4967 = vmatprep.subr.mxu0 %v5562_v59  ;;  %4964 = vmatprep.mubr.msk.f32.mxu1 %vm5563_vm2, %v5562_v59 }
0x17a4   :  { %4960 = vmatmul.mubr.msk.f32.vlgmr.msra.gmra.mrb[40].mxu0 %vm671_vm3, %v3427_v12 }
0x17a5   :  { %4969 = vmatprep.mubr.msk.f32.mxu0 %vm5563_vm2, %v5562_v59 }
0x186f   :  { %v6350_v28 = vpop.f32.mrb[26].mxu1 }
0x1870   :  { %v4946_v29 = vpop.f32.mrb[27].mxu1 }
0x1873   :  { %v6352_v30 = vpop.f32.mrb[38].mxu0  ;;  %v3422_v31 = vpop.f32.mrb[28].mxu1 }
0x1874   :  { %v3504_v32 = vsel %vm5967_vm4, -1e+30, %v3422_v31  ;;  %v4951_v33 = vpop.f32.mrb[39].mxu0  ;;  %v4956_v34 = vpop.f32.mrb[29].mxu1 }
0x1875   :  { %v3506_v35 = vsel %vm671_vm3, %v3504_v32, -inf }
0x1876   :  { %3507 = vmax.xlane.f32.xlu0 %v3506_v35 }
0x1877   :  { %v3500_v36 = vpop.f32.mrb[40].mxu0 }
0x1878   :  { %v3505_v37 = vsel %vm5975_vm5, -1e+30, %v3500_v36  ;;  %v4961_v38 = vpop.f32.mrb[41].mxu0 }
0x1879   :  { %v3509_v39 = vsel %vm671_vm3, %v3505_v37, -inf }
0x187a   :  { %3510 = vmax.xlane.f32.xlu1 %v3509_v39  ;;  %v4037_v39 = vld [vmem:[#allocation14 + $0x30] sm:$0xff] }
0x188b   :  { %3604 = vrot.lane.b32.xlu1 %v6270_v53, %s5565_s5 }
0x188c   :  { %3528 = vrot.lane.b32.xlu0 %v6242_v62, %s5565_s5 }
0x188f   :  { %3692 = vrot.lane.b32.xlu1 %v6252_v5, %s5566_s3 }
0x1893   :  { %3770 = vrot.lane.b32.xlu1 %v6259_v14, %s5566_s3 }
0x1897   :  { %3768 = vrot.lane.b32.xlu1 %v6267_v57, %s5566_s3 }
0x1903   :  { %v3508_v40 = vpop.xlane.xlu0 %3507 }
0x1904   :  { %v3512_v41 = vsub.f32 %v3504_v32, %v3508_v40  ;;  %v4038_v40 = vld [vmem:[#allocation14 + $0x38] sm:$0xff] }
0x1906   :  { %v3514_v1 = vmul.f32 1.442695, %v3512_v41  ;;  %v5121_v41 = vpack.c.bf16 %v4038_v40, %v4037_v39  ;;  %v4560_v40 = vld [vmem:[%s6509_s19 + $0x70] sm:$0xff] }
0x1907   :  { %v3529_v42 = vpop.permute.xlu0 %3528  ;;  %v3511_v43 = vpop.xlane.xlu1 %3510 }
0x1908   :  { %5232 = vpow2.f32 %v3514_v1  ;;  %v3513_v44 = vsub.f32 %v3505_v37, %v3511_v43  ;;  %4963 = vmatpush3.msra.mxu1 %v3529_v42  ;;  %v4036_v37 = vld [vmem:[#allocation14 + $0x28] sm:$0xff] }
0x1909   :  { %4972 = vmatprep.subr.mxu1 %v5562_v59 }
0x190a   :  { %v3516_v46 = vmul.f32 1.442695, %v3513_v44 }
0x190b   :  { %v3605_v47 = vpop.permute.xlu1 %3604 }
0x190c   :  { %5234 = vpow2.f32 %v3516_v46  ;;  %4968 = vmatpush3.msra.mxu0 %v3605_v47 }
0x190d   :  { %4977 = vmatprep.subr.mxu0 %v5562_v59 }
0x190f   :  { %v3693_v10 = vpop.permute.xlu1 %3692 }
0x1912   :  { %v5233_v5 = vpop.eup %5232 }
0x1913   :  { %v3518_v14 = vsel %vm671_vm3, %v5233_v5, 0.0  ;;  %v3771_v51 = vpop.permute.xlu1 %3770 }
0x1914   :  { %3519 = vadd.xlane.f32.xlu0 %v3518_v14 }
0x1916   :  { %v5235_v57 = vpop.eup %5234 }
0x1917   :  { %v3521_v13 = vsel %vm671_vm3, %v5235_v57, 0.0  ;;  %v3769_v56 = vpop.permute.xlu1 %3768 }
0x1918   :  { %3522 = vadd.xlane.f32.xlu0 %v3521_v13 }
0x192e   :  { %3690 = vrot.lane.b32.xlu0 %v6256_v8, %s5566_s3 }
0x19a1   :  { %v3520_v48 = vpop.xlane.xlu0 %3519 }
0x19a2   :  { %5236 = vrcp.f32 %v3520_v48 }
0x19a5   :  { %v3523_v49 = vpop.xlane.xlu0 %3522 }
0x19a6   :  { %5238 = vrcp.f32 %v3523_v49 }
0x19a9   :  { %v3691_v8 = vpop.permute.xlu0 %3690 }
0x19ac   :  { %v5237_v15 = vpop.eup %5236 }
0x19ad   :  { %v3526_v11 = vmul.f32 %v5237_v15, %v5233_v5 }
0x19af   :  { %4965 = vmatmul.mubr.msk.f32.vlgmr.msra.gmra.mrb[30].mxu1 %vm671_vm3, %v3526_v11 }
0x19b0   :  { %v5239_v50 = vpop.eup %5238  ;;  %4973 = vmatpush3.xpose.msk.msra.mxu1 %vm671_vm3, %v3693_v10  ;;  %4974 = vmatprep.mubr.msk.f32.mxu1 %vm5563_vm2, %v5562_v59 }
0x19b1   :  { %v3527_v55 = vmul.f32 %v5239_v50, %v5235_v57  ;;  %4982 = vmatprep.subr.mxu1 %v5562_v59  ;;  %v4546_v57 = vld [vmem:[#allocation16 + $0x1] ss:$0 sm:$0xff] }
0x19b3   :  { %4970 = vmatmul.mubr.msk.f32.vlgmr.msra.gmra.mrb[42].mxu0 %vm671_vm3, %v3527_v55  ;;  %4975 = vmatmul.mubr.msk.f32.vlgmr.msra.gmra.mrb[32].mxu1 %vm671_vm3, %v3691_v8 }
0x19b4   :  { %4978 = vmatpush3.xpose.msk.msra.mxu0 %vm671_vm3, %v3771_v51  ;;  %4979 = vmatprep.mubr.msk.f32.mxu0 %vm5563_vm2, %v5562_v59 }
0x19b5   :  { %4987 = vmatprep.subr.mxu0 %v5562_v59  ;;  %4984 = vmatprep.mubr.msk.f32.mxu1 %vm5563_vm2, %v5562_v59 }
0x19b7   :  { %4980 = vmatmul.mubr.msk.f32.vlgmr.msra.gmra.mrb[44].mxu0 %vm671_vm3, %v3769_v56 }
0x19b8   :  { %4989 = vmatprep.mubr.msk.f32.mxu0 %vm5563_vm2, %v5562_v59 }
0x1a82   :  { %v3600_v58 = vpop.f32.mrb[30].mxu1 }
0x1a83   :  { %v4966_v60 = vpop.f32.mrb[31].mxu1 }
0x1a86   :  { %v3676_v61 = vpop.f32.mrb[42].mxu0  ;;  %v3764_v9 = vpop.f32.mrb[32].mxu1 }
0x1a87   :  { %v3846_v63 = vsel %vm5967_vm4, -1e+30, %v3764_v9  ;;  %v4971_v0 = vpop.f32.mrb[43].mxu0  ;;  %v4976_v2 = vpop.f32.mrb[33].mxu1 }
0x1a88   :  { %v3848_v3 = vsel %vm671_vm3, %v3846_v63, -inf  ;;  %v4180_v2 = vld [vmem:[#allocation20 + $0x28] sm:$0xff] }
0x1a89   :  { %3849 = vmax.xlane.f32.xlu0 %v3848_v3 }
0x1a8a   :  { %v3842_v4 = vpop.f32.mrb[44].mxu0 }
0x1a8b   :  { %v3847_v6 = vsel %vm5975_vm5, -1e+30, %v3842_v4  ;;  %v4981_v17 = vpop.f32.mrb[45].mxu0  ;;  %v4181_v4 = vld [vmem:[#allocation20 + $0x30] sm:$0xff] }
0x1a8c   :  { %v3851_v18 = vsel %vm671_vm3, %v3847_v6, -inf }
0x1a8d   :  { %3852 = vmax.xlane.f32.xlu1 %v3851_v18  ;;  %v4554_v18 = vld [vmem:[%s6509_s19 + $0x40] sm:$0xff] }
0x1a9e   :  { %3946 = vrot.lane.b32.xlu1 %v6270_v53, %s5566_s3 }
0x1aa2   :  { %3340 = vrot.lane.b32.xlu1 %v6350_v28, %s5551_s10 }
0x1aa6   :  { %3342 = vrot.lane.b32.xlu1 %v6352_v30, %s5551_s10 }
0x1aaa   :  { %3684 = vrot.lane.b32.xlu1 %v3676_v61, %s6539_s17 }
0x1b16   :  { %v3850_v59 = vpop.xlane.xlu0 %3849 }
0x1b17   :  { %v3854_v16 = vsub.f32 %v3846_v63, %v3850_v59  ;;  %v4555_v59 = vld [vmem:[%s6509_s19 + $0x48] sm:$0xff] }
0x1b19   :  { %v3856_v19 = vmul.f32 1.442695, %v3854_v16  ;;  %v4556_v16 = vld [vmem:[%s6509_s19 + $0x50] sm:$0xff] }
0x1b1a   :  { %v3853_v22 = vpop.xlane.xlu1 %3852 }
0x1b1b   :  { %5240 = vpow2.f32 %v3856_v19  ;;  %v3855_v20 = vsub.f32 %v3847_v6, %v3853_v22  ;;  %v4182_v6 = vld [vmem:[#allocation20 + $0x38] sm:$0xff]  ;;  %v5133_v19 = vpack.c.bf16 %v4555_v59, %v4554_v18 }
0x1b1c   :  { %v5129_v17 = vpack.c.bf16 %v4182_v6, %v4181_v4  ;;  %v4557_v22 = vld [vmem:[%s6509_s19 + $0x58] sm:$0xff]  ;;  %v4568_v59 = vld [vmem:[%s6511_s21 + $0x1] ss:$0 sm:$0xff]  ;;  %s5508_s21 = scalar_lea.vmem %s4430_s25, 256 }
0x1b1d   :  { %v3858_v21 = vmul.f32 1.442695, %v3855_v20  ;;  %v5137_v20 = vpack.c.bf16 %v4557_v22, %v4556_v16  ;;  %p5509_p7 = scmp.ne.s32.totalorder %s4430_s25, %s5508_s21  ;;  %p5514_p9 = scmp.lt.s32.totalorder %s5508_s21, %s5508_s21 }
0x1b1e   :  { %v3947_v23 = vpop.permute.xlu1 %3946 }
0x1b1f   :  { %5242 = vpow2.f32 %v3858_v21  ;;  %4988 = vmatpush3.msra.mxu0 %v3947_v23  ;;  %v4558_v21 = vld [vmem:[%s6509_s19 + $0x60] sm:$0xff]  ;;  %v4559_v23 = vld [vmem:[%s6509_s19 + $0x68] sm:$0xff]  ;;  %p5515_p10 = por %p5514_p9, %p5513_p8 }
0x1b21   :  { %p5516_p11 = pnand %p5515_p10, %p5509_p7 }
0x1b22   :  { %v3341_v24 = vpop.permute.xlu1 %3340 }
0x1b23   :  { %3346 = vst.msk [vmem:[#allocation2] sm:$0xff] %vm1338_vm6, %v3341_v24  ;;  %v5141_v24 = vpack.c.bf16 %v4559_v23, %v4558_v21 }
0x1b25   :  { %v5241_v53 = vpop.eup %5240 }
0x1b26   :  { %v3343_v25 = vpop.permute.xlu1 %3342  ;;  %v3860_v26 = vsel %vm671_vm3, %v5241_v53, 0.0 }
0x1b27   :  { %3347 = vst.msk [vmem:[#allocation2 + $0x8] sm:$0xff] %vm1338_vm6, %v3343_v25  ;;  %3861 = vadd.xlane.f32.xlu0 %v3860_v26 }
0x1b29   :  { %v5243_v27 = vpop.eup %5242 }
0x1b2a   :  { %v3685_v12 = vpop.permute.xlu1 %3684  ;;  %v3863_v28 = vsel %vm671_vm3, %v5243_v27, 0.0 }
0x1b2b   :  { %3689 = vst.msk [vmem:[#allocation2 + $0x8] sm:$0xff] %vm1681_vm7, %v3685_v12  ;;  %3864 = vadd.xlane.f32.xlu0 %v3863_v28 }
0x1b41   :  { %3870 = vrot.lane.b32.xlu0 %v6242_v62, %s5566_s3  ;;  %v4035_v62 = vld [vmem:[#allocation14 + $0x20] sm:$0xff] }
0x1b42   :  { %v5117_v38 = vpack.c.bf16 %v4036_v37, %v4035_v62 }
0x1b45   :  { %3682 = vrot.lane.b32.xlu0 %v3600_v58, %s6539_s17 }
0x1bb4   :  { %v3862_v29 = vpop.xlane.xlu0 %3861 }
0x1bb5   :  { %5244 = vrcp.f32 %v3862_v29 }
0x1bb8   :  { %v3865_v30 = vpop.xlane.xlu0 %3864 }
0x1bb9   :  { %5246 = vrcp.f32 %v3865_v30  ;;  %v4549_v30 = vld [vmem:[#allocation17 + $0x1] ss:$0 sm:$0xff] }
0x1bbc   :  { %v3871_v31 = vpop.permute.xlu0 %3870 }
0x1bbd   :  { %4983 = vmatpush3.msra.mxu1 %v3871_v31 }
0x1bbe   :  { %5118 = vmatprep.subr.bf16.mxu1 %v5117_v38 }
0x1bbf   :  { %v5245_v32 = vpop.eup %5244 }
0x1bc0   :  { %v3868_v33 = vmul.f32 %v5245_v32, %v5241_v53  ;;  %v3683_v34 = vpop.permute.xlu0 %3682  ;;  %v4550_v32 = vld [vmem:[#allocation19 + $0x1] ss:$0 sm:$0xff] }
0x1bc1   :  { %3688 = vst.msk [vmem:[#allocation2] sm:$0xff] %vm1681_vm7, %v3683_v34 }
0x1bc2   :  { %4985 = vmatmul.mubr.msk.f32.vlgmr.msra.gmra.mrb[34].mxu1 %vm671_vm3, %v3868_v33 }
0x1bc3   :  { %v5247_v35 = vpop.eup %5246  ;;  %5120 = vmatpush3.bf16.msra.mxu1 %v5117_v38 }
0x1bc4   :  { %v3869_v36 = vmul.f32 %v5247_v35, %v5243_v27  ;;  %5122 = vmatprep.subr.bf16.mxu1 %v5121_v41 }
0x1bc6   :  { %4990 = vmatmul.mubr.msk.f32.vlgmr.msra.gmra.mrb[46].mxu0 %vm671_vm3, %v3869_v36 }
0x1bc7   :  { %5124 = vmatpush3.bf16.msra.mxu1 %v5121_v41  ;;  %v4561_v41 = vld [vmem:[%s6509_s19 + $0x78] sm:$0xff] }
0x1bc8   :  { %5134 = vmatprep.subr.bf16.mxu1 %v5133_v19 }
0x1c95   :  { %v3942_v1 = vpop.f32.mrb[34].mxu1 }
0x1c96   :  { %4024 = vrot.lane.b32.xlu0 %v3942_v1, %s5567_s27  ;;  %v4986_v42 = vpop.f32.mrb[35].mxu1  ;;  %v5145_v1 = vpack.c.bf16 %v4561_v41, %v4560_v40 }
0x1c97   :  { %v4551_v42 = vld [vmem:[#allocation22 + $0x1] ss:$0 sm:$0xff] }
0x1c99   :  { %v4018_v43 = vpop.f32.mrb[46].mxu0 }
0x1c9a   :  { %4026 = vrot.lane.b32.xlu1 %v4018_v43, %s5567_s27  ;;  %v4991_v44 = vpop.f32.mrb[47].mxu0 }
0x1d08   :  { %v4025_v46 = vpop.permute.xlu0 %4024 }
0x1d09   :  { %4030 = vst.msk [vmem:[#allocation2] sm:$0xff] %vm2024_vm8, %v4025_v46 }
0x1d0c   :  { %v4027_v47 = vpop.permute.xlu1 %4026 }
0x1d0d   :  { %4031 = vst.msk [vmem:[#allocation2 + $0x8] sm:$0xff] %vm2024_vm8, %v4027_v47 }
0x1d10   :  { %v4032_v5 = vld [vmem:[#allocation2] sm:$0xff] }
0x1d11   :  { %5000 = vmatprep.mubr.msk.f32.mxu1 %vm358_vm1, %v4032_v5 }
0x1d14   :  { %v4033_v14 = vld [vmem:[#allocation2 + $0x8] sm:$0xff] }
0x1d15   :  { %5001 = vmatmul.mubr.msk.f32.vlgmr.msra.gmra.mrb[36].mxu1 %vm358_vm1, %v4033_v14 }
0x1d16   :  { %5136 = vmatpush3.bf16.msra.mxu1 %v5133_v19 }
0x1d17   :  { %5138 = vmatprep.subr.bf16.mxu1 %v5137_v20 }
0x1d1a   :  { %5140 = vmatpush3.bf16.msra.mxu1 %v5137_v20  ;;  %v4569_v20 = vld [vmem:[%s6512_s22 + $0x1] ss:$0 sm:$0xff] }
0x1d1b   :  { %5142 = vmatprep.subr.bf16.mxu1 %v5141_v24 }
0x1d1e   :  { %5144 = vmatpush3.bf16.msra.mxu1 %v5141_v24 }
0x1d1f   :  { %5146 = vmatprep.subr.bf16.mxu1 %v5145_v1 }
0x1d22   :  { %5148 = vmatpush3.bf16.msra.mxu1 %v5145_v1 }
0x1de8   :  { %v5002_v13 = vpop.f32.mrb[36].mxu1 }
0x1de9   :  { %v4125_v48 = vadd.f32 %v5002_v13, %v4546_v57  ;;  %v4119_v49 = vpop.f32.mrb[37].mxu1 }
0x1dea   :  { %v4120_v10 = vadd.f32 %v4546_v57, %v4119_v49  ;;  %v4563_v57 = vld [vmem:[%s6510_s20 + $0x1] ss:$0 sm:$0xff] }
0x1deb   :  { %v4129_v15 = vadd.f32 %v4125_v48, %v6220_v54 }
0x1dec   :  { %v4128_v11 = vadd.f32 %v4120_v10, %v6217_v52  ;;  %v4179_v52 = vld [vmem:[#allocation20 + $0x20] sm:$0xff] }
0x1ded   :  { %v4137_v50 = vsel %vm358_vm1, %v4129_v15, 0.0  ;;  %v5125_v3 = vpack.c.bf16 %v4180_v2, %v4179_v52 }
0x1dee   :  { %4138 = vadd.xlane.f32.xlu1 %v4137_v50  ;;  %v4134_v51 = vsel %vm358_vm1, %v4128_v11, 0.0 }
0x1def   :  { %4135 = vadd.xlane.f32.xlu0 %v4134_v51  ;;  %5126 = vmatprep.subr.bf16.mxu0 %v5125_v3 }
0x1df0   :  { %5128 = vmatpush3.bf16.msra.mxu0 %v5125_v3 }
0x1df1   :  { %5130 = vmatprep.subr.bf16.mxu0 %v5129_v17 }
0x1df4   :  { %5132 = vmatpush3.bf16.msra.mxu0 %v5129_v17 }
0x1e7b   :  { %v4139_v55 = vpop.xlane.xlu1 %4138 }
0x1e7c   :  { %v4141_v8 = vmul.f32 0.03125, %v4139_v55  ;;  %v4136_v56 = vpop.xlane.xlu0 %4135 }
0x1e7d   :  { %v4140_v58 = vmul.f32 0.03125, %v4136_v56 }
0x1e7e   :  { %v4143_v60 = vsub.f32 %v4129_v15, %v4141_v8 }
0x1e7f   :  { %v4142_v61 = vsub.f32 %v4128_v11, %v4140_v58 }
0x1e80   :  { %v4145_v0 = vmul.f32 %v4143_v60, %v4143_v60 }
0x1e81   :  { %v4144_v9 = vmul.f32 %v4142_v61, %v4142_v61 }
0x1e82   :  { %v4149_v54 = vsel %vm358_vm1, %v4145_v0, 0.0 }
0x1e83   :  { %v4146_v63 = vsel %vm358_vm1, %v4144_v9, 0.0 }
0x1e84   :  { %4147 = vadd.xlane.f32.xlu0 %v4146_v63 }
0x1e88   :  { %4150 = vadd.xlane.f32.xlu0 %v4149_v54 }
0x1f11   :  { %v4148_v53 = vpop.xlane.xlu0 %4147 }
0x1f12   :  { %v4152_v25 = vmul.f32 0.03125, %v4148_v53 }
0x1f14   :  { %v4154_v26 = vadd.f32 1e-05, %v4152_v25 }
0x1f15   :  { %v4151_v27 = vpop.xlane.xlu0 %4150 }
0x1f16   :  { %5248 = vrsqrt.f32 %v4154_v26  ;;  %v4153_v12 = vmul.f32 0.03125, %v4151_v27 }
0x1f18   :  { %v4155_v28 = vadd.f32 1e-05, %v4153_v12 }
0x1f1a   :  { %5250 = vrsqrt.f32 %v4155_v28 }
0x1f20   :  { %v5249_v29 = vpop.eup %5248 }
0x1f21   :  { %v4158_v31 = vmul.f32 %v5249_v29, %v4142_v61 }
0x1f23   :  { %v4166_v33 = vmul.f32 %v4549_v30, %v4158_v31 }
0x1f24   :  { %v5251_v34 = vpop.eup %5250 }
0x1f25   :  { %v4159_v35 = vmul.f32 %v5251_v34, %v4143_v60  ;;  %v4174_v36 = vadd.f32 %v4550_v32, %v4166_v33 }
0x1f27   :  { %v4167_v62 = vmul.f32 %v4549_v30, %v4159_v35  ;;  %v4176_v37 = vmul.f32 %v4174_v36, %v6149_v45 }
0x1f29   :  { %v4175_v38 = vadd.f32 %v4550_v32, %v4167_v62  ;;  %5011 = vmatprep.mubr.msk.f32.mxu0 %vm358_vm1, %v4176_v37 }
0x1f2b   :  { %v4177_v39 = vmul.f32 %v4175_v38, %v6153_v7 }
0x1f2d   :  { %5012 = vmatmul.mubr.msk.f32.vlgmr.msra.gmra.mrb[48].mxu0 %vm358_vm1, %v4177_v39 }
0x2000   :  { %v5013_v43 = vpop.f32.mrb[48].mxu0 }
0x2001   :  { %v4269_v44 = vadd.f32 %v5013_v43, %v4551_v42  ;;  %v4263_v46 = vpop.f32.mrb[49].mxu0 }
0x2002   :  { %v4264_v47 = vadd.f32 %v4551_v42, %v4263_v46 }
0x2003   :  { %v4273_v14 = vmax.f32 %v4269_v44, 0.0 }
0x2004   :  { %v4272_v5 = vmax.f32 %v4264_v47, 0.0 }
0x2006   :  { %5030 = vmatprep.mubr.msk.f32.mxu1 %vm2278_vm12, %v4272_v5 }
0x2007   :  { %5031 = vmatmul.mubr.msk.f32.vlgmr.msra.gmra.mrb[38].mxu1 %vm2278_vm12, %v4273_v14 }
0x20da   :  { %v5032_v13 = vpop.f32.mrb[38].mxu1 }
0x20db   :  { %v4369_v48 = vadd.f32 %v5032_v13, %v4563_v57  ;;  %v4363_v49 = vpop.f32.mrb[39].mxu1 }
0x20dc   :  { %v4364_v10 = vadd.f32 %v4563_v57, %v4363_v49 }
0x20dd   :  { %v4373_v15 = vadd.f32 %v4369_v48, %v4177_v39 }
0x20de   :  { %v4372_v11 = vadd.f32 %v4364_v10, %v4176_v37 }
0x20df   :  { %v4381_v50 = vsel %vm358_vm1, %v4373_v15, 0.0 }
0x20e0   :  { %4382 = vadd.xlane.f32.xlu1 %v4381_v50  ;;  %v4378_v51 = vsel %vm358_vm1, %v4372_v11, 0.0 }
0x20e1   :  { %4379 = vadd.xlane.f32.xlu0 %v4378_v51 }
0x216d   :  { %v4383_v55 = vpop.xlane.xlu1 %4382 }
0x216e   :  { %v4385_v8 = vmul.f32 0.03125, %v4383_v55  ;;  %v4380_v56 = vpop.xlane.xlu0 %4379 }
0x216f   :  { %v4384_v58 = vmul.f32 0.03125, %v4380_v56 }
0x2170   :  { %v4387_v60 = vsub.f32 %v4373_v15, %v4385_v8 }
0x2171   :  { %v4386_v61 = vsub.f32 %v4372_v11, %v4384_v58 }
0x2172   :  { %v4389_v9 = vmul.f32 %v4387_v60, %v4387_v60 }
0x2173   :  { %v4388_v63 = vmul.f32 %v4386_v61, %v4386_v61 }
0x2174   :  { %v4393_v0 = vsel %vm358_vm1, %v4389_v9, 0.0 }
0x2175   :  { %4394 = vadd.xlane.f32.xlu1 %v4393_v0  ;;  %v4390_v54 = vsel %vm358_vm1, %v4388_v63, 0.0 }
0x2176   :  { %4391 = vadd.xlane.f32.xlu0 %v4390_v54 }
0x2202   :  { %v4395_v52 = vpop.xlane.xlu1 %4394 }
0x2203   :  { %v4397_v2 = vmul.f32 0.03125, %v4395_v52  ;;  %v4392_v3 = vpop.xlane.xlu0 %4391 }
0x2204   :  { %v4396_v4 = vmul.f32 0.03125, %v4392_v3 }
0x2205   :  { %v4399_v6 = vadd.f32 1e-05, %v4397_v2 }
0x2206   :  { %v4398_v17 = vadd.f32 1e-05, %v4396_v4 }
0x2207   :  { %5252 = vrsqrt.f32 %v4399_v6 }
0x2208   :  { %5254 = vrsqrt.f32 %v4398_v17 }
0x2211   :  { %v5253_v18 = vpop.eup %5252 }
0x2212   :  { %v5255_v16 = vpop.eup %5254  ;;  %v4403_v19 = vmul.f32 %v5253_v18, %v4387_v60 }
0x2213   :  { %v4402_v22 = vmul.f32 %v5255_v16, %v4386_v61 }
0x2214   :  { %v4411_v21 = vmul.f32 %v4568_v59, %v4403_v19 }
0x2215   :  { %v4410_v23 = vmul.f32 %v4568_v59, %v4402_v22 }
0x2216   :  { %v4419_v24 = vadd.f32 %v4569_v20, %v4411_v21 }
0x2217   :  { %v4418_v53 = vadd.f32 %v4569_v20, %v4410_v23 }
0x2218   :  { %v4421_v25 = vmul.f32 %v4419_v24, %v6153_v7 }
0x2219   :  { %v4420_v26 = vmul.f32 %v4418_v53, %v6149_v45 }
0x221a   :  { %4423 = vst.msk [vmem:[#allocation23 + $0x8] sm:$0xff] %vm358_vm1, %v4421_v25 }
0x221b   :  { %4422 = vst.msk [vmem:[#allocation23] sm:$0xff] %vm358_vm1, %v4420_v26 }
0x221c   :  { %5519 = shalt.err (!%p5516_p11)
}
0x221d   :  { %s5520_s4 = scalar_lea.hbm %s6513_s23, 256 }
0x221e   :  { %p5521_p12 = scmp.ne.s32.totalorder %s6513_s23, %s5520_s4  ;;  %p5524_p13 = scmp.lt.u32.totalorder %s5520_s4, %s6513_s23 }
0x2220   :  { %p5526_p0 = pnand %p5524_p13, %p5521_p12 }
0x2222   :  { %5529 = shalt.err (!%p5526_p0)
}
0x2223   :  { %4435 = dma.vmem_to_hbm [thread:$0]  %s4430_s25, 256, %s6513_s23, [#allocation7], %s5550_s29, %s5550_s29, %s5551_s10  }
0x2224   :  { %5544 = dma.done.wait [#allocation7], 256  }
0x2225   :  { %5545 = vsyncadd [#allocation7], 4294967040 }
0x2226   :  { %4439 = vsyncpa [#allocation6], 1 }
0x2227   :  { %4440 = vsyncpa [#allocation9], 1 }
0x2228   :  { %4441 = vsyncpa [#allocation12], 1 }
0x2229   :  { %4442 = vsyncpa [#allocation15], 1 }
0x222a   :  { %4443 = vsyncpa [#allocation18], 1 }
0x222b   :  { %4444 = vsyncpa [#allocation21], 1 }
0x222c   :  { %4445 = vsyncpa [#allocation7], 1 }

</bundles_post_ra>
